<compile_context>
chip_gen: v5e
topology: v5e:2x2
jax: 0.10.0
libtpu: 0.0.40
codegen_flags: <defaults>
</compile_context>

<pallas_src>
import functools

import jax
import jax.numpy as jnp
from jax.experimental import pallas as pl
from jax.experimental.pallas import tpu as pltpu


def _snet_fused_kernel(w1_ref, wt_ref, w2_ref, b_ref,   # SMEM scalars
                       x_ref, g_ref,                     # VMEM (NB, Cin, L)
                       out_ref,                          # VMEM (NB, 1, L)
                       *, H, W, Cin, NB):
    """Fused forward for NB batch elements in flattened spatial layout.

    w1_ref: SMEM (Cin*9,)  conv1 weights, [ci, kh, kw] order
    wt_ref: SMEM (Cin*9,)  TPN weights
    w2_ref: SMEM (2*9,)    conv2 weights, [ci, kh, kw] order (ci=0 -> x_, 1 -> g_)
    b_ref:  SMEM (3,)      [conv1_b, tpn_b, conv2_b]
    """
    L = H * W

    # ---- boundary masks in the flat index (computed once per grid step) ----
    # Tap (dh, dw) reads flat index p + dh*W + dw; the roll wraps, so we zero
    # positions whose source row/column would be outside the image.
    pidx = jax.lax.broadcasted_iota(jnp.int32, (1, L), 1)
    col = pidx % W
    row_ok = {-1: pidx >= W, 0: None, 1: pidx < (L - W)}
    col_ok = {-1: col >= 1, 0: None, 1: col < (W - 1)}

    def tap_mask(dh, dw):
        r, c = row_ok[dh], col_ok[dw]
        if r is None:
            return c
        if c is None:
            return r
        return jnp.logical_and(r, c)

    masks = {(dh, dw): tap_mask(dh, dw)
             for dh in (-1, 0, 1) for dw in (-1, 0, 1)}

    def conv3x3(chans, w_ref, bias):
        """chans: list of (1, L) f32 maps.  Returns (1, L) f32 = conv + bias.

        Lane shifts via pltpu.roll (XLU) + boundary masks — no misaligned
        slices.  One partial accumulator per kh row breaks the serial VALU
        dependence chain; the three partials are summed at the end.
        """
        parts = []
        for idh, dh in enumerate((-1, 0, 1)):
            acc = None
            for idw, dw in enumerate((-1, 0, 1)):
                shift = (-(dh * W + dw)) % L
                m = masks[(dh, dw)]
                for ci, ch in enumerate(chans):
                    t = pltpu.roll(ch, shift=shift, axis=1) if shift else ch
                    if m is not None:
                        t = jnp.where(m, t, 0.0)
                    term = w_ref[(ci * 3 + idh) * 3 + idw] * t
                    acc = term if acc is None else acc + term
            parts.append(acc)
        return parts[0] + parts[1] + parts[2] + bias

    # ---- NB batch elements per grid step (static unroll, NB is small) ----
    for nb in range(NB):
        x_chans = [x_ref[nb, ci:ci + 1, :].astype(jnp.float32)
                   for ci in range(Cin)]
        g_chans = [g_ref[nb, ci:ci + 1, :].astype(jnp.float32)
                   for ci in range(Cin)]

        # TPN(x) and conv1(g): Cin -> 1, 3x3, ReLU.  Stay in registers/VMEM.
        x_ = jnp.maximum(conv3x3(x_chans, wt_ref, b_ref[1]), 0.0)
        g_ = jnp.maximum(conv3x3(g_chans, w1_ref, b_ref[0]), 0.0)

        # conv2(cat((x_, g_), 1)): 2 -> 1, 3x3, no ReLU — no materialized concat.
        out = conv3x3([x_, g_], w2_ref, b_ref[2])

        out_ref[nb] = out.astype(out_ref.dtype)


def _pick_batch_block(n):
    """Largest per-step batch block that still leaves >= 2 grid steps (v7x 2 TCs)."""
    if n <= 2:
        return 1
    for nb in range(n // 2, 0, -1):
        if n % nb == 0:
            return nb
    return 1


def snet_texture_ver1_forward(x, g, params):
    """Mirrors: out = conv2(cat((tpn(x), conv1(g)), dim=1)).  Single pallas_call."""
    N, Cin, H, W = x.shape
    assert g.shape == x.shape
    L = H * W

    w1 = params["conv1_w"].reshape(-1).astype(jnp.float32)   # (Cin*9,)
    wt = params["tpn_w"].reshape(-1).astype(jnp.float32)     # (Cin*9,)
    w2 = params["conv2_w"].reshape(-1).astype(jnp.float32)   # (2*9,)
    b = jnp.stack([params["conv1_b"][0], params["tpn_b"][0],
                   params["conv2_b"][0]]).astype(jnp.float32)  # (3,)

    # Wrapper-side flatten to a lane-dense last dim (ideal when H*W % 128 == 0;
    # still correct otherwise since the block spans the full last dim).
    xf = x.reshape(N, Cin, L)
    gf = g.reshape(N, Cin, L)

    NB = _pick_batch_block(N)
    kernel = functools.partial(_snet_fused_kernel, H=H, W=W, Cin=Cin, NB=NB)

    out_flat = pl.pallas_call(
        kernel,
        out_shape=jax.ShapeDtypeStruct((N, 1, L), x.dtype),
        grid_spec=pltpu.PrefetchScalarGridSpec(
            num_scalar_prefetch=0,
            grid=(N // NB,),
            in_specs=[
                pl.BlockSpec(memory_space=pltpu.SMEM),   # conv1 weights (flat)
                pl.BlockSpec(memory_space=pltpu.SMEM),   # tpn weights (flat)
                pl.BlockSpec(memory_space=pltpu.SMEM),   # conv2 weights (flat)
                pl.BlockSpec(memory_space=pltpu.SMEM),   # biases (3,)
                pl.BlockSpec((NB, Cin, L), lambda n: (n, 0, 0)),  # x (flat)
                pl.BlockSpec((NB, Cin, L), lambda n: (n, 0, 0)),  # g (flat)
            ],
            out_specs=pl.BlockSpec((NB, 1, L), lambda n: (n, 0, 0)),
        ),
        compiler_params=pltpu.CompilerParams(
            dimension_semantics=("parallel",)),   # batch blocks are independent
    )(w1, wt, w2, b, xf, gf)

    return out_flat.reshape(N, 1, H, W)


def init_params(key, image_channels=1):
    ks = jax.random.split(key, 6)
    scale = 0.1
    return {
        # conv1_layers: image_channels -> 1, 3x3, ReLU
        "conv1_w": scale * jax.random.normal(ks[0], (1, image_channels, 3, 3), jnp.float32),
        "conv1_b": scale * jax.random.normal(ks[1], (1,), jnp.float32),
        # TPN: image_channels -> 1, 3x3, ReLU
        "tpn_w": scale * jax.random.normal(ks[2], (1, image_channels, 3, 3), jnp.float32),
        "tpn_b": scale * jax.random.normal(ks[3], (1,), jnp.float32),
        # conv2_layers(2): 2 -> 1, 3x3
        "conv2_w": scale * jax.random.normal(ks[4], (1, 2, 3, 3), jnp.float32),
        "conv2_b": scale * jax.random.normal(ks[5], (1,), jnp.float32),
    }


def _conv_ref(x, w, b, relu):
    """Pure-JAX reference (for correctness check only)."""
    y = jax.lax.conv_general_dilated(
        x, w, window_strides=(1, 1), padding="SAME",
        dimension_numbers=("NCHW", "OIHW", "NCHW"))
    y = y + b[None, :, None, None]
    return jnp.maximum(y, 0.0) if relu else y


def _forward_ref(x, g, p):
    g_ = _conv_ref(g, p["conv1_w"], p["conv1_b"], True)
    x_ = _conv_ref(x, p["tpn_w"], p["tpn_b"], True)
    return _conv_ref(jnp.concatenate([x_, g_], axis=1),
                     p["conv2_w"], p["conv2_b"], False)


if __name__ == "__main__":
    key = jax.random.PRNGKey(0)
    kx, kg, kp = jax.random.split(key, 3)

    N, C, H, W = 4, 3, 16, 16          # H*W = 256 -> lane-dense output blocks
    x = jax.random.normal(kx, (N, C, H, W), jnp.float32)
    g = jax.random.normal(kg, (N, C, H, W), jnp.float32)
    params = init_params(kp, image_channels=C)

    out = jax.block_until_ready(snet_texture_ver1_forward(x, g, params))
    assert out.shape == (N, 1, H, W), out.shape

    ref = jax.block_until_ready(_forward_ref(x, g, params))
    assert jnp.allclose(out, ref, atol=1e-4, rtol=1e-4), \
        float(jnp.max(jnp.abs(out - ref)))

    print("KERNEL_OK")
</pallas_src>

<mosaic_0001>
module attributes {stable_mosaic.version = 11 : i64} {
  func.func @_snet_fused_kernel(%arg0: i32, %arg1: memref<27xf32, #tpu.memory_space<smem>>, %arg2: memref<27xf32, #tpu.memory_space<smem>>, %arg3: memref<18xf32, #tpu.memory_space<smem>>, %arg4: memref<3xf32, #tpu.memory_space<smem>>, %arg5: memref<2x3x256xf32, #tpu.memory_space<vmem>>, %arg6: memref<2x3x256xf32, #tpu.memory_space<vmem>>, %arg7: memref<2x1x256xf32, #tpu.memory_space<vmem>>) attributes {dimension_semantics = [#tpu.dimension_semantics<parallel>], iteration_bounds = array<i64: 2>, scalar_prefetch = 0 : i64, scratch_operands = 0 : i64, tpu.core_type = #tpu.core_type<tc>, window_params = [{transform_indices = @transform_0, window_bounds = array<i64: 27>}, {transform_indices = @transform_1, window_bounds = array<i64: 27>}, {transform_indices = @transform_2, window_bounds = array<i64: 18>}, {transform_indices = @transform_3, window_bounds = array<i64: 3>}, {transform_indices = @transform_4, window_bounds = array<i64: 2, 3, 256>}, {transform_indices = @transform_5, window_bounds = array<i64: 2, 3, 256>}, {transform_indices = @transform_6, window_bounds = array<i64: 2, 1, 256>}]} {
    %0 = tpu.iota {dimensions = array<i32: 1>} : vector<1x256xi32>
    %c16_i32 = arith.constant 16 : i32
    %c0_i32 = arith.constant 0 : i32
    %1 = arith.cmpi eq, %c16_i32, %c0_i32 : i32
    %c1_i32 = arith.constant 1 : i32
    %2 = arith.select %1, %c1_i32, %c16_i32 : i32
    %3 = vector.broadcast %2 : i32 to vector<1x256xi32>
    %4 = arith.remsi %0, %3 : vector<1x256xi32>
    %c0_i32_0 = arith.constant 0 : i32
    %5 = vector.broadcast %c0_i32_0 : i32 to vector<1x256xi32>
    %6 = arith.cmpi ne, %4, %5 : vector<1x256xi32>
    %c0_i32_1 = arith.constant 0 : i32
    %7 = vector.broadcast %c0_i32_1 : i32 to vector<1x256xi32>
    %8 = arith.cmpi slt, %4, %7 : vector<1x256xi32>
    %c0_i32_2 = arith.constant 0 : i32
    %9 = arith.cmpi slt, %2, %c0_i32_2 : i32
    %10 = vector.broadcast %9 : i1 to vector<1x256xi1>
    %11 = vector.broadcast %10 : vector<1x256xi1> to vector<1x256xi1>
    %12 = arith.xori %8, %11 : vector<1x256xi1>
    %13 = arith.andi %12, %6 : vector<1x256xi1>
    %14 = vector.broadcast %2 : i32 to vector<1x256xi32>
    %15 = arith.addi %4, %14 : vector<1x256xi32>
    %16 = arith.select %13, %15, %4 : vector<1x256xi1>, vector<1x256xi32>
    %c16_i32_3 = arith.constant 16 : i32
    %17 = vector.broadcast %c16_i32_3 : i32 to vector<1x256xi32>
    %18 = arith.cmpi sge, %0, %17 : vector<1x256xi32>
    %c240_i32 = arith.constant 240 : i32
    %19 = vector.broadcast %c240_i32 : i32 to vector<1x256xi32>
    %20 = arith.cmpi slt, %0, %19 : vector<1x256xi32>
    %c1_i32_4 = arith.constant 1 : i32
    %21 = vector.broadcast %c1_i32_4 : i32 to vector<1x256xi32>
    %22 = arith.cmpi sge, %16, %21 : vector<1x256xi32>
    %c15_i32 = arith.constant 15 : i32
    %23 = vector.broadcast %c15_i32 : i32 to vector<1x256xi32>
    %24 = arith.cmpi slt, %16, %23 : vector<1x256xi32>
    %25 = arith.andi %18, %22 : vector<1x256xi1>
    %26 = arith.andi %18, %24 : vector<1x256xi1>
    %27 = arith.andi %20, %22 : vector<1x256xi1>
    %28 = arith.andi %20, %24 : vector<1x256xi1>
    %c0 = arith.constant 0 : index
    %c0_5 = arith.constant 0 : index
    %c0_6 = arith.constant 0 : index
    %29 = vector.load %arg5[%c0, %c0_5, %c0_6] : memref<2x3x256xf32, #tpu.memory_space<vmem>>, vector<1x1x256xf32>
    %30 = vector.shape_cast %29 : vector<1x1x256xf32> to vector<1x256xf32>
    %c0_7 = arith.constant 0 : index
    %c1 = arith.constant 1 : index
    %c0_8 = arith.constant 0 : index
    %31 = vector.load %arg5[%c0_7, %c1, %c0_8] : memref<2x3x256xf32, #tpu.memory_space<vmem>>, vector<1x1x256xf32>
    %32 = vector.shape_cast %31 : vector<1x1x256xf32> to vector<1x256xf32>
    %c0_9 = arith.constant 0 : index
    %c2 = arith.constant 2 : index
    %c0_10 = arith.constant 0 : index
    %33 = vector.load %arg5[%c0_9, %c2, %c0_10] : memref<2x3x256xf32, #tpu.memory_space<vmem>>, vector<1x1x256xf32>
    %34 = vector.shape_cast %33 : vector<1x1x256xf32> to vector<1x256xf32>
    %c0_11 = arith.constant 0 : index
    %c0_12 = arith.constant 0 : index
    %c0_13 = arith.constant 0 : index
    %35 = vector.load %arg6[%c0_11, %c0_12, %c0_13] : memref<2x3x256xf32, #tpu.memory_space<vmem>>, vector<1x1x256xf32>
    %36 = vector.shape_cast %35 : vector<1x1x256xf32> to vector<1x256xf32>
    %c0_14 = arith.constant 0 : index
    %c1_15 = arith.constant 1 : index
    %c0_16 = arith.constant 0 : index
    %37 = vector.load %arg6[%c0_14, %c1_15, %c0_16] : memref<2x3x256xf32, #tpu.memory_space<vmem>>, vector<1x1x256xf32>
    %38 = vector.shape_cast %37 : vector<1x1x256xf32> to vector<1x256xf32>
    %c0_17 = arith.constant 0 : index
    %c2_18 = arith.constant 2 : index
    %c0_19 = arith.constant 0 : index
    %39 = vector.load %arg6[%c0_17, %c2_18, %c0_19] : memref<2x3x256xf32, #tpu.memory_space<vmem>>, vector<1x1x256xf32>
    %40 = vector.shape_cast %39 : vector<1x1x256xf32> to vector<1x256xf32>
    %c1_20 = arith.constant 1 : index
    %41 = memref.load %arg4[%c1_20] : memref<3xf32, #tpu.memory_space<smem>>
    %c17_i32 = arith.constant 17 : i32
    %42 = tpu.dynamic_rotate %30 by %c17_i32 dim 1 : vector<1x256xf32>, i32 -> vector<1x256xf32>
    %cst = arith.constant 0.000000e+00 : f32
    %43 = vector.broadcast %cst : f32 to vector<1x256xf32>
    %44 = arith.select %25, %42, %43 : vector<1x256xi1>, vector<1x256xf32>
    %c0_21 = arith.constant 0 : index
    %45 = memref.load %arg2[%c0_21] : memref<27xf32, #tpu.memory_space<smem>>
    %46 = vector.broadcast %45 : f32 to vector<1x256xf32>
    %47 = arith.mulf %46, %44 : vector<1x256xf32>
    %c17_i32_22 = arith.constant 17 : i32
    %48 = tpu.dynamic_rotate %32 by %c17_i32_22 dim 1 : vector<1x256xf32>, i32 -> vector<1x256xf32>
    %cst_23 = arith.constant 0.000000e+00 : f32
    %49 = vector.broadcast %cst_23 : f32 to vector<1x256xf32>
    %50 = arith.select %25, %48, %49 : vector<1x256xi1>, vector<1x256xf32>
    %c9 = arith.constant 9 : index
    %51 = memref.load %arg2[%c9] : memref<27xf32, #tpu.memory_space<smem>>
    %52 = vector.broadcast %51 : f32 to vector<1x256xf32>
    %53 = arith.mulf %52, %50 : vector<1x256xf32>
    %54 = arith.addf %47, %53 : vector<1x256xf32>
    %c17_i32_24 = arith.constant 17 : i32
    %55 = tpu.dynamic_rotate %34 by %c17_i32_24 dim 1 : vector<1x256xf32>, i32 -> vector<1x256xf32>
    %cst_25 = arith.constant 0.000000e+00 : f32
    %56 = vector.broadcast %cst_25 : f32 to vector<1x256xf32>
    %57 = arith.select %25, %55, %56 : vector<1x256xi1>, vector<1x256xf32>
    %c18 = arith.constant 18 : index
    %58 = memref.load %arg2[%c18] : memref<27xf32, #tpu.memory_space<smem>>
    %59 = vector.broadcast %58 : f32 to vector<1x256xf32>
    %60 = arith.mulf %59, %57 : vector<1x256xf32>
    %61 = arith.addf %54, %60 : vector<1x256xf32>
    %c16_i32_26 = arith.constant 16 : i32
    %62 = tpu.dynamic_rotate %30 by %c16_i32_26 dim 1 : vector<1x256xf32>, i32 -> vector<1x256xf32>
    %cst_27 = arith.constant 0.000000e+00 : f32
    %63 = vector.broadcast %cst_27 : f32 to vector<1x256xf32>
    %64 = arith.select %18, %62, %63 : vector<1x256xi1>, vector<1x256xf32>
    %c1_28 = arith.constant 1 : index
    %65 = memref.load %arg2[%c1_28] : memref<27xf32, #tpu.memory_space<smem>>
    %66 = vector.broadcast %65 : f32 to vector<1x256xf32>
    %67 = arith.mulf %66, %64 : vector<1x256xf32>
    %68 = arith.addf %61, %67 : vector<1x256xf32>
    %c16_i32_29 = arith.constant 16 : i32
    %69 = tpu.dynamic_rotate %32 by %c16_i32_29 dim 1 : vector<1x256xf32>, i32 -> vector<1x256xf32>
    %cst_30 = arith.constant 0.000000e+00 : f32
    %70 = vector.broadcast %cst_30 : f32 to vector<1x256xf32>
    %71 = arith.select %18, %69, %70 : vector<1x256xi1>, vector<1x256xf32>
    %c10 = arith.constant 10 : index
    %72 = memref.load %arg2[%c10] : memref<27xf32, #tpu.memory_space<smem>>
    %73 = vector.broadcast %72 : f32 to vector<1x256xf32>
    %74 = arith.mulf %73, %71 : vector<1x256xf32>
    %75 = arith.addf %68, %74 : vector<1x256xf32>
    %c16_i32_31 = arith.constant 16 : i32
    %76 = tpu.dynamic_rotate %34 by %c16_i32_31 dim 1 : vector<1x256xf32>, i32 -> vector<1x256xf32>
    %cst_32 = arith.constant 0.000000e+00 : f32
    %77 = vector.broadcast %cst_32 : f32 to vector<1x256xf32>
    %78 = arith.select %18, %76, %77 : vector<1x256xi1>, vector<1x256xf32>
    %c19 = arith.constant 19 : index
    %79 = memref.load %arg2[%c19] : memref<27xf32, #tpu.memory_space<smem>>
    %80 = vector.broadcast %79 : f32 to vector<1x256xf32>
    %81 = arith.mulf %80, %78 : vector<1x256xf32>
    %82 = arith.addf %75, %81 : vector<1x256xf32>
    %c15_i32_33 = arith.constant 15 : i32
    %83 = tpu.dynamic_rotate %30 by %c15_i32_33 dim 1 : vector<1x256xf32>, i32 -> vector<1x256xf32>
    %cst_34 = arith.constant 0.000000e+00 : f32
    %84 = vector.broadcast %cst_34 : f32 to vector<1x256xf32>
    %85 = arith.select %26, %83, %84 : vector<1x256xi1>, vector<1x256xf32>
    %c2_35 = arith.constant 2 : index
    %86 = memref.load %arg2[%c2_35] : memref<27xf32, #tpu.memory_space<smem>>
    %87 = vector.broadcast %86 : f32 to vector<1x256xf32>
    %88 = arith.mulf %87, %85 : vector<1x256xf32>
    %89 = arith.addf %82, %88 : vector<1x256xf32>
    %c15_i32_36 = arith.constant 15 : i32
    %90 = tpu.dynamic_rotate %32 by %c15_i32_36 dim 1 : vector<1x256xf32>, i32 -> vector<1x256xf32>
    %cst_37 = arith.constant 0.000000e+00 : f32
    %91 = vector.broadcast %cst_37 : f32 to vector<1x256xf32>
    %92 = arith.select %26, %90, %91 : vector<1x256xi1>, vector<1x256xf32>
    %c11 = arith.constant 11 : index
    %93 = memref.load %arg2[%c11] : memref<27xf32, #tpu.memory_space<smem>>
    %94 = vector.broadcast %93 : f32 to vector<1x256xf32>
    %95 = arith.mulf %94, %92 : vector<1x256xf32>
    %96 = arith.addf %89, %95 : vector<1x256xf32>
    %c15_i32_38 = arith.constant 15 : i32
    %97 = tpu.dynamic_rotate %34 by %c15_i32_38 dim 1 : vector<1x256xf32>, i32 -> vector<1x256xf32>
    %cst_39 = arith.constant 0.000000e+00 : f32
    %98 = vector.broadcast %cst_39 : f32 to vector<1x256xf32>
    %99 = arith.select %26, %97, %98 : vector<1x256xi1>, vector<1x256xf32>
    %c20 = arith.constant 20 : index
    %100 = memref.load %arg2[%c20] : memref<27xf32, #tpu.memory_space<smem>>
    %101 = vector.broadcast %100 : f32 to vector<1x256xf32>
    %102 = arith.mulf %101, %99 : vector<1x256xf32>
    %103 = arith.addf %96, %102 : vector<1x256xf32>
    %c1_i32_40 = arith.constant 1 : i32
    %104 = tpu.dynamic_rotate %30 by %c1_i32_40 dim 1 : vector<1x256xf32>, i32 -> vector<1x256xf32>
    %cst_41 = arith.constant 0.000000e+00 : f32
    %105 = vector.broadcast %cst_41 : f32 to vector<1x256xf32>
    %106 = arith.select %22, %104, %105 : vector<1x256xi1>, vector<1x256xf32>
    %c3 = arith.constant 3 : index
    %107 = memref.load %arg2[%c3] : memref<27xf32, #tpu.memory_space<smem>>
    %108 = vector.broadcast %107 : f32 to vector<1x256xf32>
    %109 = arith.mulf %108, %106 : vector<1x256xf32>
    %c1_i32_42 = arith.constant 1 : i32
    %110 = tpu.dynamic_rotate %32 by %c1_i32_42 dim 1 : vector<1x256xf32>, i32 -> vector<1x256xf32>
    %cst_43 = arith.constant 0.000000e+00 : f32
    %111 = vector.broadcast %cst_43 : f32 to vector<1x256xf32>
    %112 = arith.select %22, %110, %111 : vector<1x256xi1>, vector<1x256xf32>
    %c12 = arith.constant 12 : index
    %113 = memref.load %arg2[%c12] : memref<27xf32, #tpu.memory_space<smem>>
    %114 = vector.broadcast %113 : f32 to vector<1x256xf32>
    %115 = arith.mulf %114, %112 : vector<1x256xf32>
    %116 = arith.addf %109, %115 : vector<1x256xf32>
    %c1_i32_44 = arith.constant 1 : i32
    %117 = tpu.dynamic_rotate %34 by %c1_i32_44 dim 1 : vector<1x256xf32>, i32 -> vector<1x256xf32>
    %cst_45 = arith.constant 0.000000e+00 : f32
    %118 = vector.broadcast %cst_45 : f32 to vector<1x256xf32>
    %119 = arith.select %22, %117, %118 : vector<1x256xi1>, vector<1x256xf32>
    %c21 = arith.constant 21 : index
    %120 = memref.load %arg2[%c21] : memref<27xf32, #tpu.memory_space<smem>>
    %121 = vector.broadcast %120 : f32 to vector<1x256xf32>
    %122 = arith.mulf %121, %119 : vector<1x256xf32>
    %123 = arith.addf %116, %122 : vector<1x256xf32>
    %c4 = arith.constant 4 : index
    %124 = memref.load %arg2[%c4] : memref<27xf32, #tpu.memory_space<smem>>
    %125 = vector.broadcast %124 : f32 to vector<1x256xf32>
    %126 = arith.mulf %125, %30 : vector<1x256xf32>
    %127 = arith.addf %123, %126 : vector<1x256xf32>
    %c13 = arith.constant 13 : index
    %128 = memref.load %arg2[%c13] : memref<27xf32, #tpu.memory_space<smem>>
    %129 = vector.broadcast %128 : f32 to vector<1x256xf32>
    %130 = arith.mulf %129, %32 : vector<1x256xf32>
    %131 = arith.addf %127, %130 : vector<1x256xf32>
    %c22 = arith.constant 22 : index
    %132 = memref.load %arg2[%c22] : memref<27xf32, #tpu.memory_space<smem>>
    %133 = vector.broadcast %132 : f32 to vector<1x256xf32>
    %134 = arith.mulf %133, %34 : vector<1x256xf32>
    %135 = arith.addf %131, %134 : vector<1x256xf32>
    %c255_i32 = arith.constant 255 : i32
    %136 = tpu.dynamic_rotate %30 by %c255_i32 dim 1 : vector<1x256xf32>, i32 -> vector<1x256xf32>
    %cst_46 = arith.constant 0.000000e+00 : f32
    %137 = vector.broadcast %cst_46 : f32 to vector<1x256xf32>
    %138 = arith.select %24, %136, %137 : vector<1x256xi1>, vector<1x256xf32>
    %c5 = arith.constant 5 : index
    %139 = memref.load %arg2[%c5] : memref<27xf32, #tpu.memory_space<smem>>
    %140 = vector.broadcast %139 : f32 to vector<1x256xf32>
    %141 = arith.mulf %140, %138 : vector<1x256xf32>
    %142 = arith.addf %135, %141 : vector<1x256xf32>
    %c255_i32_47 = arith.constant 255 : i32
    %143 = tpu.dynamic_rotate %32 by %c255_i32_47 dim 1 : vector<1x256xf32>, i32 -> vector<1x256xf32>
    %cst_48 = arith.constant 0.000000e+00 : f32
    %144 = vector.broadcast %cst_48 : f32 to vector<1x256xf32>
    %145 = arith.select %24, %143, %144 : vector<1x256xi1>, vector<1x256xf32>
    %c14 = arith.constant 14 : index
    %146 = memref.load %arg2[%c14] : memref<27xf32, #tpu.memory_space<smem>>
    %147 = vector.broadcast %146 : f32 to vector<1x256xf32>
    %148 = arith.mulf %147, %145 : vector<1x256xf32>
    %149 = arith.addf %142, %148 : vector<1x256xf32>
    %c255_i32_49 = arith.constant 255 : i32
    %150 = tpu.dynamic_rotate %34 by %c255_i32_49 dim 1 : vector<1x256xf32>, i32 -> vector<1x256xf32>
    %cst_50 = arith.constant 0.000000e+00 : f32
    %151 = vector.broadcast %cst_50 : f32 to vector<1x256xf32>
    %152 = arith.select %24, %150, %151 : vector<1x256xi1>, vector<1x256xf32>
    %c23 = arith.constant 23 : index
    %153 = memref.load %arg2[%c23] : memref<27xf32, #tpu.memory_space<smem>>
    %154 = vector.broadcast %153 : f32 to vector<1x256xf32>
    %155 = arith.mulf %154, %152 : vector<1x256xf32>
    %156 = arith.addf %149, %155 : vector<1x256xf32>
    %c241_i32 = arith.constant 241 : i32
    %157 = tpu.dynamic_rotate %30 by %c241_i32 dim 1 : vector<1x256xf32>, i32 -> vector<1x256xf32>
    %cst_51 = arith.constant 0.000000e+00 : f32
    %158 = vector.broadcast %cst_51 : f32 to vector<1x256xf32>
    %159 = arith.select %27, %157, %158 : vector<1x256xi1>, vector<1x256xf32>
    %c6 = arith.constant 6 : index
    %160 = memref.load %arg2[%c6] : memref<27xf32, #tpu.memory_space<smem>>
    %161 = vector.broadcast %160 : f32 to vector<1x256xf32>
    %162 = arith.mulf %161, %159 : vector<1x256xf32>
    %c241_i32_52 = arith.constant 241 : i32
    %163 = tpu.dynamic_rotate %32 by %c241_i32_52 dim 1 : vector<1x256xf32>, i32 -> vector<1x256xf32>
    %cst_53 = arith.constant 0.000000e+00 : f32
    %164 = vector.broadcast %cst_53 : f32 to vector<1x256xf32>
    %165 = arith.select %27, %163, %164 : vector<1x256xi1>, vector<1x256xf32>
    %c15 = arith.constant 15 : index
    %166 = memref.load %arg2[%c15] : memref<27xf32, #tpu.memory_space<smem>>
    %167 = vector.broadcast %166 : f32 to vector<1x256xf32>
    %168 = arith.mulf %167, %165 : vector<1x256xf32>
    %169 = arith.addf %162, %168 : vector<1x256xf32>
    %c241_i32_54 = arith.constant 241 : i32
    %170 = tpu.dynamic_rotate %34 by %c241_i32_54 dim 1 : vector<1x256xf32>, i32 -> vector<1x256xf32>
    %cst_55 = arith.constant 0.000000e+00 : f32
    %171 = vector.broadcast %cst_55 : f32 to vector<1x256xf32>
    %172 = arith.select %27, %170, %171 : vector<1x256xi1>, vector<1x256xf32>
    %c24 = arith.constant 24 : index
    %173 = memref.load %arg2[%c24] : memref<27xf32, #tpu.memory_space<smem>>
    %174 = vector.broadcast %173 : f32 to vector<1x256xf32>
    %175 = arith.mulf %174, %172 : vector<1x256xf32>
    %176 = arith.addf %169, %175 : vector<1x256xf32>
    %c240_i32_56 = arith.constant 240 : i32
    %177 = tpu.dynamic_rotate %30 by %c240_i32_56 dim 1 : vector<1x256xf32>, i32 -> vector<1x256xf32>
    %cst_57 = arith.constant 0.000000e+00 : f32
    %178 = vector.broadcast %cst_57 : f32 to vector<1x256xf32>
    %179 = arith.select %20, %177, %178 : vector<1x256xi1>, vector<1x256xf32>
    %c7 = arith.constant 7 : index
    %180 = memref.load %arg2[%c7] : memref<27xf32, #tpu.memory_space<smem>>
    %181 = vector.broadcast %180 : f32 to vector<1x256xf32>
    %182 = arith.mulf %181, %179 : vector<1x256xf32>
    %183 = arith.addf %176, %182 : vector<1x256xf32>
    %c240_i32_58 = arith.constant 240 : i32
    %184 = tpu.dynamic_rotate %32 by %c240_i32_58 dim 1 : vector<1x256xf32>, i32 -> vector<1x256xf32>
    %cst_59 = arith.constant 0.000000e+00 : f32
    %185 = vector.broadcast %cst_59 : f32 to vector<1x256xf32>
    %186 = arith.select %20, %184, %185 : vector<1x256xi1>, vector<1x256xf32>
    %c16 = arith.constant 16 : index
    %187 = memref.load %arg2[%c16] : memref<27xf32, #tpu.memory_space<smem>>
    %188 = vector.broadcast %187 : f32 to vector<1x256xf32>
    %189 = arith.mulf %188, %186 : vector<1x256xf32>
    %190 = arith.addf %183, %189 : vector<1x256xf32>
    %c240_i32_60 = arith.constant 240 : i32
    %191 = tpu.dynamic_rotate %34 by %c240_i32_60 dim 1 : vector<1x256xf32>, i32 -> vector<1x256xf32>
    %cst_61 = arith.constant 0.000000e+00 : f32
    %192 = vector.broadcast %cst_61 : f32 to vector<1x256xf32>
    %193 = arith.select %20, %191, %192 : vector<1x256xi1>, vector<1x256xf32>
    %c25 = arith.constant 25 : index
    %194 = memref.load %arg2[%c25] : memref<27xf32, #tpu.memory_space<smem>>
    %195 = vector.broadcast %194 : f32 to vector<1x256xf32>
    %196 = arith.mulf %195, %193 : vector<1x256xf32>
    %197 = arith.addf %190, %196 : vector<1x256xf32>
    %c239_i32 = arith.constant 239 : i32
    %198 = tpu.dynamic_rotate %30 by %c239_i32 dim 1 : vector<1x256xf32>, i32 -> vector<1x256xf32>
    %cst_62 = arith.constant 0.000000e+00 : f32
    %199 = vector.broadcast %cst_62 : f32 to vector<1x256xf32>
    %200 = arith.select %28, %198, %199 : vector<1x256xi1>, vector<1x256xf32>
    %c8 = arith.constant 8 : index
    %201 = memref.load %arg2[%c8] : memref<27xf32, #tpu.memory_space<smem>>
    %202 = vector.broadcast %201 : f32 to vector<1x256xf32>
    %203 = arith.mulf %202, %200 : vector<1x256xf32>
    %204 = arith.addf %197, %203 : vector<1x256xf32>
    %c239_i32_63 = arith.constant 239 : i32
    %205 = tpu.dynamic_rotate %32 by %c239_i32_63 dim 1 : vector<1x256xf32>, i32 -> vector<1x256xf32>
    %cst_64 = arith.constant 0.000000e+00 : f32
    %206 = vector.broadcast %cst_64 : f32 to vector<1x256xf32>
    %207 = arith.select %28, %205, %206 : vector<1x256xi1>, vector<1x256xf32>
    %c17 = arith.constant 17 : index
    %208 = memref.load %arg2[%c17] : memref<27xf32, #tpu.memory_space<smem>>
    %209 = vector.broadcast %208 : f32 to vector<1x256xf32>
    %210 = arith.mulf %209, %207 : vector<1x256xf32>
    %211 = arith.addf %204, %210 : vector<1x256xf32>
    %c239_i32_65 = arith.constant 239 : i32
    %212 = tpu.dynamic_rotate %34 by %c239_i32_65 dim 1 : vector<1x256xf32>, i32 -> vector<1x256xf32>
    %cst_66 = arith.constant 0.000000e+00 : f32
    %213 = vector.broadcast %cst_66 : f32 to vector<1x256xf32>
    %214 = arith.select %28, %212, %213 : vector<1x256xi1>, vector<1x256xf32>
    %c26 = arith.constant 26 : index
    %215 = memref.load %arg2[%c26] : memref<27xf32, #tpu.memory_space<smem>>
    %216 = vector.broadcast %215 : f32 to vector<1x256xf32>
    %217 = arith.mulf %216, %214 : vector<1x256xf32>
    %218 = arith.addf %211, %217 : vector<1x256xf32>
    %219 = arith.addf %103, %156 : vector<1x256xf32>
    %220 = arith.addf %219, %218 : vector<1x256xf32>
    %221 = vector.broadcast %41 : f32 to vector<1x256xf32>
    %222 = arith.addf %220, %221 : vector<1x256xf32>
    %cst_67 = arith.constant 0.000000e+00 : f32
    %223 = vector.broadcast %cst_67 : f32 to vector<1x256xf32>
    %224 = arith.maximumf %222, %223 : vector<1x256xf32>
    %c0_68 = arith.constant 0 : index
    %225 = memref.load %arg4[%c0_68] : memref<3xf32, #tpu.memory_space<smem>>
    %c17_i32_69 = arith.constant 17 : i32
    %226 = tpu.dynamic_rotate %36 by %c17_i32_69 dim 1 : vector<1x256xf32>, i32 -> vector<1x256xf32>
    %cst_70 = arith.constant 0.000000e+00 : f32
    %227 = vector.broadcast %cst_70 : f32 to vector<1x256xf32>
    %228 = arith.select %25, %226, %227 : vector<1x256xi1>, vector<1x256xf32>
    %c0_71 = arith.constant 0 : index
    %229 = memref.load %arg1[%c0_71] : memref<27xf32, #tpu.memory_space<smem>>
    %230 = vector.broadcast %229 : f32 to vector<1x256xf32>
    %231 = arith.mulf %230, %228 : vector<1x256xf32>
    %c17_i32_72 = arith.constant 17 : i32
    %232 = tpu.dynamic_rotate %38 by %c17_i32_72 dim 1 : vector<1x256xf32>, i32 -> vector<1x256xf32>
    %cst_73 = arith.constant 0.000000e+00 : f32
    %233 = vector.broadcast %cst_73 : f32 to vector<1x256xf32>
    %234 = arith.select %25, %232, %233 : vector<1x256xi1>, vector<1x256xf32>
    %c9_74 = arith.constant 9 : index
    %235 = memref.load %arg1[%c9_74] : memref<27xf32, #tpu.memory_space<smem>>
    %236 = vector.broadcast %235 : f32 to vector<1x256xf32>
    %237 = arith.mulf %236, %234 : vector<1x256xf32>
    %238 = arith.addf %231, %237 : vector<1x256xf32>
    %c17_i32_75 = arith.constant 17 : i32
    %239 = tpu.dynamic_rotate %40 by %c17_i32_75 dim 1 : vector<1x256xf32>, i32 -> vector<1x256xf32>
    %cst_76 = arith.constant 0.000000e+00 : f32
    %240 = vector.broadcast %cst_76 : f32 to vector<1x256xf32>
    %241 = arith.select %25, %239, %240 : vector<1x256xi1>, vector<1x256xf32>
    %c18_77 = arith.constant 18 : index
    %242 = memref.load %arg1[%c18_77] : memref<27xf32, #tpu.memory_space<smem>>
    %243 = vector.broadcast %242 : f32 to vector<1x256xf32>
    %244 = arith.mulf %243, %241 : vector<1x256xf32>
    %245 = arith.addf %238, %244 : vector<1x256xf32>
    %c16_i32_78 = arith.constant 16 : i32
    %246 = tpu.dynamic_rotate %36 by %c16_i32_78 dim 1 : vector<1x256xf32>, i32 -> vector<1x256xf32>
    %cst_79 = arith.constant 0.000000e+00 : f32
    %247 = vector.broadcast %cst_79 : f32 to vector<1x256xf32>
    %248 = arith.select %18, %246, %247 : vector<1x256xi1>, vector<1x256xf32>
    %c1_80 = arith.constant 1 : index
    %249 = memref.load %arg1[%c1_80] : memref<27xf32, #tpu.memory_space<smem>>
    %250 = vector.broadcast %249 : f32 to vector<1x256xf32>
    %251 = arith.mulf %250, %248 : vector<1x256xf32>
    %252 = arith.addf %245, %251 : vector<1x256xf32>
    %c16_i32_81 = arith.constant 16 : i32
    %253 = tpu.dynamic_rotate %38 by %c16_i32_81 dim 1 : vector<1x256xf32>, i32 -> vector<1x256xf32>
    %cst_82 = arith.constant 0.000000e+00 : f32
    %254 = vector.broadcast %cst_82 : f32 to vector<1x256xf32>
    %255 = arith.select %18, %253, %254 : vector<1x256xi1>, vector<1x256xf32>
    %c10_83 = arith.constant 10 : index
    %256 = memref.load %arg1[%c10_83] : memref<27xf32, #tpu.memory_space<smem>>
    %257 = vector.broadcast %256 : f32 to vector<1x256xf32>
    %258 = arith.mulf %257, %255 : vector<1x256xf32>
    %259 = arith.addf %252, %258 : vector<1x256xf32>
    %c16_i32_84 = arith.constant 16 : i32
    %260 = tpu.dynamic_rotate %40 by %c16_i32_84 dim 1 : vector<1x256xf32>, i32 -> vector<1x256xf32>
    %cst_85 = arith.constant 0.000000e+00 : f32
    %261 = vector.broadcast %cst_85 : f32 to vector<1x256xf32>
    %262 = arith.select %18, %260, %261 : vector<1x256xi1>, vector<1x256xf32>
    %c19_86 = arith.constant 19 : index
    %263 = memref.load %arg1[%c19_86] : memref<27xf32, #tpu.memory_space<smem>>
    %264 = vector.broadcast %263 : f32 to vector<1x256xf32>
    %265 = arith.mulf %264, %262 : vector<1x256xf32>
    %266 = arith.addf %259, %265 : vector<1x256xf32>
    %c15_i32_87 = arith.constant 15 : i32
    %267 = tpu.dynamic_rotate %36 by %c15_i32_87 dim 1 : vector<1x256xf32>, i32 -> vector<1x256xf32>
    %cst_88 = arith.constant 0.000000e+00 : f32
    %268 = vector.broadcast %cst_88 : f32 to vector<1x256xf32>
    %269 = arith.select %26, %267, %268 : vector<1x256xi1>, vector<1x256xf32>
    %c2_89 = arith.constant 2 : index
    %270 = memref.load %arg1[%c2_89] : memref<27xf32, #tpu.memory_space<smem>>
    %271 = vector.broadcast %270 : f32 to vector<1x256xf32>
    %272 = arith.mulf %271, %269 : vector<1x256xf32>
    %273 = arith.addf %266, %272 : vector<1x256xf32>
    %c15_i32_90 = arith.constant 15 : i32
    %274 = tpu.dynamic_rotate %38 by %c15_i32_90 dim 1 : vector<1x256xf32>, i32 -> vector<1x256xf32>
    %cst_91 = arith.constant 0.000000e+00 : f32
    %275 = vector.broadcast %cst_91 : f32 to vector<1x256xf32>
    %276 = arith.select %26, %274, %275 : vector<1x256xi1>, vector<1x256xf32>
    %c11_92 = arith.constant 11 : index
    %277 = memref.load %arg1[%c11_92] : memref<27xf32, #tpu.memory_space<smem>>
    %278 = vector.broadcast %277 : f32 to vector<1x256xf32>
    %279 = arith.mulf %278, %276 : vector<1x256xf32>
    %280 = arith.addf %273, %279 : vector<1x256xf32>
    %c15_i32_93 = arith.constant 15 : i32
    %281 = tpu.dynamic_rotate %40 by %c15_i32_93 dim 1 : vector<1x256xf32>, i32 -> vector<1x256xf32>
    %cst_94 = arith.constant 0.000000e+00 : f32
    %282 = vector.broadcast %cst_94 : f32 to vector<1x256xf32>
    %283 = arith.select %26, %281, %282 : vector<1x256xi1>, vector<1x256xf32>
    %c20_95 = arith.constant 20 : index
    %284 = memref.load %arg1[%c20_95] : memref<27xf32, #tpu.memory_space<smem>>
    %285 = vector.broadcast %284 : f32 to vector<1x256xf32>
    %286 = arith.mulf %285, %283 : vector<1x256xf32>
    %287 = arith.addf %280, %286 : vector<1x256xf32>
    %c1_i32_96 = arith.constant 1 : i32
    %288 = tpu.dynamic_rotate %36 by %c1_i32_96 dim 1 : vector<1x256xf32>, i32 -> vector<1x256xf32>
    %cst_97 = arith.constant 0.000000e+00 : f32
    %289 = vector.broadcast %cst_97 : f32 to vector<1x256xf32>
    %290 = arith.select %22, %288, %289 : vector<1x256xi1>, vector<1x256xf32>
    %c3_98 = arith.constant 3 : index
    %291 = memref.load %arg1[%c3_98] : memref<27xf32, #tpu.memory_space<smem>>
    %292 = vector.broadcast %291 : f32 to vector<1x256xf32>
    %293 = arith.mulf %292, %290 : vector<1x256xf32>
    %c1_i32_99 = arith.constant 1 : i32
    %294 = tpu.dynamic_rotate %38 by %c1_i32_99 dim 1 : vector<1x256xf32>, i32 -> vector<1x256xf32>
    %cst_100 = arith.constant 0.000000e+00 : f32
    %295 = vector.broadcast %cst_100 : f32 to vector<1x256xf32>
    %296 = arith.select %22, %294, %295 : vector<1x256xi1>, vector<1x256xf32>
    %c12_101 = arith.constant 12 : index
    %297 = memref.load %arg1[%c12_101] : memref<27xf32, #tpu.memory_space<smem>>
    %298 = vector.broadcast %297 : f32 to vector<1x256xf32>
    %299 = arith.mulf %298, %296 : vector<1x256xf32>
    %300 = arith.addf %293, %299 : vector<1x256xf32>
    %c1_i32_102 = arith.constant 1 : i32
    %301 = tpu.dynamic_rotate %40 by %c1_i32_102 dim 1 : vector<1x256xf32>, i32 -> vector<1x256xf32>
    %cst_103 = arith.constant 0.000000e+00 : f32
    %302 = vector.broadcast %cst_103 : f32 to vector<1x256xf32>
    %303 = arith.select %22, %301, %302 : vector<1x256xi1>, vector<1x256xf32>
    %c21_104 = arith.constant 21 : index
    %304 = memref.load %arg1[%c21_104] : memref<27xf32, #tpu.memory_space<smem>>
    %305 = vector.broadcast %304 : f32 to vector<1x256xf32>
    %306 = arith.mulf %305, %303 : vector<1x256xf32>
    %307 = arith.addf %300, %306 : vector<1x256xf32>
    %c4_105 = arith.constant 4 : index
    %308 = memref.load %arg1[%c4_105] : memref<27xf32, #tpu.memory_space<smem>>
    %309 = vector.broadcast %308 : f32 to vector<1x256xf32>
    %310 = arith.mulf %309, %36 : vector<1x256xf32>
    %311 = arith.addf %307, %310 : vector<1x256xf32>
    %c13_106 = arith.constant 13 : index
    %312 = memref.load %arg1[%c13_106] : memref<27xf32, #tpu.memory_space<smem>>
    %313 = vector.broadcast %312 : f32 to vector<1x256xf32>
    %314 = arith.mulf %313, %38 : vector<1x256xf32>
    %315 = arith.addf %311, %314 : vector<1x256xf32>
    %c22_107 = arith.constant 22 : index
    %316 = memref.load %arg1[%c22_107] : memref<27xf32, #tpu.memory_space<smem>>
    %317 = vector.broadcast %316 : f32 to vector<1x256xf32>
    %318 = arith.mulf %317, %40 : vector<1x256xf32>
    %319 = arith.addf %315, %318 : vector<1x256xf32>
    %c255_i32_108 = arith.constant 255 : i32
    %320 = tpu.dynamic_rotate %36 by %c255_i32_108 dim 1 : vector<1x256xf32>, i32 -> vector<1x256xf32>
    %cst_109 = arith.constant 0.000000e+00 : f32
    %321 = vector.broadcast %cst_109 : f32 to vector<1x256xf32>
    %322 = arith.select %24, %320, %321 : vector<1x256xi1>, vector<1x256xf32>
    %c5_110 = arith.constant 5 : index
    %323 = memref.load %arg1[%c5_110] : memref<27xf32, #tpu.memory_space<smem>>
    %324 = vector.broadcast %323 : f32 to vector<1x256xf32>
    %325 = arith.mulf %324, %322 : vector<1x256xf32>
    %326 = arith.addf %319, %325 : vector<1x256xf32>
    %c255_i32_111 = arith.constant 255 : i32
    %327 = tpu.dynamic_rotate %38 by %c255_i32_111 dim 1 : vector<1x256xf32>, i32 -> vector<1x256xf32>
    %cst_112 = arith.constant 0.000000e+00 : f32
    %328 = vector.broadcast %cst_112 : f32 to vector<1x256xf32>
    %329 = arith.select %24, %327, %328 : vector<1x256xi1>, vector<1x256xf32>
    %c14_113 = arith.constant 14 : index
    %330 = memref.load %arg1[%c14_113] : memref<27xf32, #tpu.memory_space<smem>>
    %331 = vector.broadcast %330 : f32 to vector<1x256xf32>
    %332 = arith.mulf %331, %329 : vector<1x256xf32>
    %333 = arith.addf %326, %332 : vector<1x256xf32>
    %c255_i32_114 = arith.constant 255 : i32
    %334 = tpu.dynamic_rotate %40 by %c255_i32_114 dim 1 : vector<1x256xf32>, i32 -> vector<1x256xf32>
    %cst_115 = arith.constant 0.000000e+00 : f32
    %335 = vector.broadcast %cst_115 : f32 to vector<1x256xf32>
    %336 = arith.select %24, %334, %335 : vector<1x256xi1>, vector<1x256xf32>
    %c23_116 = arith.constant 23 : index
    %337 = memref.load %arg1[%c23_116] : memref<27xf32, #tpu.memory_space<smem>>
    %338 = vector.broadcast %337 : f32 to vector<1x256xf32>
    %339 = arith.mulf %338, %336 : vector<1x256xf32>
    %340 = arith.addf %333, %339 : vector<1x256xf32>
    %c241_i32_117 = arith.constant 241 : i32
    %341 = tpu.dynamic_rotate %36 by %c241_i32_117 dim 1 : vector<1x256xf32>, i32 -> vector<1x256xf32>
    %cst_118 = arith.constant 0.000000e+00 : f32
    %342 = vector.broadcast %cst_118 : f32 to vector<1x256xf32>
    %343 = arith.select %27, %341, %342 : vector<1x256xi1>, vector<1x256xf32>
    %c6_119 = arith.constant 6 : index
    %344 = memref.load %arg1[%c6_119] : memref<27xf32, #tpu.memory_space<smem>>
    %345 = vector.broadcast %344 : f32 to vector<1x256xf32>
    %346 = arith.mulf %345, %343 : vector<1x256xf32>
    %c241_i32_120 = arith.constant 241 : i32
    %347 = tpu.dynamic_rotate %38 by %c241_i32_120 dim 1 : vector<1x256xf32>, i32 -> vector<1x256xf32>
    %cst_121 = arith.constant 0.000000e+00 : f32
    %348 = vector.broadcast %cst_121 : f32 to vector<1x256xf32>
    %349 = arith.select %27, %347, %348 : vector<1x256xi1>, vector<1x256xf32>
    %c15_122 = arith.constant 15 : index
    %350 = memref.load %arg1[%c15_122] : memref<27xf32, #tpu.memory_space<smem>>
    %351 = vector.broadcast %350 : f32 to vector<1x256xf32>
    %352 = arith.mulf %351, %349 : vector<1x256xf32>
    %353 = arith.addf %346, %352 : vector<1x256xf32>
    %c241_i32_123 = arith.constant 241 : i32
    %354 = tpu.dynamic_rotate %40 by %c241_i32_123 dim 1 : vector<1x256xf32>, i32 -> vector<1x256xf32>
    %cst_124 = arith.constant 0.000000e+00 : f32
    %355 = vector.broadcast %cst_124 : f32 to vector<1x256xf32>
    %356 = arith.select %27, %354, %355 : vector<1x256xi1>, vector<1x256xf32>
    %c24_125 = arith.constant 24 : index
    %357 = memref.load %arg1[%c24_125] : memref<27xf32, #tpu.memory_space<smem>>
    %358 = vector.broadcast %357 : f32 to vector<1x256xf32>
    %359 = arith.mulf %358, %356 : vector<1x256xf32>
    %360 = arith.addf %353, %359 : vector<1x256xf32>
    %c240_i32_126 = arith.constant 240 : i32
    %361 = tpu.dynamic_rotate %36 by %c240_i32_126 dim 1 : vector<1x256xf32>, i32 -> vector<1x256xf32>
    %cst_127 = arith.constant 0.000000e+00 : f32
    %362 = vector.broadcast %cst_127 : f32 to vector<1x256xf32>
    %363 = arith.select %20, %361, %362 : vector<1x256xi1>, vector<1x256xf32>
    %c7_128 = arith.constant 7 : index
    %364 = memref.load %arg1[%c7_128] : memref<27xf32, #tpu.memory_space<smem>>
    %365 = vector.broadcast %364 : f32 to vector<1x256xf32>
    %366 = arith.mulf %365, %363 : vector<1x256xf32>
    %367 = arith.addf %360, %366 : vector<1x256xf32>
    %c240_i32_129 = arith.constant 240 : i32
    %368 = tpu.dynamic_rotate %38 by %c240_i32_129 dim 1 : vector<1x256xf32>, i32 -> vector<1x256xf32>
    %cst_130 = arith.constant 0.000000e+00 : f32
    %369 = vector.broadcast %cst_130 : f32 to vector<1x256xf32>
    %370 = arith.select %20, %368, %369 : vector<1x256xi1>, vector<1x256xf32>
    %c16_131 = arith.constant 16 : index
    %371 = memref.load %arg1[%c16_131] : memref<27xf32, #tpu.memory_space<smem>>
    %372 = vector.broadcast %371 : f32 to vector<1x256xf32>
    %373 = arith.mulf %372, %370 : vector<1x256xf32>
    %374 = arith.addf %367, %373 : vector<1x256xf32>
    %c240_i32_132 = arith.constant 240 : i32
    %375 = tpu.dynamic_rotate %40 by %c240_i32_132 dim 1 : vector<1x256xf32>, i32 -> vector<1x256xf32>
    %cst_133 = arith.constant 0.000000e+00 : f32
    %376 = vector.broadcast %cst_133 : f32 to vector<1x256xf32>
    %377 = arith.select %20, %375, %376 : vector<1x256xi1>, vector<1x256xf32>
    %c25_134 = arith.constant 25 : index
    %378 = memref.load %arg1[%c25_134] : memref<27xf32, #tpu.memory_space<smem>>
    %379 = vector.broadcast %378 : f32 to vector<1x256xf32>
    %380 = arith.mulf %379, %377 : vector<1x256xf32>
    %381 = arith.addf %374, %380 : vector<1x256xf32>
    %c239_i32_135 = arith.constant 239 : i32
    %382 = tpu.dynamic_rotate %36 by %c239_i32_135 dim 1 : vector<1x256xf32>, i32 -> vector<1x256xf32>
    %cst_136 = arith.constant 0.000000e+00 : f32
    %383 = vector.broadcast %cst_136 : f32 to vector<1x256xf32>
    %384 = arith.select %28, %382, %383 : vector<1x256xi1>, vector<1x256xf32>
    %c8_137 = arith.constant 8 : index
    %385 = memref.load %arg1[%c8_137] : memref<27xf32, #tpu.memory_space<smem>>
    %386 = vector.broadcast %385 : f32 to vector<1x256xf32>
    %387 = arith.mulf %386, %384 : vector<1x256xf32>
    %388 = arith.addf %381, %387 : vector<1x256xf32>
    %c239_i32_138 = arith.constant 239 : i32
    %389 = tpu.dynamic_rotate %38 by %c239_i32_138 dim 1 : vector<1x256xf32>, i32 -> vector<1x256xf32>
    %cst_139 = arith.constant 0.000000e+00 : f32
    %390 = vector.broadcast %cst_139 : f32 to vector<1x256xf32>
    %391 = arith.select %28, %389, %390 : vector<1x256xi1>, vector<1x256xf32>
    %c17_140 = arith.constant 17 : index
    %392 = memref.load %arg1[%c17_140] : memref<27xf32, #tpu.memory_space<smem>>
    %393 = vector.broadcast %392 : f32 to vector<1x256xf32>
    %394 = arith.mulf %393, %391 : vector<1x256xf32>
    %395 = arith.addf %388, %394 : vector<1x256xf32>
    %c239_i32_141 = arith.constant 239 : i32
    %396 = tpu.dynamic_rotate %40 by %c239_i32_141 dim 1 : vector<1x256xf32>, i32 -> vector<1x256xf32>
    %cst_142 = arith.constant 0.000000e+00 : f32
    %397 = vector.broadcast %cst_142 : f32 to vector<1x256xf32>
    %398 = arith.select %28, %396, %397 : vector<1x256xi1>, vector<1x256xf32>
    %c26_143 = arith.constant 26 : index
    %399 = memref.load %arg1[%c26_143] : memref<27xf32, #tpu.memory_space<smem>>
    %400 = vector.broadcast %399 : f32 to vector<1x256xf32>
    %401 = arith.mulf %400, %398 : vector<1x256xf32>
    %402 = arith.addf %395, %401 : vector<1x256xf32>
    %403 = arith.addf %287, %340 : vector<1x256xf32>
    %404 = arith.addf %403, %402 : vector<1x256xf32>
    %405 = vector.broadcast %225 : f32 to vector<1x256xf32>
    %406 = arith.addf %404, %405 : vector<1x256xf32>
    %cst_144 = arith.constant 0.000000e+00 : f32
    %407 = vector.broadcast %cst_144 : f32 to vector<1x256xf32>
    %408 = arith.maximumf %406, %407 : vector<1x256xf32>
    %c2_145 = arith.constant 2 : index
    %409 = memref.load %arg4[%c2_145] : memref<3xf32, #tpu.memory_space<smem>>
    %c17_i32_146 = arith.constant 17 : i32
    %410 = tpu.dynamic_rotate %224 by %c17_i32_146 dim 1 : vector<1x256xf32>, i32 -> vector<1x256xf32>
    %cst_147 = arith.constant 0.000000e+00 : f32
    %411 = vector.broadcast %cst_147 : f32 to vector<1x256xf32>
    %412 = arith.select %25, %410, %411 : vector<1x256xi1>, vector<1x256xf32>
    %c0_148 = arith.constant 0 : index
    %413 = memref.load %arg3[%c0_148] : memref<18xf32, #tpu.memory_space<smem>>
    %414 = vector.broadcast %413 : f32 to vector<1x256xf32>
    %415 = arith.mulf %414, %412 : vector<1x256xf32>
    %c17_i32_149 = arith.constant 17 : i32
    %416 = tpu.dynamic_rotate %408 by %c17_i32_149 dim 1 : vector<1x256xf32>, i32 -> vector<1x256xf32>
    %cst_150 = arith.constant 0.000000e+00 : f32
    %417 = vector.broadcast %cst_150 : f32 to vector<1x256xf32>
    %418 = arith.select %25, %416, %417 : vector<1x256xi1>, vector<1x256xf32>
    %c9_151 = arith.constant 9 : index
    %419 = memref.load %arg3[%c9_151] : memref<18xf32, #tpu.memory_space<smem>>
    %420 = vector.broadcast %419 : f32 to vector<1x256xf32>
    %421 = arith.mulf %420, %418 : vector<1x256xf32>
    %422 = arith.addf %415, %421 : vector<1x256xf32>
    %c16_i32_152 = arith.constant 16 : i32
    %423 = tpu.dynamic_rotate %224 by %c16_i32_152 dim 1 : vector<1x256xf32>, i32 -> vector<1x256xf32>
    %cst_153 = arith.constant 0.000000e+00 : f32
    %424 = vector.broadcast %cst_153 : f32 to vector<1x256xf32>
    %425 = arith.select %18, %423, %424 : vector<1x256xi1>, vector<1x256xf32>
    %c1_154 = arith.constant 1 : index
    %426 = memref.load %arg3[%c1_154] : memref<18xf32, #tpu.memory_space<smem>>
    %427 = vector.broadcast %426 : f32 to vector<1x256xf32>
    %428 = arith.mulf %427, %425 : vector<1x256xf32>
    %429 = arith.addf %422, %428 : vector<1x256xf32>
    %c16_i32_155 = arith.constant 16 : i32
    %430 = tpu.dynamic_rotate %408 by %c16_i32_155 dim 1 : vector<1x256xf32>, i32 -> vector<1x256xf32>
    %cst_156 = arith.constant 0.000000e+00 : f32
    %431 = vector.broadcast %cst_156 : f32 to vector<1x256xf32>
    %432 = arith.select %18, %430, %431 : vector<1x256xi1>, vector<1x256xf32>
    %c10_157 = arith.constant 10 : index
    %433 = memref.load %arg3[%c10_157] : memref<18xf32, #tpu.memory_space<smem>>
    %434 = vector.broadcast %433 : f32 to vector<1x256xf32>
    %435 = arith.mulf %434, %432 : vector<1x256xf32>
    %436 = arith.addf %429, %435 : vector<1x256xf32>
    %c15_i32_158 = arith.constant 15 : i32
    %437 = tpu.dynamic_rotate %224 by %c15_i32_158 dim 1 : vector<1x256xf32>, i32 -> vector<1x256xf32>
    %cst_159 = arith.constant 0.000000e+00 : f32
    %438 = vector.broadcast %cst_159 : f32 to vector<1x256xf32>
    %439 = arith.select %26, %437, %438 : vector<1x256xi1>, vector<1x256xf32>
    %c2_160 = arith.constant 2 : index
    %440 = memref.load %arg3[%c2_160] : memref<18xf32, #tpu.memory_space<smem>>
    %441 = vector.broadcast %440 : f32 to vector<1x256xf32>
    %442 = arith.mulf %441, %439 : vector<1x256xf32>
    %443 = arith.addf %436, %442 : vector<1x256xf32>
    %c15_i32_161 = arith.constant 15 : i32
    %444 = tpu.dynamic_rotate %408 by %c15_i32_161 dim 1 : vector<1x256xf32>, i32 -> vector<1x256xf32>
    %cst_162 = arith.constant 0.000000e+00 : f32
    %445 = vector.broadcast %cst_162 : f32 to vector<1x256xf32>
    %446 = arith.select %26, %444, %445 : vector<1x256xi1>, vector<1x256xf32>
    %c11_163 = arith.constant 11 : index
    %447 = memref.load %arg3[%c11_163] : memref<18xf32, #tpu.memory_space<smem>>
    %448 = vector.broadcast %447 : f32 to vector<1x256xf32>
    %449 = arith.mulf %448, %446 : vector<1x256xf32>
    %450 = arith.addf %443, %449 : vector<1x256xf32>
    %c1_i32_164 = arith.constant 1 : i32
    %451 = tpu.dynamic_rotate %224 by %c1_i32_164 dim 1 : vector<1x256xf32>, i32 -> vector<1x256xf32>
    %cst_165 = arith.constant 0.000000e+00 : f32
    %452 = vector.broadcast %cst_165 : f32 to vector<1x256xf32>
    %453 = arith.select %22, %451, %452 : vector<1x256xi1>, vector<1x256xf32>
    %c3_166 = arith.constant 3 : index
    %454 = memref.load %arg3[%c3_166] : memref<18xf32, #tpu.memory_space<smem>>
    %455 = vector.broadcast %454 : f32 to vector<1x256xf32>
    %456 = arith.mulf %455, %453 : vector<1x256xf32>
    %c1_i32_167 = arith.constant 1 : i32
    %457 = tpu.dynamic_rotate %408 by %c1_i32_167 dim 1 : vector<1x256xf32>, i32 -> vector<1x256xf32>
    %cst_168 = arith.constant 0.000000e+00 : f32
    %458 = vector.broadcast %cst_168 : f32 to vector<1x256xf32>
    %459 = arith.select %22, %457, %458 : vector<1x256xi1>, vector<1x256xf32>
    %c12_169 = arith.constant 12 : index
    %460 = memref.load %arg3[%c12_169] : memref<18xf32, #tpu.memory_space<smem>>
    %461 = vector.broadcast %460 : f32 to vector<1x256xf32>
    %462 = arith.mulf %461, %459 : vector<1x256xf32>
    %463 = arith.addf %456, %462 : vector<1x256xf32>
    %c4_170 = arith.constant 4 : index
    %464 = memref.load %arg3[%c4_170] : memref<18xf32, #tpu.memory_space<smem>>
    %465 = vector.broadcast %464 : f32 to vector<1x256xf32>
    %466 = arith.mulf %465, %224 : vector<1x256xf32>
    %467 = arith.addf %463, %466 : vector<1x256xf32>
    %c13_171 = arith.constant 13 : index
    %468 = memref.load %arg3[%c13_171] : memref<18xf32, #tpu.memory_space<smem>>
    %469 = vector.broadcast %468 : f32 to vector<1x256xf32>
    %470 = arith.mulf %469, %408 : vector<1x256xf32>
    %471 = arith.addf %467, %470 : vector<1x256xf32>
    %c255_i32_172 = arith.constant 255 : i32
    %472 = tpu.dynamic_rotate %224 by %c255_i32_172 dim 1 : vector<1x256xf32>, i32 -> vector<1x256xf32>
    %cst_173 = arith.constant 0.000000e+00 : f32
    %473 = vector.broadcast %cst_173 : f32 to vector<1x256xf32>
    %474 = arith.select %24, %472, %473 : vector<1x256xi1>, vector<1x256xf32>
    %c5_174 = arith.constant 5 : index
    %475 = memref.load %arg3[%c5_174] : memref<18xf32, #tpu.memory_space<smem>>
    %476 = vector.broadcast %475 : f32 to vector<1x256xf32>
    %477 = arith.mulf %476, %474 : vector<1x256xf32>
    %478 = arith.addf %471, %477 : vector<1x256xf32>
    %c255_i32_175 = arith.constant 255 : i32
    %479 = tpu.dynamic_rotate %408 by %c255_i32_175 dim 1 : vector<1x256xf32>, i32 -> vector<1x256xf32>
    %cst_176 = arith.constant 0.000000e+00 : f32
    %480 = vector.broadcast %cst_176 : f32 to vector<1x256xf32>
    %481 = arith.select %24, %479, %480 : vector<1x256xi1>, vector<1x256xf32>
    %c14_177 = arith.constant 14 : index
    %482 = memref.load %arg3[%c14_177] : memref<18xf32, #tpu.memory_space<smem>>
    %483 = vector.broadcast %482 : f32 to vector<1x256xf32>
    %484 = arith.mulf %483, %481 : vector<1x256xf32>
    %485 = arith.addf %478, %484 : vector<1x256xf32>
    %c241_i32_178 = arith.constant 241 : i32
    %486 = tpu.dynamic_rotate %224 by %c241_i32_178 dim 1 : vector<1x256xf32>, i32 -> vector<1x256xf32>
    %cst_179 = arith.constant 0.000000e+00 : f32
    %487 = vector.broadcast %cst_179 : f32 to vector<1x256xf32>
    %488 = arith.select %27, %486, %487 : vector<1x256xi1>, vector<1x256xf32>
    %c6_180 = arith.constant 6 : index
    %489 = memref.load %arg3[%c6_180] : memref<18xf32, #tpu.memory_space<smem>>
    %490 = vector.broadcast %489 : f32 to vector<1x256xf32>
    %491 = arith.mulf %490, %488 : vector<1x256xf32>
    %c241_i32_181 = arith.constant 241 : i32
    %492 = tpu.dynamic_rotate %408 by %c241_i32_181 dim 1 : vector<1x256xf32>, i32 -> vector<1x256xf32>
    %cst_182 = arith.constant 0.000000e+00 : f32
    %493 = vector.broadcast %cst_182 : f32 to vector<1x256xf32>
    %494 = arith.select %27, %492, %493 : vector<1x256xi1>, vector<1x256xf32>
    %c15_183 = arith.constant 15 : index
    %495 = memref.load %arg3[%c15_183] : memref<18xf32, #tpu.memory_space<smem>>
    %496 = vector.broadcast %495 : f32 to vector<1x256xf32>
    %497 = arith.mulf %496, %494 : vector<1x256xf32>
    %498 = arith.addf %491, %497 : vector<1x256xf32>
    %c240_i32_184 = arith.constant 240 : i32
    %499 = tpu.dynamic_rotate %224 by %c240_i32_184 dim 1 : vector<1x256xf32>, i32 -> vector<1x256xf32>
    %cst_185 = arith.constant 0.000000e+00 : f32
    %500 = vector.broadcast %cst_185 : f32 to vector<1x256xf32>
    %501 = arith.select %20, %499, %500 : vector<1x256xi1>, vector<1x256xf32>
    %c7_186 = arith.constant 7 : index
    %502 = memref.load %arg3[%c7_186] : memref<18xf32, #tpu.memory_space<smem>>
    %503 = vector.broadcast %502 : f32 to vector<1x256xf32>
    %504 = arith.mulf %503, %501 : vector<1x256xf32>
    %505 = arith.addf %498, %504 : vector<1x256xf32>
    %c240_i32_187 = arith.constant 240 : i32
    %506 = tpu.dynamic_rotate %408 by %c240_i32_187 dim 1 : vector<1x256xf32>, i32 -> vector<1x256xf32>
    %cst_188 = arith.constant 0.000000e+00 : f32
    %507 = vector.broadcast %cst_188 : f32 to vector<1x256xf32>
    %508 = arith.select %20, %506, %507 : vector<1x256xi1>, vector<1x256xf32>
    %c16_189 = arith.constant 16 : index
    %509 = memref.load %arg3[%c16_189] : memref<18xf32, #tpu.memory_space<smem>>
    %510 = vector.broadcast %509 : f32 to vector<1x256xf32>
    %511 = arith.mulf %510, %508 : vector<1x256xf32>
    %512 = arith.addf %505, %511 : vector<1x256xf32>
    %c239_i32_190 = arith.constant 239 : i32
    %513 = tpu.dynamic_rotate %224 by %c239_i32_190 dim 1 : vector<1x256xf32>, i32 -> vector<1x256xf32>
    %cst_191 = arith.constant 0.000000e+00 : f32
    %514 = vector.broadcast %cst_191 : f32 to vector<1x256xf32>
    %515 = arith.select %28, %513, %514 : vector<1x256xi1>, vector<1x256xf32>
    %c8_192 = arith.constant 8 : index
    %516 = memref.load %arg3[%c8_192] : memref<18xf32, #tpu.memory_space<smem>>
    %517 = vector.broadcast %516 : f32 to vector<1x256xf32>
    %518 = arith.mulf %517, %515 : vector<1x256xf32>
    %519 = arith.addf %512, %518 : vector<1x256xf32>
    %c239_i32_193 = arith.constant 239 : i32
    %520 = tpu.dynamic_rotate %408 by %c239_i32_193 dim 1 : vector<1x256xf32>, i32 -> vector<1x256xf32>
    %cst_194 = arith.constant 0.000000e+00 : f32
    %521 = vector.broadcast %cst_194 : f32 to vector<1x256xf32>
    %522 = arith.select %28, %520, %521 : vector<1x256xi1>, vector<1x256xf32>
    %c17_195 = arith.constant 17 : index
    %523 = memref.load %arg3[%c17_195] : memref<18xf32, #tpu.memory_space<smem>>
    %524 = vector.broadcast %523 : f32 to vector<1x256xf32>
    %525 = arith.mulf %524, %522 : vector<1x256xf32>
    %526 = arith.addf %519, %525 : vector<1x256xf32>
    %527 = arith.addf %450, %485 : vector<1x256xf32>
    %528 = arith.addf %527, %526 : vector<1x256xf32>
    %529 = vector.broadcast %409 : f32 to vector<1x256xf32>
    %530 = arith.addf %528, %529 : vector<1x256xf32>
    %c0_196 = arith.constant 0 : index
    %c0_197 = arith.constant 0 : index
    %c0_198 = arith.constant 0 : index
    %531 = vector.load %arg7[%c0_196, %c0_197, %c0_198] : memref<2x1x256xf32, #tpu.memory_space<vmem>>, vector<1x1x256xf32>
    %532 = vector.shape_cast %531 : vector<1x1x256xf32> to vector<1x256xf32>
    %533 = vector.shape_cast %530 : vector<1x256xf32> to vector<1x1x256xf32>
    tpu.vector_store %arg7[%c0_196, %c0_197, %c0_198], %533 {strides = array<i32>} : memref<2x1x256xf32, #tpu.memory_space<vmem>>, vector<1x1x256xf32>,
    %c1_199 = arith.constant 1 : index
    %c0_200 = arith.constant 0 : index
    %c0_201 = arith.constant 0 : index
    %534 = vector.load %arg5[%c1_199, %c0_200, %c0_201] : memref<2x3x256xf32, #tpu.memory_space<vmem>>, vector<1x1x256xf32>
    %535 = vector.shape_cast %534 : vector<1x1x256xf32> to vector<1x256xf32>
    %c1_202 = arith.constant 1 : index
    %c1_203 = arith.constant 1 : index
    %c0_204 = arith.constant 0 : index
    %536 = vector.load %arg5[%c1_202, %c1_203, %c0_204] : memref<2x3x256xf32, #tpu.memory_space<vmem>>, vector<1x1x256xf32>
    %537 = vector.shape_cast %536 : vector<1x1x256xf32> to vector<1x256xf32>
    %c1_205 = arith.constant 1 : index
    %c2_206 = arith.constant 2 : index
    %c0_207 = arith.constant 0 : index
    %538 = vector.load %arg5[%c1_205, %c2_206, %c0_207] : memref<2x3x256xf32, #tpu.memory_space<vmem>>, vector<1x1x256xf32>
    %539 = vector.shape_cast %538 : vector<1x1x256xf32> to vector<1x256xf32>
    %c1_208 = arith.constant 1 : index
    %c0_209 = arith.constant 0 : index
    %c0_210 = arith.constant 0 : index
    %540 = vector.load %arg6[%c1_208, %c0_209, %c0_210] : memref<2x3x256xf32, #tpu.memory_space<vmem>>, vector<1x1x256xf32>
    %541 = vector.shape_cast %540 : vector<1x1x256xf32> to vector<1x256xf32>
    %c1_211 = arith.constant 1 : index
    %c1_212 = arith.constant 1 : index
    %c0_213 = arith.constant 0 : index
    %542 = vector.load %arg6[%c1_211, %c1_212, %c0_213] : memref<2x3x256xf32, #tpu.memory_space<vmem>>, vector<1x1x256xf32>
    %543 = vector.shape_cast %542 : vector<1x1x256xf32> to vector<1x256xf32>
    %c1_214 = arith.constant 1 : index
    %c2_215 = arith.constant 2 : index
    %c0_216 = arith.constant 0 : index
    %544 = vector.load %arg6[%c1_214, %c2_215, %c0_216] : memref<2x3x256xf32, #tpu.memory_space<vmem>>, vector<1x1x256xf32>
    %545 = vector.shape_cast %544 : vector<1x1x256xf32> to vector<1x256xf32>
    %c1_217 = arith.constant 1 : index
    %546 = memref.load %arg4[%c1_217] : memref<3xf32, #tpu.memory_space<smem>>
    %c17_i32_218 = arith.constant 17 : i32
    %547 = tpu.dynamic_rotate %535 by %c17_i32_218 dim 1 : vector<1x256xf32>, i32 -> vector<1x256xf32>
    %cst_219 = arith.constant 0.000000e+00 : f32
    %548 = vector.broadcast %cst_219 : f32 to vector<1x256xf32>
    %549 = arith.select %25, %547, %548 : vector<1x256xi1>, vector<1x256xf32>
    %c0_220 = arith.constant 0 : index
    %550 = memref.load %arg2[%c0_220] : memref<27xf32, #tpu.memory_space<smem>>
    %551 = vector.broadcast %550 : f32 to vector<1x256xf32>
    %552 = arith.mulf %551, %549 : vector<1x256xf32>
    %c17_i32_221 = arith.constant 17 : i32
    %553 = tpu.dynamic_rotate %537 by %c17_i32_221 dim 1 : vector<1x256xf32>, i32 -> vector<1x256xf32>
    %cst_222 = arith.constant 0.000000e+00 : f32
    %554 = vector.broadcast %cst_222 : f32 to vector<1x256xf32>
    %555 = arith.select %25, %553, %554 : vector<1x256xi1>, vector<1x256xf32>
    %c9_223 = arith.constant 9 : index
    %556 = memref.load %arg2[%c9_223] : memref<27xf32, #tpu.memory_space<smem>>
    %557 = vector.broadcast %556 : f32 to vector<1x256xf32>
    %558 = arith.mulf %557, %555 : vector<1x256xf32>
    %559 = arith.addf %552, %558 : vector<1x256xf32>
    %c17_i32_224 = arith.constant 17 : i32
    %560 = tpu.dynamic_rotate %539 by %c17_i32_224 dim 1 : vector<1x256xf32>, i32 -> vector<1x256xf32>
    %cst_225 = arith.constant 0.000000e+00 : f32
    %561 = vector.broadcast %cst_225 : f32 to vector<1x256xf32>
    %562 = arith.select %25, %560, %561 : vector<1x256xi1>, vector<1x256xf32>
    %c18_226 = arith.constant 18 : index
    %563 = memref.load %arg2[%c18_226] : memref<27xf32, #tpu.memory_space<smem>>
    %564 = vector.broadcast %563 : f32 to vector<1x256xf32>
    %565 = arith.mulf %564, %562 : vector<1x256xf32>
    %566 = arith.addf %559, %565 : vector<1x256xf32>
    %c16_i32_227 = arith.constant 16 : i32
    %567 = tpu.dynamic_rotate %535 by %c16_i32_227 dim 1 : vector<1x256xf32>, i32 -> vector<1x256xf32>
    %cst_228 = arith.constant 0.000000e+00 : f32
    %568 = vector.broadcast %cst_228 : f32 to vector<1x256xf32>
    %569 = arith.select %18, %567, %568 : vector<1x256xi1>, vector<1x256xf32>
    %c1_229 = arith.constant 1 : index
    %570 = memref.load %arg2[%c1_229] : memref<27xf32, #tpu.memory_space<smem>>
    %571 = vector.broadcast %570 : f32 to vector<1x256xf32>
    %572 = arith.mulf %571, %569 : vector<1x256xf32>
    %573 = arith.addf %566, %572 : vector<1x256xf32>
    %c16_i32_230 = arith.constant 16 : i32
    %574 = tpu.dynamic_rotate %537 by %c16_i32_230 dim 1 : vector<1x256xf32>, i32 -> vector<1x256xf32>
    %cst_231 = arith.constant 0.000000e+00 : f32
    %575 = vector.broadcast %cst_231 : f32 to vector<1x256xf32>
    %576 = arith.select %18, %574, %575 : vector<1x256xi1>, vector<1x256xf32>
    %c10_232 = arith.constant 10 : index
    %577 = memref.load %arg2[%c10_232] : memref<27xf32, #tpu.memory_space<smem>>
    %578 = vector.broadcast %577 : f32 to vector<1x256xf32>
    %579 = arith.mulf %578, %576 : vector<1x256xf32>
    %580 = arith.addf %573, %579 : vector<1x256xf32>
    %c16_i32_233 = arith.constant 16 : i32
    %581 = tpu.dynamic_rotate %539 by %c16_i32_233 dim 1 : vector<1x256xf32>, i32 -> vector<1x256xf32>
    %cst_234 = arith.constant 0.000000e+00 : f32
    %582 = vector.broadcast %cst_234 : f32 to vector<1x256xf32>
    %583 = arith.select %18, %581, %582 : vector<1x256xi1>, vector<1x256xf32>
    %c19_235 = arith.constant 19 : index
    %584 = memref.load %arg2[%c19_235] : memref<27xf32, #tpu.memory_space<smem>>
    %585 = vector.broadcast %584 : f32 to vector<1x256xf32>
    %586 = arith.mulf %585, %583 : vector<1x256xf32>
    %587 = arith.addf %580, %586 : vector<1x256xf32>
    %c15_i32_236 = arith.constant 15 : i32
    %588 = tpu.dynamic_rotate %535 by %c15_i32_236 dim 1 : vector<1x256xf32>, i32 -> vector<1x256xf32>
    %cst_237 = arith.constant 0.000000e+00 : f32
    %589 = vector.broadcast %cst_237 : f32 to vector<1x256xf32>
    %590 = arith.select %26, %588, %589 : vector<1x256xi1>, vector<1x256xf32>
    %c2_238 = arith.constant 2 : index
    %591 = memref.load %arg2[%c2_238] : memref<27xf32, #tpu.memory_space<smem>>
    %592 = vector.broadcast %591 : f32 to vector<1x256xf32>
    %593 = arith.mulf %592, %590 : vector<1x256xf32>
    %594 = arith.addf %587, %593 : vector<1x256xf32>
    %c15_i32_239 = arith.constant 15 : i32
    %595 = tpu.dynamic_rotate %537 by %c15_i32_239 dim 1 : vector<1x256xf32>, i32 -> vector<1x256xf32>
    %cst_240 = arith.constant 0.000000e+00 : f32
    %596 = vector.broadcast %cst_240 : f32 to vector<1x256xf32>
    %597 = arith.select %26, %595, %596 : vector<1x256xi1>, vector<1x256xf32>
    %c11_241 = arith.constant 11 : index
    %598 = memref.load %arg2[%c11_241] : memref<27xf32, #tpu.memory_space<smem>>
    %599 = vector.broadcast %598 : f32 to vector<1x256xf32>
    %600 = arith.mulf %599, %597 : vector<1x256xf32>
    %601 = arith.addf %594, %600 : vector<1x256xf32>
    %c15_i32_242 = arith.constant 15 : i32
    %602 = tpu.dynamic_rotate %539 by %c15_i32_242 dim 1 : vector<1x256xf32>, i32 -> vector<1x256xf32>
    %cst_243 = arith.constant 0.000000e+00 : f32
    %603 = vector.broadcast %cst_243 : f32 to vector<1x256xf32>
    %604 = arith.select %26, %602, %603 : vector<1x256xi1>, vector<1x256xf32>
    %c20_244 = arith.constant 20 : index
    %605 = memref.load %arg2[%c20_244] : memref<27xf32, #tpu.memory_space<smem>>
    %606 = vector.broadcast %605 : f32 to vector<1x256xf32>
    %607 = arith.mulf %606, %604 : vector<1x256xf32>
    %608 = arith.addf %601, %607 : vector<1x256xf32>
    %c1_i32_245 = arith.constant 1 : i32
    %609 = tpu.dynamic_rotate %535 by %c1_i32_245 dim 1 : vector<1x256xf32>, i32 -> vector<1x256xf32>
    %cst_246 = arith.constant 0.000000e+00 : f32
    %610 = vector.broadcast %cst_246 : f32 to vector<1x256xf32>
    %611 = arith.select %22, %609, %610 : vector<1x256xi1>, vector<1x256xf32>
    %c3_247 = arith.constant 3 : index
    %612 = memref.load %arg2[%c3_247] : memref<27xf32, #tpu.memory_space<smem>>
    %613 = vector.broadcast %612 : f32 to vector<1x256xf32>
    %614 = arith.mulf %613, %611 : vector<1x256xf32>
    %c1_i32_248 = arith.constant 1 : i32
    %615 = tpu.dynamic_rotate %537 by %c1_i32_248 dim 1 : vector<1x256xf32>, i32 -> vector<1x256xf32>
    %cst_249 = arith.constant 0.000000e+00 : f32
    %616 = vector.broadcast %cst_249 : f32 to vector<1x256xf32>
    %617 = arith.select %22, %615, %616 : vector<1x256xi1>, vector<1x256xf32>
    %c12_250 = arith.constant 12 : index
    %618 = memref.load %arg2[%c12_250] : memref<27xf32, #tpu.memory_space<smem>>
    %619 = vector.broadcast %618 : f32 to vector<1x256xf32>
    %620 = arith.mulf %619, %617 : vector<1x256xf32>
    %621 = arith.addf %614, %620 : vector<1x256xf32>
    %c1_i32_251 = arith.constant 1 : i32
    %622 = tpu.dynamic_rotate %539 by %c1_i32_251 dim 1 : vector<1x256xf32>, i32 -> vector<1x256xf32>
    %cst_252 = arith.constant 0.000000e+00 : f32
    %623 = vector.broadcast %cst_252 : f32 to vector<1x256xf32>
    %624 = arith.select %22, %622, %623 : vector<1x256xi1>, vector<1x256xf32>
    %c21_253 = arith.constant 21 : index
    %625 = memref.load %arg2[%c21_253] : memref<27xf32, #tpu.memory_space<smem>>
    %626 = vector.broadcast %625 : f32 to vector<1x256xf32>
    %627 = arith.mulf %626, %624 : vector<1x256xf32>
    %628 = arith.addf %621, %627 : vector<1x256xf32>
    %c4_254 = arith.constant 4 : index
    %629 = memref.load %arg2[%c4_254] : memref<27xf32, #tpu.memory_space<smem>>
    %630 = vector.broadcast %629 : f32 to vector<1x256xf32>
    %631 = arith.mulf %630, %535 : vector<1x256xf32>
    %632 = arith.addf %628, %631 : vector<1x256xf32>
    %c13_255 = arith.constant 13 : index
    %633 = memref.load %arg2[%c13_255] : memref<27xf32, #tpu.memory_space<smem>>
    %634 = vector.broadcast %633 : f32 to vector<1x256xf32>
    %635 = arith.mulf %634, %537 : vector<1x256xf32>
    %636 = arith.addf %632, %635 : vector<1x256xf32>
    %c22_256 = arith.constant 22 : index
    %637 = memref.load %arg2[%c22_256] : memref<27xf32, #tpu.memory_space<smem>>
    %638 = vector.broadcast %637 : f32 to vector<1x256xf32>
    %639 = arith.mulf %638, %539 : vector<1x256xf32>
    %640 = arith.addf %636, %639 : vector<1x256xf32>
    %c255_i32_257 = arith.constant 255 : i32
    %641 = tpu.dynamic_rotate %535 by %c255_i32_257 dim 1 : vector<1x256xf32>, i32 -> vector<1x256xf32>
    %cst_258 = arith.constant 0.000000e+00 : f32
    %642 = vector.broadcast %cst_258 : f32 to vector<1x256xf32>
    %643 = arith.select %24, %641, %642 : vector<1x256xi1>, vector<1x256xf32>
    %c5_259 = arith.constant 5 : index
    %644 = memref.load %arg2[%c5_259] : memref<27xf32, #tpu.memory_space<smem>>
    %645 = vector.broadcast %644 : f32 to vector<1x256xf32>
    %646 = arith.mulf %645, %643 : vector<1x256xf32>
    %647 = arith.addf %640, %646 : vector<1x256xf32>
    %c255_i32_260 = arith.constant 255 : i32
    %648 = tpu.dynamic_rotate %537 by %c255_i32_260 dim 1 : vector<1x256xf32>, i32 -> vector<1x256xf32>
    %cst_261 = arith.constant 0.000000e+00 : f32
    %649 = vector.broadcast %cst_261 : f32 to vector<1x256xf32>
    %650 = arith.select %24, %648, %649 : vector<1x256xi1>, vector<1x256xf32>
    %c14_262 = arith.constant 14 : index
    %651 = memref.load %arg2[%c14_262] : memref<27xf32, #tpu.memory_space<smem>>
    %652 = vector.broadcast %651 : f32 to vector<1x256xf32>
    %653 = arith.mulf %652, %650 : vector<1x256xf32>
    %654 = arith.addf %647, %653 : vector<1x256xf32>
    %c255_i32_263 = arith.constant 255 : i32
    %655 = tpu.dynamic_rotate %539 by %c255_i32_263 dim 1 : vector<1x256xf32>, i32 -> vector<1x256xf32>
    %cst_264 = arith.constant 0.000000e+00 : f32
    %656 = vector.broadcast %cst_264 : f32 to vector<1x256xf32>
    %657 = arith.select %24, %655, %656 : vector<1x256xi1>, vector<1x256xf32>
    %c23_265 = arith.constant 23 : index
    %658 = memref.load %arg2[%c23_265] : memref<27xf32, #tpu.memory_space<smem>>
    %659 = vector.broadcast %658 : f32 to vector<1x256xf32>
    %660 = arith.mulf %659, %657 : vector<1x256xf32>
    %661 = arith.addf %654, %660 : vector<1x256xf32>
    %c241_i32_266 = arith.constant 241 : i32
    %662 = tpu.dynamic_rotate %535 by %c241_i32_266 dim 1 : vector<1x256xf32>, i32 -> vector<1x256xf32>
    %cst_267 = arith.constant 0.000000e+00 : f32
    %663 = vector.broadcast %cst_267 : f32 to vector<1x256xf32>
    %664 = arith.select %27, %662, %663 : vector<1x256xi1>, vector<1x256xf32>
    %c6_268 = arith.constant 6 : index
    %665 = memref.load %arg2[%c6_268] : memref<27xf32, #tpu.memory_space<smem>>
    %666 = vector.broadcast %665 : f32 to vector<1x256xf32>
    %667 = arith.mulf %666, %664 : vector<1x256xf32>
    %c241_i32_269 = arith.constant 241 : i32
    %668 = tpu.dynamic_rotate %537 by %c241_i32_269 dim 1 : vector<1x256xf32>, i32 -> vector<1x256xf32>
    %cst_270 = arith.constant 0.000000e+00 : f32
    %669 = vector.broadcast %cst_270 : f32 to vector<1x256xf32>
    %670 = arith.select %27, %668, %669 : vector<1x256xi1>, vector<1x256xf32>
    %c15_271 = arith.constant 15 : index
    %671 = memref.load %arg2[%c15_271] : memref<27xf32, #tpu.memory_space<smem>>
    %672 = vector.broadcast %671 : f32 to vector<1x256xf32>
    %673 = arith.mulf %672, %670 : vector<1x256xf32>
    %674 = arith.addf %667, %673 : vector<1x256xf32>
    %c241_i32_272 = arith.constant 241 : i32
    %675 = tpu.dynamic_rotate %539 by %c241_i32_272 dim 1 : vector<1x256xf32>, i32 -> vector<1x256xf32>
    %cst_273 = arith.constant 0.000000e+00 : f32
    %676 = vector.broadcast %cst_273 : f32 to vector<1x256xf32>
    %677 = arith.select %27, %675, %676 : vector<1x256xi1>, vector<1x256xf32>
    %c24_274 = arith.constant 24 : index
    %678 = memref.load %arg2[%c24_274] : memref<27xf32, #tpu.memory_space<smem>>
    %679 = vector.broadcast %678 : f32 to vector<1x256xf32>
    %680 = arith.mulf %679, %677 : vector<1x256xf32>
    %681 = arith.addf %674, %680 : vector<1x256xf32>
    %c240_i32_275 = arith.constant 240 : i32
    %682 = tpu.dynamic_rotate %535 by %c240_i32_275 dim 1 : vector<1x256xf32>, i32 -> vector<1x256xf32>
    %cst_276 = arith.constant 0.000000e+00 : f32
    %683 = vector.broadcast %cst_276 : f32 to vector<1x256xf32>
    %684 = arith.select %20, %682, %683 : vector<1x256xi1>, vector<1x256xf32>
    %c7_277 = arith.constant 7 : index
    %685 = memref.load %arg2[%c7_277] : memref<27xf32, #tpu.memory_space<smem>>
    %686 = vector.broadcast %685 : f32 to vector<1x256xf32>
    %687 = arith.mulf %686, %684 : vector<1x256xf32>
    %688 = arith.addf %681, %687 : vector<1x256xf32>
    %c240_i32_278 = arith.constant 240 : i32
    %689 = tpu.dynamic_rotate %537 by %c240_i32_278 dim 1 : vector<1x256xf32>, i32 -> vector<1x256xf32>
    %cst_279 = arith.constant 0.000000e+00 : f32
    %690 = vector.broadcast %cst_279 : f32 to vector<1x256xf32>
    %691 = arith.select %20, %689, %690 : vector<1x256xi1>, vector<1x256xf32>
    %c16_280 = arith.constant 16 : index
    %692 = memref.load %arg2[%c16_280] : memref<27xf32, #tpu.memory_space<smem>>
    %693 = vector.broadcast %692 : f32 to vector<1x256xf32>
    %694 = arith.mulf %693, %691 : vector<1x256xf32>
    %695 = arith.addf %688, %694 : vector<1x256xf32>
    %c240_i32_281 = arith.constant 240 : i32
    %696 = tpu.dynamic_rotate %539 by %c240_i32_281 dim 1 : vector<1x256xf32>, i32 -> vector<1x256xf32>
    %cst_282 = arith.constant 0.000000e+00 : f32
    %697 = vector.broadcast %cst_282 : f32 to vector<1x256xf32>
    %698 = arith.select %20, %696, %697 : vector<1x256xi1>, vector<1x256xf32>
    %c25_283 = arith.constant 25 : index
    %699 = memref.load %arg2[%c25_283] : memref<27xf32, #tpu.memory_space<smem>>
    %700 = vector.broadcast %699 : f32 to vector<1x256xf32>
    %701 = arith.mulf %700, %698 : vector<1x256xf32>
    %702 = arith.addf %695, %701 : vector<1x256xf32>
    %c239_i32_284 = arith.constant 239 : i32
    %703 = tpu.dynamic_rotate %535 by %c239_i32_284 dim 1 : vector<1x256xf32>, i32 -> vector<1x256xf32>
    %cst_285 = arith.constant 0.000000e+00 : f32
    %704 = vector.broadcast %cst_285 : f32 to vector<1x256xf32>
    %705 = arith.select %28, %703, %704 : vector<1x256xi1>, vector<1x256xf32>
    %c8_286 = arith.constant 8 : index
    %706 = memref.load %arg2[%c8_286] : memref<27xf32, #tpu.memory_space<smem>>
    %707 = vector.broadcast %706 : f32 to vector<1x256xf32>
    %708 = arith.mulf %707, %705 : vector<1x256xf32>
    %709 = arith.addf %702, %708 : vector<1x256xf32>
    %c239_i32_287 = arith.constant 239 : i32
    %710 = tpu.dynamic_rotate %537 by %c239_i32_287 dim 1 : vector<1x256xf32>, i32 -> vector<1x256xf32>
    %cst_288 = arith.constant 0.000000e+00 : f32
    %711 = vector.broadcast %cst_288 : f32 to vector<1x256xf32>
    %712 = arith.select %28, %710, %711 : vector<1x256xi1>, vector<1x256xf32>
    %c17_289 = arith.constant 17 : index
    %713 = memref.load %arg2[%c17_289] : memref<27xf32, #tpu.memory_space<smem>>
    %714 = vector.broadcast %713 : f32 to vector<1x256xf32>
    %715 = arith.mulf %714, %712 : vector<1x256xf32>
    %716 = arith.addf %709, %715 : vector<1x256xf32>
    %c239_i32_290 = arith.constant 239 : i32
    %717 = tpu.dynamic_rotate %539 by %c239_i32_290 dim 1 : vector<1x256xf32>, i32 -> vector<1x256xf32>
    %cst_291 = arith.constant 0.000000e+00 : f32
    %718 = vector.broadcast %cst_291 : f32 to vector<1x256xf32>
    %719 = arith.select %28, %717, %718 : vector<1x256xi1>, vector<1x256xf32>
    %c26_292 = arith.constant 26 : index
    %720 = memref.load %arg2[%c26_292] : memref<27xf32, #tpu.memory_space<smem>>
    %721 = vector.broadcast %720 : f32 to vector<1x256xf32>
    %722 = arith.mulf %721, %719 : vector<1x256xf32>
    %723 = arith.addf %716, %722 : vector<1x256xf32>
    %724 = arith.addf %608, %661 : vector<1x256xf32>
    %725 = arith.addf %724, %723 : vector<1x256xf32>
    %726 = vector.broadcast %546 : f32 to vector<1x256xf32>
    %727 = arith.addf %725, %726 : vector<1x256xf32>
    %cst_293 = arith.constant 0.000000e+00 : f32
    %728 = vector.broadcast %cst_293 : f32 to vector<1x256xf32>
    %729 = arith.maximumf %727, %728 : vector<1x256xf32>
    %c0_294 = arith.constant 0 : index
    %730 = memref.load %arg4[%c0_294] : memref<3xf32, #tpu.memory_space<smem>>
    %c17_i32_295 = arith.constant 17 : i32
    %731 = tpu.dynamic_rotate %541 by %c17_i32_295 dim 1 : vector<1x256xf32>, i32 -> vector<1x256xf32>
    %cst_296 = arith.constant 0.000000e+00 : f32
    %732 = vector.broadcast %cst_296 : f32 to vector<1x256xf32>
    %733 = arith.select %25, %731, %732 : vector<1x256xi1>, vector<1x256xf32>
    %c0_297 = arith.constant 0 : index
    %734 = memref.load %arg1[%c0_297] : memref<27xf32, #tpu.memory_space<smem>>
    %735 = vector.broadcast %734 : f32 to vector<1x256xf32>
    %736 = arith.mulf %735, %733 : vector<1x256xf32>
    %c17_i32_298 = arith.constant 17 : i32
    %737 = tpu.dynamic_rotate %543 by %c17_i32_298 dim 1 : vector<1x256xf32>, i32 -> vector<1x256xf32>
    %cst_299 = arith.constant 0.000000e+00 : f32
    %738 = vector.broadcast %cst_299 : f32 to vector<1x256xf32>
    %739 = arith.select %25, %737, %738 : vector<1x256xi1>, vector<1x256xf32>
    %c9_300 = arith.constant 9 : index
    %740 = memref.load %arg1[%c9_300] : memref<27xf32, #tpu.memory_space<smem>>
    %741 = vector.broadcast %740 : f32 to vector<1x256xf32>
    %742 = arith.mulf %741, %739 : vector<1x256xf32>
    %743 = arith.addf %736, %742 : vector<1x256xf32>
    %c17_i32_301 = arith.constant 17 : i32
    %744 = tpu.dynamic_rotate %545 by %c17_i32_301 dim 1 : vector<1x256xf32>, i32 -> vector<1x256xf32>
    %cst_302 = arith.constant 0.000000e+00 : f32
    %745 = vector.broadcast %cst_302 : f32 to vector<1x256xf32>
    %746 = arith.select %25, %744, %745 : vector<1x256xi1>, vector<1x256xf32>
    %c18_303 = arith.constant 18 : index
    %747 = memref.load %arg1[%c18_303] : memref<27xf32, #tpu.memory_space<smem>>
    %748 = vector.broadcast %747 : f32 to vector<1x256xf32>
    %749 = arith.mulf %748, %746 : vector<1x256xf32>
    %750 = arith.addf %743, %749 : vector<1x256xf32>
    %c16_i32_304 = arith.constant 16 : i32
    %751 = tpu.dynamic_rotate %541 by %c16_i32_304 dim 1 : vector<1x256xf32>, i32 -> vector<1x256xf32>
    %cst_305 = arith.constant 0.000000e+00 : f32
    %752 = vector.broadcast %cst_305 : f32 to vector<1x256xf32>
    %753 = arith.select %18, %751, %752 : vector<1x256xi1>, vector<1x256xf32>
    %c1_306 = arith.constant 1 : index
    %754 = memref.load %arg1[%c1_306] : memref<27xf32, #tpu.memory_space<smem>>
    %755 = vector.broadcast %754 : f32 to vector<1x256xf32>
    %756 = arith.mulf %755, %753 : vector<1x256xf32>
    %757 = arith.addf %750, %756 : vector<1x256xf32>
    %c16_i32_307 = arith.constant 16 : i32
    %758 = tpu.dynamic_rotate %543 by %c16_i32_307 dim 1 : vector<1x256xf32>, i32 -> vector<1x256xf32>
    %cst_308 = arith.constant 0.000000e+00 : f32
    %759 = vector.broadcast %cst_308 : f32 to vector<1x256xf32>
    %760 = arith.select %18, %758, %759 : vector<1x256xi1>, vector<1x256xf32>
    %c10_309 = arith.constant 10 : index
    %761 = memref.load %arg1[%c10_309] : memref<27xf32, #tpu.memory_space<smem>>
    %762 = vector.broadcast %761 : f32 to vector<1x256xf32>
    %763 = arith.mulf %762, %760 : vector<1x256xf32>
    %764 = arith.addf %757, %763 : vector<1x256xf32>
    %c16_i32_310 = arith.constant 16 : i32
    %765 = tpu.dynamic_rotate %545 by %c16_i32_310 dim 1 : vector<1x256xf32>, i32 -> vector<1x256xf32>
    %cst_311 = arith.constant 0.000000e+00 : f32
    %766 = vector.broadcast %cst_311 : f32 to vector<1x256xf32>
    %767 = arith.select %18, %765, %766 : vector<1x256xi1>, vector<1x256xf32>
    %c19_312 = arith.constant 19 : index
    %768 = memref.load %arg1[%c19_312] : memref<27xf32, #tpu.memory_space<smem>>
    %769 = vector.broadcast %768 : f32 to vector<1x256xf32>
    %770 = arith.mulf %769, %767 : vector<1x256xf32>
    %771 = arith.addf %764, %770 : vector<1x256xf32>
    %c15_i32_313 = arith.constant 15 : i32
    %772 = tpu.dynamic_rotate %541 by %c15_i32_313 dim 1 : vector<1x256xf32>, i32 -> vector<1x256xf32>
    %cst_314 = arith.constant 0.000000e+00 : f32
    %773 = vector.broadcast %cst_314 : f32 to vector<1x256xf32>
    %774 = arith.select %26, %772, %773 : vector<1x256xi1>, vector<1x256xf32>
    %c2_315 = arith.constant 2 : index
    %775 = memref.load %arg1[%c2_315] : memref<27xf32, #tpu.memory_space<smem>>
    %776 = vector.broadcast %775 : f32 to vector<1x256xf32>
    %777 = arith.mulf %776, %774 : vector<1x256xf32>
    %778 = arith.addf %771, %777 : vector<1x256xf32>
    %c15_i32_316 = arith.constant 15 : i32
    %779 = tpu.dynamic_rotate %543 by %c15_i32_316 dim 1 : vector<1x256xf32>, i32 -> vector<1x256xf32>
    %cst_317 = arith.constant 0.000000e+00 : f32
    %780 = vector.broadcast %cst_317 : f32 to vector<1x256xf32>
    %781 = arith.select %26, %779, %780 : vector<1x256xi1>, vector<1x256xf32>
    %c11_318 = arith.constant 11 : index
    %782 = memref.load %arg1[%c11_318] : memref<27xf32, #tpu.memory_space<smem>>
    %783 = vector.broadcast %782 : f32 to vector<1x256xf32>
    %784 = arith.mulf %783, %781 : vector<1x256xf32>
    %785 = arith.addf %778, %784 : vector<1x256xf32>
    %c15_i32_319 = arith.constant 15 : i32
    %786 = tpu.dynamic_rotate %545 by %c15_i32_319 dim 1 : vector<1x256xf32>, i32 -> vector<1x256xf32>
    %cst_320 = arith.constant 0.000000e+00 : f32
    %787 = vector.broadcast %cst_320 : f32 to vector<1x256xf32>
    %788 = arith.select %26, %786, %787 : vector<1x256xi1>, vector<1x256xf32>
    %c20_321 = arith.constant 20 : index
    %789 = memref.load %arg1[%c20_321] : memref<27xf32, #tpu.memory_space<smem>>
    %790 = vector.broadcast %789 : f32 to vector<1x256xf32>
    %791 = arith.mulf %790, %788 : vector<1x256xf32>
    %792 = arith.addf %785, %791 : vector<1x256xf32>
    %c1_i32_322 = arith.constant 1 : i32
    %793 = tpu.dynamic_rotate %541 by %c1_i32_322 dim 1 : vector<1x256xf32>, i32 -> vector<1x256xf32>
    %cst_323 = arith.constant 0.000000e+00 : f32
    %794 = vector.broadcast %cst_323 : f32 to vector<1x256xf32>
    %795 = arith.select %22, %793, %794 : vector<1x256xi1>, vector<1x256xf32>
    %c3_324 = arith.constant 3 : index
    %796 = memref.load %arg1[%c3_324] : memref<27xf32, #tpu.memory_space<smem>>
    %797 = vector.broadcast %796 : f32 to vector<1x256xf32>
    %798 = arith.mulf %797, %795 : vector<1x256xf32>
    %c1_i32_325 = arith.constant 1 : i32
    %799 = tpu.dynamic_rotate %543 by %c1_i32_325 dim 1 : vector<1x256xf32>, i32 -> vector<1x256xf32>
    %cst_326 = arith.constant 0.000000e+00 : f32
    %800 = vector.broadcast %cst_326 : f32 to vector<1x256xf32>
    %801 = arith.select %22, %799, %800 : vector<1x256xi1>, vector<1x256xf32>
    %c12_327 = arith.constant 12 : index
    %802 = memref.load %arg1[%c12_327] : memref<27xf32, #tpu.memory_space<smem>>
    %803 = vector.broadcast %802 : f32 to vector<1x256xf32>
    %804 = arith.mulf %803, %801 : vector<1x256xf32>
    %805 = arith.addf %798, %804 : vector<1x256xf32>
    %c1_i32_328 = arith.constant 1 : i32
    %806 = tpu.dynamic_rotate %545 by %c1_i32_328 dim 1 : vector<1x256xf32>, i32 -> vector<1x256xf32>
    %cst_329 = arith.constant 0.000000e+00 : f32
    %807 = vector.broadcast %cst_329 : f32 to vector<1x256xf32>
    %808 = arith.select %22, %806, %807 : vector<1x256xi1>, vector<1x256xf32>
    %c21_330 = arith.constant 21 : index
    %809 = memref.load %arg1[%c21_330] : memref<27xf32, #tpu.memory_space<smem>>
    %810 = vector.broadcast %809 : f32 to vector<1x256xf32>
    %811 = arith.mulf %810, %808 : vector<1x256xf32>
    %812 = arith.addf %805, %811 : vector<1x256xf32>
    %c4_331 = arith.constant 4 : index
    %813 = memref.load %arg1[%c4_331] : memref<27xf32, #tpu.memory_space<smem>>
    %814 = vector.broadcast %813 : f32 to vector<1x256xf32>
    %815 = arith.mulf %814, %541 : vector<1x256xf32>
    %816 = arith.addf %812, %815 : vector<1x256xf32>
    %c13_332 = arith.constant 13 : index
    %817 = memref.load %arg1[%c13_332] : memref<27xf32, #tpu.memory_space<smem>>
    %818 = vector.broadcast %817 : f32 to vector<1x256xf32>
    %819 = arith.mulf %818, %543 : vector<1x256xf32>
    %820 = arith.addf %816, %819 : vector<1x256xf32>
    %c22_333 = arith.constant 22 : index
    %821 = memref.load %arg1[%c22_333] : memref<27xf32, #tpu.memory_space<smem>>
    %822 = vector.broadcast %821 : f32 to vector<1x256xf32>
    %823 = arith.mulf %822, %545 : vector<1x256xf32>
    %824 = arith.addf %820, %823 : vector<1x256xf32>
    %c255_i32_334 = arith.constant 255 : i32
    %825 = tpu.dynamic_rotate %541 by %c255_i32_334 dim 1 : vector<1x256xf32>, i32 -> vector<1x256xf32>
    %cst_335 = arith.constant 0.000000e+00 : f32
    %826 = vector.broadcast %cst_335 : f32 to vector<1x256xf32>
    %827 = arith.select %24, %825, %826 : vector<1x256xi1>, vector<1x256xf32>
    %c5_336 = arith.constant 5 : index
    %828 = memref.load %arg1[%c5_336] : memref<27xf32, #tpu.memory_space<smem>>
    %829 = vector.broadcast %828 : f32 to vector<1x256xf32>
    %830 = arith.mulf %829, %827 : vector<1x256xf32>
    %831 = arith.addf %824, %830 : vector<1x256xf32>
    %c255_i32_337 = arith.constant 255 : i32
    %832 = tpu.dynamic_rotate %543 by %c255_i32_337 dim 1 : vector<1x256xf32>, i32 -> vector<1x256xf32>
    %cst_338 = arith.constant 0.000000e+00 : f32
    %833 = vector.broadcast %cst_338 : f32 to vector<1x256xf32>
    %834 = arith.select %24, %832, %833 : vector<1x256xi1>, vector<1x256xf32>
    %c14_339 = arith.constant 14 : index
    %835 = memref.load %arg1[%c14_339] : memref<27xf32, #tpu.memory_space<smem>>
    %836 = vector.broadcast %835 : f32 to vector<1x256xf32>
    %837 = arith.mulf %836, %834 : vector<1x256xf32>
    %838 = arith.addf %831, %837 : vector<1x256xf32>
    %c255_i32_340 = arith.constant 255 : i32
    %839 = tpu.dynamic_rotate %545 by %c255_i32_340 dim 1 : vector<1x256xf32>, i32 -> vector<1x256xf32>
    %cst_341 = arith.constant 0.000000e+00 : f32
    %840 = vector.broadcast %cst_341 : f32 to vector<1x256xf32>
    %841 = arith.select %24, %839, %840 : vector<1x256xi1>, vector<1x256xf32>
    %c23_342 = arith.constant 23 : index
    %842 = memref.load %arg1[%c23_342] : memref<27xf32, #tpu.memory_space<smem>>
    %843 = vector.broadcast %842 : f32 to vector<1x256xf32>
    %844 = arith.mulf %843, %841 : vector<1x256xf32>
    %845 = arith.addf %838, %844 : vector<1x256xf32>
    %c241_i32_343 = arith.constant 241 : i32
    %846 = tpu.dynamic_rotate %541 by %c241_i32_343 dim 1 : vector<1x256xf32>, i32 -> vector<1x256xf32>
    %cst_344 = arith.constant 0.000000e+00 : f32
    %847 = vector.broadcast %cst_344 : f32 to vector<1x256xf32>
    %848 = arith.select %27, %846, %847 : vector<1x256xi1>, vector<1x256xf32>
    %c6_345 = arith.constant 6 : index
    %849 = memref.load %arg1[%c6_345] : memref<27xf32, #tpu.memory_space<smem>>
    %850 = vector.broadcast %849 : f32 to vector<1x256xf32>
    %851 = arith.mulf %850, %848 : vector<1x256xf32>
    %c241_i32_346 = arith.constant 241 : i32
    %852 = tpu.dynamic_rotate %543 by %c241_i32_346 dim 1 : vector<1x256xf32>, i32 -> vector<1x256xf32>
    %cst_347 = arith.constant 0.000000e+00 : f32
    %853 = vector.broadcast %cst_347 : f32 to vector<1x256xf32>
    %854 = arith.select %27, %852, %853 : vector<1x256xi1>, vector<1x256xf32>
    %c15_348 = arith.constant 15 : index
    %855 = memref.load %arg1[%c15_348] : memref<27xf32, #tpu.memory_space<smem>>
    %856 = vector.broadcast %855 : f32 to vector<1x256xf32>
    %857 = arith.mulf %856, %854 : vector<1x256xf32>
    %858 = arith.addf %851, %857 : vector<1x256xf32>
    %c241_i32_349 = arith.constant 241 : i32
    %859 = tpu.dynamic_rotate %545 by %c241_i32_349 dim 1 : vector<1x256xf32>, i32 -> vector<1x256xf32>
    %cst_350 = arith.constant 0.000000e+00 : f32
    %860 = vector.broadcast %cst_350 : f32 to vector<1x256xf32>
    %861 = arith.select %27, %859, %860 : vector<1x256xi1>, vector<1x256xf32>
    %c24_351 = arith.constant 24 : index
    %862 = memref.load %arg1[%c24_351] : memref<27xf32, #tpu.memory_space<smem>>
    %863 = vector.broadcast %862 : f32 to vector<1x256xf32>
    %864 = arith.mulf %863, %861 : vector<1x256xf32>
    %865 = arith.addf %858, %864 : vector<1x256xf32>
    %c240_i32_352 = arith.constant 240 : i32
    %866 = tpu.dynamic_rotate %541 by %c240_i32_352 dim 1 : vector<1x256xf32>, i32 -> vector<1x256xf32>
    %cst_353 = arith.constant 0.000000e+00 : f32
    %867 = vector.broadcast %cst_353 : f32 to vector<1x256xf32>
    %868 = arith.select %20, %866, %867 : vector<1x256xi1>, vector<1x256xf32>
    %c7_354 = arith.constant 7 : index
    %869 = memref.load %arg1[%c7_354] : memref<27xf32, #tpu.memory_space<smem>>
    %870 = vector.broadcast %869 : f32 to vector<1x256xf32>
    %871 = arith.mulf %870, %868 : vector<1x256xf32>
    %872 = arith.addf %865, %871 : vector<1x256xf32>
    %c240_i32_355 = arith.constant 240 : i32
    %873 = tpu.dynamic_rotate %543 by %c240_i32_355 dim 1 : vector<1x256xf32>, i32 -> vector<1x256xf32>
    %cst_356 = arith.constant 0.000000e+00 : f32
    %874 = vector.broadcast %cst_356 : f32 to vector<1x256xf32>
    %875 = arith.select %20, %873, %874 : vector<1x256xi1>, vector<1x256xf32>
    %c16_357 = arith.constant 16 : index
    %876 = memref.load %arg1[%c16_357] : memref<27xf32, #tpu.memory_space<smem>>
    %877 = vector.broadcast %876 : f32 to vector<1x256xf32>
    %878 = arith.mulf %877, %875 : vector<1x256xf32>
    %879 = arith.addf %872, %878 : vector<1x256xf32>
    %c240_i32_358 = arith.constant 240 : i32
    %880 = tpu.dynamic_rotate %545 by %c240_i32_358 dim 1 : vector<1x256xf32>, i32 -> vector<1x256xf32>
    %cst_359 = arith.constant 0.000000e+00 : f32
    %881 = vector.broadcast %cst_359 : f32 to vector<1x256xf32>
    %882 = arith.select %20, %880, %881 : vector<1x256xi1>, vector<1x256xf32>
    %c25_360 = arith.constant 25 : index
    %883 = memref.load %arg1[%c25_360] : memref<27xf32, #tpu.memory_space<smem>>
    %884 = vector.broadcast %883 : f32 to vector<1x256xf32>
    %885 = arith.mulf %884, %882 : vector<1x256xf32>
    %886 = arith.addf %879, %885 : vector<1x256xf32>
    %c239_i32_361 = arith.constant 239 : i32
    %887 = tpu.dynamic_rotate %541 by %c239_i32_361 dim 1 : vector<1x256xf32>, i32 -> vector<1x256xf32>
    %cst_362 = arith.constant 0.000000e+00 : f32
    %888 = vector.broadcast %cst_362 : f32 to vector<1x256xf32>
    %889 = arith.select %28, %887, %888 : vector<1x256xi1>, vector<1x256xf32>
    %c8_363 = arith.constant 8 : index
    %890 = memref.load %arg1[%c8_363] : memref<27xf32, #tpu.memory_space<smem>>
    %891 = vector.broadcast %890 : f32 to vector<1x256xf32>
    %892 = arith.mulf %891, %889 : vector<1x256xf32>
    %893 = arith.addf %886, %892 : vector<1x256xf32>
    %c239_i32_364 = arith.constant 239 : i32
    %894 = tpu.dynamic_rotate %543 by %c239_i32_364 dim 1 : vector<1x256xf32>, i32 -> vector<1x256xf32>
    %cst_365 = arith.constant 0.000000e+00 : f32
    %895 = vector.broadcast %cst_365 : f32 to vector<1x256xf32>
    %896 = arith.select %28, %894, %895 : vector<1x256xi1>, vector<1x256xf32>
    %c17_366 = arith.constant 17 : index
    %897 = memref.load %arg1[%c17_366] : memref<27xf32, #tpu.memory_space<smem>>
    %898 = vector.broadcast %897 : f32 to vector<1x256xf32>
    %899 = arith.mulf %898, %896 : vector<1x256xf32>
    %900 = arith.addf %893, %899 : vector<1x256xf32>
    %c239_i32_367 = arith.constant 239 : i32
    %901 = tpu.dynamic_rotate %545 by %c239_i32_367 dim 1 : vector<1x256xf32>, i32 -> vector<1x256xf32>
    %cst_368 = arith.constant 0.000000e+00 : f32
    %902 = vector.broadcast %cst_368 : f32 to vector<1x256xf32>
    %903 = arith.select %28, %901, %902 : vector<1x256xi1>, vector<1x256xf32>
    %c26_369 = arith.constant 26 : index
    %904 = memref.load %arg1[%c26_369] : memref<27xf32, #tpu.memory_space<smem>>
    %905 = vector.broadcast %904 : f32 to vector<1x256xf32>
    %906 = arith.mulf %905, %903 : vector<1x256xf32>
    %907 = arith.addf %900, %906 : vector<1x256xf32>
    %908 = arith.addf %792, %845 : vector<1x256xf32>
    %909 = arith.addf %908, %907 : vector<1x256xf32>
    %910 = vector.broadcast %730 : f32 to vector<1x256xf32>
    %911 = arith.addf %909, %910 : vector<1x256xf32>
    %cst_370 = arith.constant 0.000000e+00 : f32
    %912 = vector.broadcast %cst_370 : f32 to vector<1x256xf32>
    %913 = arith.maximumf %911, %912 : vector<1x256xf32>
    %c2_371 = arith.constant 2 : index
    %914 = memref.load %arg4[%c2_371] : memref<3xf32, #tpu.memory_space<smem>>
    %c17_i32_372 = arith.constant 17 : i32
    %915 = tpu.dynamic_rotate %729 by %c17_i32_372 dim 1 : vector<1x256xf32>, i32 -> vector<1x256xf32>
    %cst_373 = arith.constant 0.000000e+00 : f32
    %916 = vector.broadcast %cst_373 : f32 to vector<1x256xf32>
    %917 = arith.select %25, %915, %916 : vector<1x256xi1>, vector<1x256xf32>
    %c0_374 = arith.constant 0 : index
    %918 = memref.load %arg3[%c0_374] : memref<18xf32, #tpu.memory_space<smem>>
    %919 = vector.broadcast %918 : f32 to vector<1x256xf32>
    %920 = arith.mulf %919, %917 : vector<1x256xf32>
    %c17_i32_375 = arith.constant 17 : i32
    %921 = tpu.dynamic_rotate %913 by %c17_i32_375 dim 1 : vector<1x256xf32>, i32 -> vector<1x256xf32>
    %cst_376 = arith.constant 0.000000e+00 : f32
    %922 = vector.broadcast %cst_376 : f32 to vector<1x256xf32>
    %923 = arith.select %25, %921, %922 : vector<1x256xi1>, vector<1x256xf32>
    %c9_377 = arith.constant 9 : index
    %924 = memref.load %arg3[%c9_377] : memref<18xf32, #tpu.memory_space<smem>>
    %925 = vector.broadcast %924 : f32 to vector<1x256xf32>
    %926 = arith.mulf %925, %923 : vector<1x256xf32>
    %927 = arith.addf %920, %926 : vector<1x256xf32>
    %c16_i32_378 = arith.constant 16 : i32
    %928 = tpu.dynamic_rotate %729 by %c16_i32_378 dim 1 : vector<1x256xf32>, i32 -> vector<1x256xf32>
    %cst_379 = arith.constant 0.000000e+00 : f32
    %929 = vector.broadcast %cst_379 : f32 to vector<1x256xf32>
    %930 = arith.select %18, %928, %929 : vector<1x256xi1>, vector<1x256xf32>
    %c1_380 = arith.constant 1 : index
    %931 = memref.load %arg3[%c1_380] : memref<18xf32, #tpu.memory_space<smem>>
    %932 = vector.broadcast %931 : f32 to vector<1x256xf32>
    %933 = arith.mulf %932, %930 : vector<1x256xf32>
    %934 = arith.addf %927, %933 : vector<1x256xf32>
    %c16_i32_381 = arith.constant 16 : i32
    %935 = tpu.dynamic_rotate %913 by %c16_i32_381 dim 1 : vector<1x256xf32>, i32 -> vector<1x256xf32>
    %cst_382 = arith.constant 0.000000e+00 : f32
    %936 = vector.broadcast %cst_382 : f32 to vector<1x256xf32>
    %937 = arith.select %18, %935, %936 : vector<1x256xi1>, vector<1x256xf32>
    %c10_383 = arith.constant 10 : index
    %938 = memref.load %arg3[%c10_383] : memref<18xf32, #tpu.memory_space<smem>>
    %939 = vector.broadcast %938 : f32 to vector<1x256xf32>
    %940 = arith.mulf %939, %937 : vector<1x256xf32>
    %941 = arith.addf %934, %940 : vector<1x256xf32>
    %c15_i32_384 = arith.constant 15 : i32
    %942 = tpu.dynamic_rotate %729 by %c15_i32_384 dim 1 : vector<1x256xf32>, i32 -> vector<1x256xf32>
    %cst_385 = arith.constant 0.000000e+00 : f32
    %943 = vector.broadcast %cst_385 : f32 to vector<1x256xf32>
    %944 = arith.select %26, %942, %943 : vector<1x256xi1>, vector<1x256xf32>
    %c2_386 = arith.constant 2 : index
    %945 = memref.load %arg3[%c2_386] : memref<18xf32, #tpu.memory_space<smem>>
    %946 = vector.broadcast %945 : f32 to vector<1x256xf32>
    %947 = arith.mulf %946, %944 : vector<1x256xf32>
    %948 = arith.addf %941, %947 : vector<1x256xf32>
    %c15_i32_387 = arith.constant 15 : i32
    %949 = tpu.dynamic_rotate %913 by %c15_i32_387 dim 1 : vector<1x256xf32>, i32 -> vector<1x256xf32>
    %cst_388 = arith.constant 0.000000e+00 : f32
    %950 = vector.broadcast %cst_388 : f32 to vector<1x256xf32>
    %951 = arith.select %26, %949, %950 : vector<1x256xi1>, vector<1x256xf32>
    %c11_389 = arith.constant 11 : index
    %952 = memref.load %arg3[%c11_389] : memref<18xf32, #tpu.memory_space<smem>>
    %953 = vector.broadcast %952 : f32 to vector<1x256xf32>
    %954 = arith.mulf %953, %951 : vector<1x256xf32>
    %955 = arith.addf %948, %954 : vector<1x256xf32>
    %c1_i32_390 = arith.constant 1 : i32
    %956 = tpu.dynamic_rotate %729 by %c1_i32_390 dim 1 : vector<1x256xf32>, i32 -> vector<1x256xf32>
    %cst_391 = arith.constant 0.000000e+00 : f32
    %957 = vector.broadcast %cst_391 : f32 to vector<1x256xf32>
    %958 = arith.select %22, %956, %957 : vector<1x256xi1>, vector<1x256xf32>
    %c3_392 = arith.constant 3 : index
    %959 = memref.load %arg3[%c3_392] : memref<18xf32, #tpu.memory_space<smem>>
    %960 = vector.broadcast %959 : f32 to vector<1x256xf32>
    %961 = arith.mulf %960, %958 : vector<1x256xf32>
    %c1_i32_393 = arith.constant 1 : i32
    %962 = tpu.dynamic_rotate %913 by %c1_i32_393 dim 1 : vector<1x256xf32>, i32 -> vector<1x256xf32>
    %cst_394 = arith.constant 0.000000e+00 : f32
    %963 = vector.broadcast %cst_394 : f32 to vector<1x256xf32>
    %964 = arith.select %22, %962, %963 : vector<1x256xi1>, vector<1x256xf32>
    %c12_395 = arith.constant 12 : index
    %965 = memref.load %arg3[%c12_395] : memref<18xf32, #tpu.memory_space<smem>>
    %966 = vector.broadcast %965 : f32 to vector<1x256xf32>
    %967 = arith.mulf %966, %964 : vector<1x256xf32>
    %968 = arith.addf %961, %967 : vector<1x256xf32>
    %c4_396 = arith.constant 4 : index
    %969 = memref.load %arg3[%c4_396] : memref<18xf32, #tpu.memory_space<smem>>
    %970 = vector.broadcast %969 : f32 to vector<1x256xf32>
    %971 = arith.mulf %970, %729 : vector<1x256xf32>
    %972 = arith.addf %968, %971 : vector<1x256xf32>
    %c13_397 = arith.constant 13 : index
    %973 = memref.load %arg3[%c13_397] : memref<18xf32, #tpu.memory_space<smem>>
    %974 = vector.broadcast %973 : f32 to vector<1x256xf32>
    %975 = arith.mulf %974, %913 : vector<1x256xf32>
    %976 = arith.addf %972, %975 : vector<1x256xf32>
    %c255_i32_398 = arith.constant 255 : i32
    %977 = tpu.dynamic_rotate %729 by %c255_i32_398 dim 1 : vector<1x256xf32>, i32 -> vector<1x256xf32>
    %cst_399 = arith.constant 0.000000e+00 : f32
    %978 = vector.broadcast %cst_399 : f32 to vector<1x256xf32>
    %979 = arith.select %24, %977, %978 : vector<1x256xi1>, vector<1x256xf32>
    %c5_400 = arith.constant 5 : index
    %980 = memref.load %arg3[%c5_400] : memref<18xf32, #tpu.memory_space<smem>>
    %981 = vector.broadcast %980 : f32 to vector<1x256xf32>
    %982 = arith.mulf %981, %979 : vector<1x256xf32>
    %983 = arith.addf %976, %982 : vector<1x256xf32>
    %c255_i32_401 = arith.constant 255 : i32
    %984 = tpu.dynamic_rotate %913 by %c255_i32_401 dim 1 : vector<1x256xf32>, i32 -> vector<1x256xf32>
    %cst_402 = arith.constant 0.000000e+00 : f32
    %985 = vector.broadcast %cst_402 : f32 to vector<1x256xf32>
    %986 = arith.select %24, %984, %985 : vector<1x256xi1>, vector<1x256xf32>
    %c14_403 = arith.constant 14 : index
    %987 = memref.load %arg3[%c14_403] : memref<18xf32, #tpu.memory_space<smem>>
    %988 = vector.broadcast %987 : f32 to vector<1x256xf32>
    %989 = arith.mulf %988, %986 : vector<1x256xf32>
    %990 = arith.addf %983, %989 : vector<1x256xf32>
    %c241_i32_404 = arith.constant 241 : i32
    %991 = tpu.dynamic_rotate %729 by %c241_i32_404 dim 1 : vector<1x256xf32>, i32 -> vector<1x256xf32>
    %cst_405 = arith.constant 0.000000e+00 : f32
    %992 = vector.broadcast %cst_405 : f32 to vector<1x256xf32>
    %993 = arith.select %27, %991, %992 : vector<1x256xi1>, vector<1x256xf32>
    %c6_406 = arith.constant 6 : index
    %994 = memref.load %arg3[%c6_406] : memref<18xf32, #tpu.memory_space<smem>>
    %995 = vector.broadcast %994 : f32 to vector<1x256xf32>
    %996 = arith.mulf %995, %993 : vector<1x256xf32>
    %c241_i32_407 = arith.constant 241 : i32
    %997 = tpu.dynamic_rotate %913 by %c241_i32_407 dim 1 : vector<1x256xf32>, i32 -> vector<1x256xf32>
    %cst_408 = arith.constant 0.000000e+00 : f32
    %998 = vector.broadcast %cst_408 : f32 to vector<1x256xf32>
    %999 = arith.select %27, %997, %998 : vector<1x256xi1>, vector<1x256xf32>
    %c15_409 = arith.constant 15 : index
    %1000 = memref.load %arg3[%c15_409] : memref<18xf32, #tpu.memory_space<smem>>
    %1001 = vector.broadcast %1000 : f32 to vector<1x256xf32>
    %1002 = arith.mulf %1001, %999 : vector<1x256xf32>
    %1003 = arith.addf %996, %1002 : vector<1x256xf32>
    %c240_i32_410 = arith.constant 240 : i32
    %1004 = tpu.dynamic_rotate %729 by %c240_i32_410 dim 1 : vector<1x256xf32>, i32 -> vector<1x256xf32>
    %cst_411 = arith.constant 0.000000e+00 : f32
    %1005 = vector.broadcast %cst_411 : f32 to vector<1x256xf32>
    %1006 = arith.select %20, %1004, %1005 : vector<1x256xi1>, vector<1x256xf32>
    %c7_412 = arith.constant 7 : index
    %1007 = memref.load %arg3[%c7_412] : memref<18xf32, #tpu.memory_space<smem>>
    %1008 = vector.broadcast %1007 : f32 to vector<1x256xf32>
    %1009 = arith.mulf %1008, %1006 : vector<1x256xf32>
    %1010 = arith.addf %1003, %1009 : vector<1x256xf32>
    %c240_i32_413 = arith.constant 240 : i32
    %1011 = tpu.dynamic_rotate %913 by %c240_i32_413 dim 1 : vector<1x256xf32>, i32 -> vector<1x256xf32>
    %cst_414 = arith.constant 0.000000e+00 : f32
    %1012 = vector.broadcast %cst_414 : f32 to vector<1x256xf32>
    %1013 = arith.select %20, %1011, %1012 : vector<1x256xi1>, vector<1x256xf32>
    %c16_415 = arith.constant 16 : index
    %1014 = memref.load %arg3[%c16_415] : memref<18xf32, #tpu.memory_space<smem>>
    %1015 = vector.broadcast %1014 : f32 to vector<1x256xf32>
    %1016 = arith.mulf %1015, %1013 : vector<1x256xf32>
    %1017 = arith.addf %1010, %1016 : vector<1x256xf32>
    %c239_i32_416 = arith.constant 239 : i32
    %1018 = tpu.dynamic_rotate %729 by %c239_i32_416 dim 1 : vector<1x256xf32>, i32 -> vector<1x256xf32>
    %cst_417 = arith.constant 0.000000e+00 : f32
    %1019 = vector.broadcast %cst_417 : f32 to vector<1x256xf32>
    %1020 = arith.select %28, %1018, %1019 : vector<1x256xi1>, vector<1x256xf32>
    %c8_418 = arith.constant 8 : index
    %1021 = memref.load %arg3[%c8_418] : memref<18xf32, #tpu.memory_space<smem>>
    %1022 = vector.broadcast %1021 : f32 to vector<1x256xf32>
    %1023 = arith.mulf %1022, %1020 : vector<1x256xf32>
    %1024 = arith.addf %1017, %1023 : vector<1x256xf32>
    %c239_i32_419 = arith.constant 239 : i32
    %1025 = tpu.dynamic_rotate %913 by %c239_i32_419 dim 1 : vector<1x256xf32>, i32 -> vector<1x256xf32>
    %cst_420 = arith.constant 0.000000e+00 : f32
    %1026 = vector.broadcast %cst_420 : f32 to vector<1x256xf32>
    %1027 = arith.select %28, %1025, %1026 : vector<1x256xi1>, vector<1x256xf32>
    %c17_421 = arith.constant 17 : index
    %1028 = memref.load %arg3[%c17_421] : memref<18xf32, #tpu.memory_space<smem>>
    %1029 = vector.broadcast %1028 : f32 to vector<1x256xf32>
    %1030 = arith.mulf %1029, %1027 : vector<1x256xf32>
    %1031 = arith.addf %1024, %1030 : vector<1x256xf32>
    %1032 = arith.addf %955, %990 : vector<1x256xf32>
    %1033 = arith.addf %1032, %1031 : vector<1x256xf32>
    %1034 = vector.broadcast %914 : f32 to vector<1x256xf32>
    %1035 = arith.addf %1033, %1034 : vector<1x256xf32>
    %c1_422 = arith.constant 1 : index
    %c0_423 = arith.constant 0 : index
    %c0_424 = arith.constant 0 : index
    %1036 = vector.load %arg7[%c1_422, %c0_423, %c0_424] : memref<2x1x256xf32, #tpu.memory_space<vmem>>, vector<1x1x256xf32>
    %1037 = vector.shape_cast %1036 : vector<1x1x256xf32> to vector<1x256xf32>
    %1038 = vector.shape_cast %1035 : vector<1x256xf32> to vector<1x1x256xf32>
    tpu.vector_store %arg7[%c1_422, %c0_423, %c0_424], %1038 {strides = array<i32>} : memref<2x1x256xf32, #tpu.memory_space<vmem>>, vector<1x1x256xf32>,
    return
  }
  func.func @transform_0(%arg0: i32) -> i32 {
    %c0_i32 = arith.constant 0 : i32
    %c0_i32_0 = arith.constant 0 : i32
    return %c0_i32 : i32
  }
  func.func @transform_1(%arg0: i32) -> i32 {
    %c0_i32 = arith.constant 0 : i32
    %c0_i32_0 = arith.constant 0 : i32
    return %c0_i32 : i32
  }
  func.func @transform_2(%arg0: i32) -> i32 {
    %c0_i32 = arith.constant 0 : i32
    %c0_i32_0 = arith.constant 0 : i32
    return %c0_i32 : i32
  }
  func.func @transform_3(%arg0: i32) -> i32 {
    %c0_i32 = arith.constant 0 : i32
    %c0_i32_0 = arith.constant 0 : i32
    return %c0_i32 : i32
  }
  func.func @transform_4(%arg0: i32) -> (i32, i32, i32) {
    %c0_i32 = arith.constant 0 : i32
    %c0_i32_0 = arith.constant 0 : i32
    %c0_i32_1 = arith.constant 0 : i32
    return %arg0, %c0_i32, %c0_i32_0 : i32, i32, i32
  }
  func.func @transform_5(%arg0: i32) -> (i32, i32, i32) {
    %c0_i32 = arith.constant 0 : i32
    %c0_i32_0 = arith.constant 0 : i32
    %c0_i32_1 = arith.constant 0 : i32
    return %arg0, %c0_i32, %c0_i32_0 : i32, i32, i32
  }
  func.func @transform_6(%arg0: i32) -> (i32, i32, i32) {
    %c0_i32 = arith.constant 0 : i32
    %c0_i32_0 = arith.constant 0 : i32
    %c0_i32_1 = arith.constant 0 : i32
    return %arg0, %c0_i32, %c0_i32_0 : i32, i32, i32
  }
}

</mosaic_0001>

<bundles_post_ra>
// kernel: tpu_custom_call.1
= control target key start
LH: loop header
LB: loop body
LE: loop exit
PB: predicated region body
PF: predicated region fallthrough
CT: control target
= control target key end

     0   :  { %s5931_s0 = inlined_call_operand.vmem [shape: f32[27], index: 0, kind: input, shape index: {}]   ;;  %s5932_s1 = inlined_call_operand.vmem [shape: f32[27], index: 1, kind: input, shape index: {}]   ;;  %s5933_s2 = inlined_call_operand.vmem [shape: f32[18], index: 2, kind: input, shape index: {}]   ;;  %s5934_s3 = inlined_call_operand.vmem [shape: f32[3], index: 3, kind: input, shape index: {}]   ;;  %s5935_s4 = inlined_call_operand.vmem [shape: f32[4,3,256], index: 4, kind: input, shape index: {}]   ;;  %s5936_s5 = inlined_call_operand.vmem [shape: f32[4,3,256], index: 5, kind: input, shape index: {}]   ;;  %s5937_s6 = inlined_call_operand.hbm [shape: f32[4,1,256], index: 6, kind: output, shape index: {}]  }
   0x1   :  { %5967 = sst [smem:[#allocation16_spill]] %s5931_s0 }
   0x2   :  { %11 = vsyncpa [#allocation4], 0 }
   0x3   :  { %12 = vsyncpa [#allocation6], 0 }
   0x4   :  { %13 = vsyncpa [#allocation9], 0 }
   0x5   :  { %14 = vsyncpa [#allocation3], 0 }
   0x6   :  { %16 = vsyncpa [#allocation3 + $0x1], 0  ;;  %s3032_s21 = smov 0   ;;  %s3034_s22 = smov 0  }
   0x7   :  { %s3036_s23 = smov 0   ;;  %s3038_s24 = smov 0  }
   0x8 LB: > { %s3053_s25 = sadd.s32 4294967295, %s2981_s24   ;;  %s2575_s26 = sadd.s32 4294967294, %s2981_s24   ;;  %s2981_s24 = sphi %s3038_s24, %s6138_s24   ;;  %s2977_s23 = sphi %s3036_s23, %s6137_s23   ;;  %s2973_s22 = sphi %s3034_s22, %s6136_s22   ;;  %s2969_s21 = sphi %s3032_s21, %s6135_s21  }
   0x9   : > { %s3057_s27 = sadd.s32 1, %s2981_s24   ;;  %s165_s28 = sadd.s32 1, %s2977_s23 }
   0xa   : > { %s162_s29 = ssub.s32 %s2981_s24, %s3057_s27  ;;  %p175_p0 = scmp.ne.s32.totalorder %s2977_s23, %s2973_s22 }
   0xb   : > { %p163_p1 = scmp.eq.s32.totalorder %s162_s29, 0  ;;  %p176_p2 = scmp.eq.s32.totalorder %s3053_s25, 1 }
   0xc   : > { %p181_p3 = scmp.ne.s32.totalorder %s2973_s22, %s2969_s21  ;;  %p182_p4 = scmp.eq.s32.totalorder %s2575_s26, 1 }
   0xd   : > { %s3068_s30 = scalar_select %p163_p1, %s2977_s23, %s165_s28  }
   0xe   : > { %p3070_p5 = por %p176_p2, %p175_p0  ;;  %p3074_p6 = por %p182_p4, %p181_p3 }
   0xf   : > { %p2576_p7 = scmp.ge.s32.totalorder %s2981_s24, 1  ;;  %p189_p8 = scmp.lt.s32.totalorder %s2981_s24, 3 }
  0x10   : > { %p2790_p9 = scmp.eq.s32.totalorder %s3053_s25, 0  ;;  %s211_s12 = sshll.u32 %s5932_s1, 4  ;;  %s212_s12 = int_to_ptr.vmem [resolvable:$true] %s211_s12 }
  0x11   : > { %p3081_p10 = pnand %p2576_p7, %p189_p8  ;;  %s5971_s0 = sld [smem:[#allocation16_spill]] }
  0x12   : > { %s221_s18 = sshll.u32 %s5933_s2, 4  ;;  %s231_s26 = sshll.u32 %s5934_s3, 4  ;;  %s222_s18 = int_to_ptr.vmem [resolvable:$true] %s221_s18  ;;  %s232_s26 = int_to_ptr.vmem [resolvable:$true] %s231_s26 }
  0x13   : > { %p2773_p11 = pneg %p3081_p10  ;;  %s2983_s28 = smov [#allocation5]  }
  0x14   : > { %s2984_s29 = smov [#allocation2]   ;;  %s2985_s10 = smov [#allocation7]  }
  0x15   : > { %p2774_p12 = pnand %p2790_p9, %p2773_p11  ;;  %s2986_s11 = smov [#allocation8]  }
  0x17   : > { %s201_s15 = sshll.u32 %s5971_s0, 4  ;;  %264 = sbr.rel (%p3081_p10) target bundleno = 1083 (0x43b), region = 44  ;;  %s202_s15 = int_to_ptr.vmem [resolvable:$true] %s201_s15 }
  0x18   : > { %2779 = dma.vmem_to_smem (!%p2774_p12), %s212_s12, 16, %s2983_s28, [#allocation6]  }
  0x19   : > { %2776 = dma.vmem_to_smem (!%p2774_p12), %s202_s15, 16, %s2984_s29, [#allocation4]  }
  0x1a   : > { %2782 = dma.vmem_to_smem (!%p2774_p12), %s222_s18, 16, %s2985_s10, [#allocation6]  }
  0x1b   : > { %2785 = dma.vmem_to_smem (!%p2774_p12), %s232_s26, 16, %s2986_s11, [#allocation9]  }
  0x1c   : > { %2952 = dma.done.wait (%p2790_p9), [#allocation4], 16  }
  0x1d   : > { %2954 = vsyncadd (%p2790_p9), [#allocation4], 4294967280 }
  0x1e   : > { %2956 = dma.done.wait (%p2790_p9), [#allocation6], 32  }
  0x1f   : > { %2958 = vsyncadd (%p2790_p9), [#allocation6], 4294967264 }
  0x20   : > { %2960 = dma.done.wait (%p2790_p9), [#allocation9], 16  }
  0x21   : > { %2962 = vsyncadd (%p2790_p9), [#allocation9], 4294967280 }
  0x22   : > { %286 = sfence }
  0x23   : > { %s2588_s9 = sshll.u32 %s3053_s25, 1  ;;  %s5956_s16 = smov 17   ;;  %v5944_v41 = vlaneseq }
  0x24   : > { %p319_p13 = scmp.lt.s32.totalorder %s2588_s9, 3  ;;  %s5940_s17 = smov 16  }
  0x25   : > { %s5938_s18 = smov 15   ;;  %s5942_s19 = smov 1   ;;  %v3308_v43 = vand.u32 127, %v5944_v41 }
  0x26   : > { %s6140_s9 = smov (!%p319_p13, %s2588_s9), 3  ;;  %s5965_s20 = smov 127  }
  0x27   : > { %s2752_s12 = sshll.u32 %s6140_s9, 3  ;;  %s5958_s26 = smov 113   ;;  %v3321_v46 = vadd.s32 128, %v3308_v43  ;;  %v340_v47 = vand.u32 15, %v3308_v43  ;;  %vm5960_vm0 = vcmp.ge.s32.totalorder %v3308_v43, 16  ;;  %vm5963_vm2 = vcmp.lt.s32.totalorder %v3308_v43, 17 }
  0x28   : > { %s3124_s15 = scalar_lea.vmem %s5935_s4, %s2752_s12  ;;  %s5951_s28 = smov 112   ;;  %vm5962_vm5 = vcmp.lt.s32.totalorder %v3308_v43, 16  ;;  %vm5953_vm8 = vcmp.lt.s32.totalorder %v3308_v43, 15  ;;  %vm5955_vm9 = vcmp.lt.s32.totalorder %v3308_v43, 1  ;;  %vm5947_vm11 = vcmp.lt.s32.totalorder %v3308_v43, 127 }
  0x29   : > { %v3127_v0 = vld [vmem:[%s3124_s15 + $0x1] ss:$4 sm:$0x3]  ;;  %v3130_v1 = vld [vmem:[%s3124_s15] ss:$4 sm:$0x3]  ;;  %s3213_s13 = scalar_lea.vmem %s5936_s5, %s2752_s12 }
  0x2a   : > { %v3133_v2 = vperm.slane %v3127_v0, 0  ;;  %v388_v3 = vperm.slane %v3130_v1, 0  ;;  %v3137_v4 = vld [vmem:[%s3124_s15 + $0x2] ss:$4 sm:$0x3]  ;;  %v407_v6 = vperm.slane %v3127_v0, 1 }
  0x2b   : > { %v425_v5 = vperm.slane %v3137_v4, 0  ;;  %v389_v7 = vperm.slane %v3130_v1, 1  ;;  %v426_v8 = vperm.slane %v3137_v4, 1  ;;  %s5949_s29 = smov 111   ;;  %s3324_s9 = sld [smem:[#allocation5 + $0x9]]  ;;  %v347_v49 = vand.u32 15, %v3321_v46 }
  0x2c   : > { %410 = vrot.lane.b32.xlu1 %v3133_v2, %s5956_s16  ;;  %392 = vrot.lane.b32.xlu0 %v388_v3, %s5956_s16  ;;  %v3218_v15 = vld [vmem:[%s3213_s13] ss:$4 sm:$0x3]  ;;  %v3234_v21 = vld [vmem:[%s3213_s13 + $0x1] ss:$4 sm:$0x3] }
  0x2d   : > { %429 = vrot.lane.b32.xlu2 %v425_v5, %s5956_s16  ;;  %v3226_v18 = vperm.slane %v3218_v15, 1  ;;  %v3229_v19 = vperm.slane %v3218_v15, 0  ;;  %5972 = vst [vmem:[#allocation15_spill] sm:$0xff] %v3234_v21  ;;  %v3237_v22 = vperm.slane %v3234_v21, 0  ;;  %v3253_v27 = vperm.slane %v3234_v21, 1  ;;  %s3328_s12 = sld [smem:[#allocation5]] }
  0x2e   : > { %v2597_v23 = vld [vmem:[%s3213_s13 + $0x2] ss:$4 sm:$0x3]  ;;  %vm3334_vm1 = vcmp.ge.s32.totalorder %v340_v47, 1  ;;  %s3347_s14 = sld [smem:[#allocation5 + $0x12]]  ;;  %vm3379_vm4 = vcmp.ge.s32.totalorder %v347_v49, 1 }
  0x2f   : > { %v3250_v26 = vperm.slane %v2597_v23, 0  ;;  %v3257_v29 = vperm.slane %v2597_v23, 1  ;;  %vm3371_vm3 = vmand %vm5960_vm0, %vm3334_vm1  ;;  %s3375_s10 = sld [smem:[#allocation5 + $0x1]]  ;;  %vm3464_vm6 = vcmp.lt.s32.totalorder %v340_v47, 15  ;;  %vm3470_vm7 = vcmp.lt.s32.totalorder %v347_v49, 15 }
  0x30   : > { %s3395_s11 = sld [smem:[#allocation5 + $0xa]]  ;;  %vm3540_vm10 = vmand %vm5960_vm0, %vm3464_vm6  ;;  %vm363_vm12 = vcmp.lt.s32.totalorder %v3321_v46, 240  ;;  %vm5954_vm13 = vcmp.lt.s32.totalorder %v3308_v43, 113  ;;  %vm5948_vm15 = vcmp.lt.s32.totalorder %v3308_v43, 112 }
  0x31   : > { %v419_v59 = vstv %s3324_s9  ;;  %s3398_s9 = sld [smem:[#allocation5 + $0x13]]  ;;  %vm3675_vm14 = vmand %vm363_vm12, %vm3379_vm4 }
  0x32   : > { %s4520_s0 = sld [smem:[#allocation7 + $0x2]] }
  0x33   : > { %v402_v63 = vstv %s3328_s12  ;;  %s3416_s12 = sld [smem:[#allocation5 + $0x2]] }
  0x34   : > { %412 = vrot.lane.b32.xlu1 %v407_v6, %s5956_s16  ;;  %394 = vrot.lane.b32.xlu0 %v389_v7, %s5956_s16 }
  0x35   : > { %431 = vrot.lane.b32.xlu2 %v426_v8, %s5956_s16 }
  0x3c   : > { %445 = vrot.lane.b32.xlu1 %v389_v7, %s5940_s17  ;;  %443 = vrot.lane.b32.xlu0 %v388_v3, %s5940_s17 }
  0x3d   : > { %458 = vrot.lane.b32.xlu2 %v3133_v2, %s5940_s17 }
  0x44   : > { %472 = vrot.lane.b32.xlu1 %v425_v5, %s5940_s17  ;;  %460 = vrot.lane.b32.xlu0 %v407_v6, %s5940_s17 }
  0x45   : > { %474 = vrot.lane.b32.xlu2 %v426_v8, %s5940_s17 }
  0x4c   : > { %488 = vrot.lane.b32.xlu1 %v389_v7, %s5938_s18  ;;  %486 = vrot.lane.b32.xlu0 %v388_v3, %s5938_s18 }
  0x4d   : > { %501 = vrot.lane.b32.xlu2 %v3133_v2, %s5938_s18 }
  0x54   : > { %515 = vrot.lane.b32.xlu1 %v425_v5, %s5938_s18  ;;  %503 = vrot.lane.b32.xlu0 %v407_v6, %s5938_s18 }
  0x55   : > { %517 = vrot.lane.b32.xlu2 %v426_v8, %s5938_s18 }
  0x5c   : > { %531 = vrot.lane.b32.xlu1 %v389_v7, %s5942_s19  ;;  %529 = vrot.lane.b32.xlu0 %v388_v3, %s5942_s19 }
  0x5d   : > { %542 = vrot.lane.b32.xlu2 %v3133_v2, %s5942_s19 }
  0x64   : > { %556 = vrot.lane.b32.xlu1 %v425_v5, %s5942_s19  ;;  %544 = vrot.lane.b32.xlu0 %v407_v6, %s5942_s19 }
  0x65   : > { %558 = vrot.lane.b32.xlu2 %v426_v8, %s5942_s19 }
  0x6c   : > { %602 = vrot.lane.b32.xlu1 %v389_v7, %s5965_s20  ;;  %600 = vrot.lane.b32.xlu0 %v388_v3, %s5965_s20 }
  0x6d   : > { %615 = vrot.lane.b32.xlu2 %v3133_v2, %s5965_s20 }
  0x74   : > { %629 = vrot.lane.b32.xlu1 %v425_v5, %s5965_s20  ;;  %617 = vrot.lane.b32.xlu0 %v407_v6, %s5965_s20 }
  0x75   : > { %631 = vrot.lane.b32.xlu2 %v426_v8, %s5965_s20 }
  0x7c   : > { %645 = vrot.lane.b32.xlu1 %v389_v7, %s5958_s26  ;;  %643 = vrot.lane.b32.xlu0 %v388_v3, %s5958_s26 }
  0x7d   : > { %656 = vrot.lane.b32.xlu2 %v3133_v2, %s5958_s26 }
  0x84   : > { %670 = vrot.lane.b32.xlu1 %v425_v5, %s5958_s26  ;;  %658 = vrot.lane.b32.xlu0 %v407_v6, %s5958_s26 }
  0x85   : > { %672 = vrot.lane.b32.xlu2 %v426_v8, %s5958_s26 }
  0x87   : > { %v3185_v9 = vpop.permute.xlu2 %429 }
  0x8c   : > { %686 = vrot.lane.b32.xlu1 %v389_v7, %s5951_s28  ;;  %684 = vrot.lane.b32.xlu0 %v388_v3, %s5951_s28 }
  0x8d   : > { %699 = vrot.lane.b32.xlu2 %v3133_v2, %s5951_s28 }
  0x8f   : > { %v3191_v10 = vpop.permute.xlu2 %431 }
  0x94   : > { %713 = vrot.lane.b32.xlu1 %v425_v5, %s5951_s28  ;;  %701 = vrot.lane.b32.xlu0 %v407_v6, %s5951_s28 }
  0x95   : > { %715 = vrot.lane.b32.xlu2 %v426_v8, %s5951_s28 }
  0x97   : > { %v3196_v11 = vpop.permute.xlu2 %458 }
  0x9c   : > { %729 = vrot.lane.b32.xlu1 %v389_v7, %s5949_s29  ;;  %727 = vrot.lane.b32.xlu0 %v388_v3, %s5949_s29 }
  0x9d   : > { %742 = vrot.lane.b32.xlu2 %v3133_v2, %s5949_s29 }
  0x9e   : > { %v3200_v12 = vpop.permute.xlu1 %410  ;;  %v3202_v13 = vpop.permute.xlu0 %392 }
  0x9f   : > { %v3206_v14 = vpop.permute.xlu2 %474 }
  0xa4   : > { %756 = vrot.lane.b32.xlu1 %v425_v5, %s5949_s29  ;;  %744 = vrot.lane.b32.xlu0 %v407_v6, %s5949_s29  ;;  %v433_v5 = vsel %vm5963_vm2, %v3185_v9, %v3191_v10  ;;  %v434_v6 = vsel %vm5963_vm2, %v3191_v10, %v3185_v9 }
  0xa5   : > { %758 = vrot.lane.b32.xlu2 %v426_v8, %s5949_s29  ;;  %v435_v9 = vsel %vm3371_vm3, %v434_v6, 0.0  ;;  %v436_v10 = vsel %vm3379_vm4, %v433_v5, 0.0 }
  0xa6   : > { %v3220_v16 = vpop.permute.xlu1 %412  ;;  %v3222_v17 = vpop.permute.xlu0 %394 }
  0xa7   : > { %v3231_v20 = vpop.permute.xlu2 %501  ;;  %v415_v51 = vsel %vm5963_vm2, %v3220_v16, %v3200_v12  ;;  %v414_v52 = vsel %vm5963_vm2, %v3200_v12, %v3220_v16  ;;  %v397_v53 = vsel %vm5963_vm2, %v3202_v13, %v3222_v17  ;;  %v398_v54 = vsel %vm5963_vm2, %v3222_v17, %v3202_v13 }
  0xa8   : > { %v416_v60 = vsel %vm3371_vm3, %v415_v51, 0.0  ;;  %v417_v62 = vsel %vm3379_vm4, %v414_v52, 0.0  ;;  %v399_v2 = vsel %vm3371_vm3, %v398_v54, 0.0  ;;  %v400_v3 = vsel %vm3379_vm4, %v397_v53, 0.0 }
  0xa9   : > { %v420_v7 = vmul.f32 %v419_v59, %v416_v60  ;;  %v421_v8 = vmul.f32 %v419_v59, %v417_v62  ;;  %v403_v12 = vmul.f32 %v402_v63, %v399_v2  ;;  %v404_v13 = vmul.f32 %v402_v63, %v400_v3 }
  0xaa   : > { %v438_v17 = vstv %s3347_s14  ;;  %v453_v52 = vstv %s3375_s10  ;;  %s3440_s14 = sld [smem:[#allocation5 + $0x15]]  ;;  %v467_v3 = vstv %s3395_s11 }
  0xab   : > { %v422_v53 = vadd.f32 %v420_v7, %v403_v12  ;;  %v423_v54 = vadd.f32 %v421_v8, %v404_v13  ;;  %v439_v63 = vmul.f32 %v438_v17, %v435_v9  ;;  %v440_v2 = vmul.f32 %v438_v17, %v436_v10  ;;  %s3445_s10 = sld [smem:[#allocation5 + $0x4]] }
  0xac   : > { %787 = vrot.lane.b32.xlu1 %v3226_v18, %s5956_s16  ;;  %785 = vrot.lane.b32.xlu0 %v3229_v19, %s5956_s16  ;;  %s3479_s11 = sld [smem:[#allocation5 + $0x16]] }
  0xad   : > { %802 = vrot.lane.b32.xlu2 %v3237_v22, %s5956_s16  ;;  %v442_v13 = vadd.f32 %v440_v2, %v423_v54 }
  0xae   : > { %v3244_v24 = vpop.permute.xlu1 %445  ;;  %v3246_v25 = vpop.permute.xlu0 %443 }
  0xaf   : > { %v3255_v28 = vpop.permute.xlu2 %517  ;;  %v449_v16 = vsel %vm5962_vm5, %v3244_v24, %v3246_v25  ;;  %v448_v59 = vsel %vm5962_vm5, %v3246_v25, %v3244_v24  ;;  %v481_v25 = vstv %s3398_s9  ;;  %s3491_s9 = sld [smem:[#allocation5 + $0xb]] }
  0xb0   : > { %v450_v60 = vsel %vm5960_vm0, %v449_v16, 0.0  ;;  %v455_v8 = vmul.f32 %v453_v52, %v448_v59 }
  0xb1   : > { %v454_v7 = vmul.f32 %v453_v52, %v450_v60 }
  0xb2   : > { %v457_v59 = vadd.f32 %v455_v8, %v442_v13  ;;  %v571_v8 = vstv %s3445_s10  ;;  %s3598_s10 = sld [smem:[#allocation5 + $0x6]] }
  0xb4   : > { %821 = vrot.lane.b32.xlu1 %v3250_v26, %s5956_s16  ;;  %804 = vrot.lane.b32.xlu0 %v3253_v27, %s5956_s16 }
  0xb5   : > { %823 = vrot.lane.b32.xlu2 %v3257_v29, %s5956_s16 }
  0xb6   : > { %v3263_v30 = vpop.permute.xlu1 %472  ;;  %v3265_v31 = vpop.permute.xlu0 %460 }
  0xb7   : > { %v3269_v32 = vpop.permute.xlu2 %542  ;;  %v462_v5 = vsel %vm5962_vm5, %v3196_v11, %v3265_v31  ;;  %v463_v24 = vsel %vm5962_vm5, %v3265_v31, %v3196_v11  ;;  %v477_v6 = vsel %vm5962_vm5, %v3206_v14, %v3263_v30  ;;  %v441_v31 = vadd.f32 %v439_v63, %v422_v53 }
  0xb8   : > { %v476_v16 = vsel %vm5962_vm5, %v3263_v30, %v3206_v14  ;;  %v464_v47 = vsel %vm5960_vm0, %v463_v24, 0.0  ;;  %v469_v49 = vmul.f32 %v467_v3, %v462_v5  ;;  %v478_v17 = vsel %vm5960_vm0, %v477_v6, 0.0 }
  0xb9   : > { %v496_v14 = vstv %s3416_s12  ;;  %v456_v54 = vadd.f32 %v454_v7, %v441_v31  ;;  %v483_v60 = vmul.f32 %v481_v25, %v476_v16  ;;  %v468_v2 = vmul.f32 %v467_v3, %v464_v47  ;;  %s3586_s12 = sld [smem:[#allocation5 + $0xf]] }
  0xba   : > { %v482_v5 = vmul.f32 %v481_v25, %v478_v17  ;;  %v471_v6 = vadd.f32 %v469_v49, %v457_v59  ;;  %v565_v25 = vstv %s3440_s14  ;;  %v572_v59 = vmul.f32 %v571_v8, %v3130_v1  ;;  %s3590_s14 = sld [smem:[#allocation5 + $0x17]] }
  0xbb   : > { %v470_v49 = vadd.f32 %v468_v2, %v456_v54  ;;  %v5946_v8 = vstv %s3491_s9 }
  0xbc   : > { %837 = vrot.lane.b32.xlu1 %v3226_v18, %s5940_s17  ;;  %835 = vrot.lane.b32.xlu0 %v3229_v19, %s5940_s17  ;;  %v485_v1 = vadd.f32 %v483_v60, %v471_v6  ;;  %v574_v21 = vperm.slane %v572_v59, 0  ;;  %v575_v60 = vperm.slane %v572_v59, 1 }
  0xbd   : > { %849 = vrot.lane.b32.xlu2 %v3237_v22, %s5940_s17 }
  0xbe   : > { %v3275_v33 = vpop.permute.xlu1 %488  ;;  %v3277_v34 = vpop.permute.xlu0 %486 }
  0xbf   : > { %v3281_v35 = vpop.permute.xlu2 %558  ;;  %v491_v16 = vsel %vm5953_vm8, %v3277_v34, %v3275_v33  ;;  %v492_v47 = vsel %vm5953_vm8, %v3275_v33, %v3277_v34 }
  0xc0   : > { %v494_v2 = vsel %vm3470_vm7, %v491_v16, 0.0 }
  0xc1   : > { %v498_v41 = vmul.f32 %v496_v14, %v494_v2 }
  0xc4   : > { %863 = vrot.lane.b32.xlu1 %v3250_v26, %s5940_s17  ;;  %851 = vrot.lane.b32.xlu0 %v3253_v27, %s5940_s17 }
  0xc5   : > { %865 = vrot.lane.b32.xlu2 %v3257_v29, %s5940_s17  ;;  %s3432_s17 = sld [smem:[#allocation5 + $0xc]] }
  0xc6   : > { %v3287_v36 = vpop.permute.xlu1 %515  ;;  %v3289_v37 = vpop.permute.xlu0 %503 }
  0xc7   : > { %v3293_v38 = vpop.permute.xlu2 %615 }
  0xcb   : > { %v551_v63 = vstv %s3432_s17  ;;  %s3556_s17 = sld [smem:[#allocation5 + $0x5]] }
  0xcc   : > { %879 = vrot.lane.b32.xlu1 %v3226_v18, %s5938_s18  ;;  %877 = vrot.lane.b32.xlu0 %v3229_v19, %s5938_s18 }
  0xcd   : > { %891 = vrot.lane.b32.xlu2 %v3237_v22, %s5938_s18 }
  0xce   : > { %v3299_v39 = vpop.permute.xlu1 %531  ;;  %v3301_v40 = vpop.permute.xlu0 %529 }
  0xcf   : > { %v3305_v42 = vpop.permute.xlu2 %631 }
  0xd4   : > { %905 = vrot.lane.b32.xlu1 %v3250_v26, %s5938_s18  ;;  %893 = vrot.lane.b32.xlu0 %v3253_v27, %s5938_s18 }
  0xd5   : > { %907 = vrot.lane.b32.xlu2 %v3257_v29, %s5938_s18  ;;  %s3423_s18 = sld [smem:[#allocation5 + $0x3]] }
  0xd6   : > { %v3314_v44 = vpop.permute.xlu1 %556  ;;  %v3316_v45 = vpop.permute.xlu0 %544 }
  0xd7   : > { %v3326_v48 = vpop.permute.xlu2 %656  ;;  %v546_v9 = vsel %vm5955_vm9, %v3269_v32, %v3316_v45  ;;  %v547_v10 = vsel %vm5955_vm9, %v3316_v45, %v3269_v32  ;;  %v534_v32 = vsel %vm5955_vm9, %v3301_v40, %v3299_v39  ;;  %v535_v45 = vsel %vm5955_vm9, %v3299_v39, %v3301_v40 }
  0xd8   : > { %v548_v7 = vsel %vm3334_vm1, %v547_v10, 0.0  ;;  %v549_v3 = vsel %vm3379_vm4, %v546_v9, 0.0  ;;  %v560_v31 = vsel %vm5955_vm9, %v3314_v44, %v3281_v35  ;;  %v561_v39 = vsel %vm5955_vm9, %v3281_v35, %v3314_v44 }
  0xd9   : > { %v536_v35 = vsel %vm3334_vm1, %v535_v45, 0.0  ;;  %v537_v44 = vsel %vm3379_vm4, %v534_v32, 0.0  ;;  %v552_v17 = vmul.f32 %v551_v63, %v548_v7  ;;  %v553_v9 = vmul.f32 %v551_v63, %v549_v3 }
  0xda   : > { %v591_v10 = vstv %s3479_s11  ;;  %v562_v33 = vsel %vm3334_vm1, %v561_v39, 0.0  ;;  %v563_v34 = vsel %vm3379_vm4, %v560_v31, 0.0  ;;  %v493_v63 = vsel %vm3540_vm10, %v492_v47, 0.0  ;;  %s3614_s11 = sld [smem:[#allocation5 + $0x18]] }
  0xdb   : > { %v539_v30 = vstv %s3423_s18  ;;  %s3508_s18 = sld [smem:[#allocation5 + $0x14]]  ;;  %v3584_v31 = vmul.f32 %v3137_v4, %v591_v10  ;;  %v566_v47 = vmul.f32 %v565_v25, %v562_v33  ;;  %v567_v16 = vmul.f32 %v565_v25, %v563_v34 }
  0xdc   : > { %921 = vrot.lane.b32.xlu1 %v3226_v18, %s5942_s19  ;;  %919 = vrot.lane.b32.xlu0 %v3229_v19, %s5942_s19  ;;  %v540_v32 = vmul.f32 %v539_v30, %v536_v35  ;;  %v541_v45 = vmul.f32 %v539_v30, %v537_v44  ;;  %v484_v35 = vadd.f32 %v482_v5, %v470_v49  ;;  %v610_v49 = vstv %s3556_s17  ;;  %s3640_s17 = sld [smem:[#allocation5 + $0x7]] }
  0xdd   : > { %931 = vrot.lane.b32.xlu2 %v3237_v22, %s5942_s19  ;;  %v497_v44 = vmul.f32 %v496_v14, %v493_v63  ;;  %v506_v4 = vsel %vm5953_vm8, %v3289_v37, %v3231_v20  ;;  %v3604_v14 = vsel %vm5953_vm8, %v3231_v20, %v3289_v37  ;;  %v3610_v5 = vsel %vm5953_vm8, %v3287_v36, %v3255_v28 }
  0xde   : > { %v3361_v55 = vpop.permute.xlu1 %602  ;;  %v3363_v56 = vpop.permute.xlu0 %600  ;;  %v554_v39 = vadd.f32 %v552_v17, %v540_v32  ;;  %v3620_v17 = vsel %vm5953_vm8, %v3255_v28, %v3287_v36  ;;  %v3629_v33 = vadd.f32 %v498_v41, %v485_v1  ;;  %v507_v34 = vsel %vm3540_vm10, %v506_v4, 0.0 }
  0xdf   : > { %v3386_v61 = vpop.permute.xlu2 %672  ;;  %v3627_v10 = vadd.f32 %v497_v44, %v484_v35  ;;  %v595_v28 = vperm.slane %v3584_v31, 1  ;;  %v3658_v1 = vmul.f32 %v5946_v8, %v507_v34  ;;  %v605_v35 = vsel %vm5947_vm11, %v3363_v56, %v3361_v55 }
  0xe0   : > { %v568_v20 = vadd.f32 %v566_v47, %v554_v39  ;;  %v665_v47 = vstv %s3586_s12  ;;  %s3699_s12 = sld [smem:[#allocation5 + $0x10]] }
  0xe2   : > { %v578_v39 = vadd.f32 %v574_v21, %v568_v20  ;;  %v694_v2 = vstv %s3640_s17  ;;  %s3776_s17 = sld [smem:[#allocation5 + $0x11]] }
  0xe4   : > { %945 = vrot.lane.b32.xlu1 %v3250_v26, %s5942_s19  ;;  %933 = vrot.lane.b32.xlu0 %v3253_v27, %s5942_s19 }
  0xe5   : > { %947 = vrot.lane.b32.xlu2 %v3257_v29, %s5942_s19  ;;  %s3460_s19 = sld [smem:[#allocation5 + $0xd]] }
  0xe6   : > { %v3425_v23 = vpop.permute.xlu1 %629  ;;  %v3427_v51 = vpop.permute.xlu0 %617 }
  0xe7   : > { %v3442_v62 = vpop.permute.xlu2 %699 }
  0xeb   : > { %v581_v40 = vstv %s3460_s19  ;;  %s3575_s19 = sld [smem:[#allocation5 + $0xe]] }
  0xec   : > { %991 = vrot.lane.b32.xlu1 %v3226_v18, %s5965_s20  ;;  %989 = vrot.lane.b32.xlu0 %v3229_v19, %s5965_s20  ;;  %v3569_v54 = vmul.f32 %v3127_v0, %v581_v40  ;;  %v555_v40 = vadd.f32 %v553_v9, %v541_v45  ;;  %v594_v9 = vperm.slane %v3584_v31, 0 }
  0xed   : > { %1003 = vrot.lane.b32.xlu2 %v3237_v22, %s5965_s20 }
  0xee   : > { %v3502_v52 = vpop.permute.xlu1 %645  ;;  %v3504_v53 = vpop.permute.xlu0 %643  ;;  %v584_v6 = vperm.slane %v3569_v54, 0  ;;  %v585_v25 = vperm.slane %v3569_v54, 1  ;;  %v569_v37 = vadd.f32 %v567_v16, %v555_v40 }
  0xef   : > { %v3519_v24 = vpop.permute.xlu2 %715  ;;  %v649_v44 = vsel %vm5954_vm13, %v3502_v52, %v3504_v53 }
  0xf0   : > { %v579_v40 = vadd.f32 %v575_v60, %v569_v37  ;;  %v607_v37 = vsel %vm3464_vm6, %v605_v35, 0.0 }
  0xf1   : > { %v624_v59 = vstv %s3575_s19  ;;  %s2625_s19 = sld [smem:[#allocation2 + $0x9]] }
  0xf2   : > { %v589_v20 = vadd.f32 %v585_v25, %v579_v40 }
  0xf4   : > { %1017 = vrot.lane.b32.xlu1 %v3250_v26, %s5965_s20  ;;  %1005 = vrot.lane.b32.xlu0 %v3253_v27, %s5965_s20 }
  0xf5   : > { %1019 = vrot.lane.b32.xlu2 %v3257_v29, %s5965_s20 }
  0xf6   : > { %v3577_v7 = vpop.permute.xlu1 %670  ;;  %v659_v3 = vpop.permute.xlu0 %658 }
  0xf7   : > { %v3588_v30 = vpop.permute.xlu2 %742  ;;  %v660_v32 = vsel %vm5954_vm13, %v3326_v48, %v659_v3  ;;  %v661_v45 = vsel %vm5954_vm13, %v659_v3, %v3326_v48  ;;  %v606_v48 = vsel %vm5947_vm11, %v3361_v55, %v3363_v56  ;;  %v648_v3 = vsel %vm5954_vm13, %v3504_v53, %v3502_v52 }
  0xf8   : > { %v662_v55 = vsel %vm3334_vm1, %v660_v32, 0.0  ;;  %v663_v56 = vsel %vm3675_vm14, %v661_v45, 0.0  ;;  %v674_v4 = vsel %vm5954_vm13, %v3577_v7, %v3386_v61  ;;  %v675_v60 = vsel %vm5954_vm13, %v3386_v61, %v3577_v7 }
  0xf9   : > { %v653_v52 = vstv %s3598_s10  ;;  %v679_v53 = vstv %s3614_s11  ;;  %v608_v34 = vsel %vm3470_vm7, %v606_v48, 0.0  ;;  %v650_v32 = vsel %vm3334_vm1, %v648_v3, 0.0  ;;  %s3721_s10 = sld [smem:[#allocation5 + $0x19]] }
  0xfa   : > { %v651_v61 = vsel %vm3675_vm14, %v649_v44, 0.0  ;;  %v666_v7 = vmul.f32 %v665_v47, %v662_v55  ;;  %v667_v45 = vmul.f32 %v665_v47, %v663_v56  ;;  %v676_v35 = vsel %vm3334_vm1, %v674_v4, 0.0  ;;  %s3741_s11 = sld [smem:[#allocation5 + $0x8]] }
  0xfb   : > { %v677_v48 = vsel %vm3675_vm14, %v675_v60, 0.0  ;;  %v588_v3 = vadd.f32 %v584_v6, %v578_v39  ;;  %v611_v47 = vmul.f32 %v610_v49, %v607_v37  ;;  %v612_v55 = vmul.f32 %v610_v49, %v608_v34 }
  0xfc   : > { %1033 = vrot.lane.b32.xlu1 %v3226_v18, %s5958_s26  ;;  %1031 = vrot.lane.b32.xlu0 %v3229_v19, %s5958_s26  ;;  %v654_v56 = vmul.f32 %v653_v52, %v650_v32  ;;  %v655_v4 = vmul.f32 %v653_v52, %v651_v61  ;;  %v619_v6 = vsel %vm5947_vm11, %v3293_v38, %v3427_v51 }
  0xfd   : > { %1043 = vrot.lane.b32.xlu2 %v3237_v22, %s5958_s26  ;;  %v680_v25 = vmul.f32 %v679_v53, %v676_v35  ;;  %v681_v39 = vmul.f32 %v679_v53, %v677_v48  ;;  %v598_v37 = vadd.f32 %v594_v9, %v588_v3  ;;  %v620_v53 = vsel %vm5947_vm11, %v3427_v51, %v3293_v38 }
  0xfe   : > { %v687_v54 = vpop.permute.xlu1 %686  ;;  %v685_v41 = vpop.permute.xlu0 %684  ;;  %v668_v8 = vadd.f32 %v666_v7, %v654_v56  ;;  %v669_v36 = vadd.f32 %v667_v45, %v655_v4  ;;  %v633_v34 = vsel %vm5947_vm11, %v3425_v23, %v3305_v42  ;;  %v621_v51 = vsel %vm3464_vm6, %v619_v6, 0.0 }
  0xff   : > { %v3661_v16 = vpop.permute.xlu2 %758  ;;  %v690_v44 = vsel %vm5948_vm15, %v687_v54, %v685_v41  ;;  %v689_v49 = vsel %vm5948_vm15, %v685_v41, %v687_v54  ;;  %v708_v54 = vstv %s3699_s12  ;;  %v634_v41 = vsel %vm5947_vm11, %v3305_v42, %v3425_v23  ;;  %s3783_s12 = sld [smem:[#allocation5 + $0x1a]] }
 0x100   : > { %v692_v52 = vsel %vm363_vm12, %v690_v44, 0.0  ;;  %v695_v61 = vmul.f32 %v694_v2, %v689_v49  ;;  %vm731_vm11 = vcmp.lt.s32.totalorder %v3308_v43, 111  ;;  %v622_v42 = vsel %vm3470_vm7, %v620_v53, 0.0 }
 0x101   : > { %v696_v7 = vmul.f32 %v694_v2, %v692_v52  ;;  %v682_v23 = vadd.f32 %v680_v25, %v668_v8  ;;  %v599_v8 = vadd.f32 %v595_v28, %v589_v20  ;;  %v625_v28 = vmul.f32 %v624_v59, %v621_v51 }
 0x102   : > { %v636_v20 = vsel %vm3470_vm7, %v634_v41, 0.0  ;;  %v626_v25 = vmul.f32 %v624_v59, %v622_v42  ;;  %v737_v49 = vstv %s3741_s11  ;;  %v5989_v41 = vsel %vm3470_vm7, %v3604_v14, 0.0  ;;  %s3933_s11 = sld [smem:[#allocation2 + $0x1]] }
 0x103   : > { %v697_v56 = vadd.f32 %v695_v61, %v682_v23  ;;  %v5991_v59 = vsel %vm3540_vm10, %v3620_v17, 0.0  ;;  %v613_v61 = vadd.f32 %v611_v47, %v598_v37  ;;  %v5993_v42 = vsel %vm3470_vm7, %v3610_v5, 0.0 }
 0x104   : > { %1057 = vrot.lane.b32.xlu1 %v3250_v26, %s5958_s26  ;;  %1045 = vrot.lane.b32.xlu0 %v3253_v27, %s5958_s26  ;;  %v751_v5 = vstv %s3776_s17  ;;  %s3950_s17 = sld [smem:[#allocation2 + $0xa]] }
 0x105   : > { %1059 = vrot.lane.b32.xlu2 %v3257_v29, %s5958_s26  ;;  %v627_v17 = vadd.f32 %v625_v28, %v613_v61 }
 0x106   : > { %v714_v0 = vpop.permute.xlu1 %713  ;;  %v702_v63 = vpop.permute.xlu0 %701 }
 0x107   : > { %v704_v40 = vsel %vm5948_vm15, %v702_v63, %v3442_v62  ;;  %v3735_v60 = vpop.permute.xlu2 %802  ;;  %v703_v9 = vsel %vm5948_vm15, %v3442_v62, %v702_v63  ;;  %v718_v38 = vsel %vm5948_vm15, %v3519_v24, %v714_v0  ;;  %v683_v62 = vadd.f32 %v681_v39, %v669_v36 }
 0x108   : > { %v706_v32 = vsel %vm363_vm12, %v704_v40, 0.0  ;;  %v722_v63 = vstv %s3721_s10  ;;  %v709_v45 = vmul.f32 %v708_v54, %v703_v9  ;;  %v717_v2 = vsel %vm5948_vm15, %v714_v0, %v3519_v24  ;;  %vm3795_vm15 = vmand %vm363_vm12, %vm3470_vm7  ;;  %s3925_s10 = sld [smem:[#allocation2 + $0x12]] }
 0x109   : > { %v710_v35 = vmul.f32 %v708_v54, %v706_v32  ;;  %v720_v48 = vsel %vm363_vm12, %v718_v38, 0.0  ;;  %v635_v36 = vsel %vm3464_vm6, %v633_v34, 0.0  ;;  %v698_v4 = vadd.f32 %v696_v7, %v683_v62 }
 0x10a   : > { %v723_v39 = vmul.f32 %v722_v63, %v717_v2  ;;  %v724_v40 = vmul.f32 %v722_v63, %v720_v48  ;;  %v711_v52 = vadd.f32 %v709_v45, %v697_v56  ;;  %v5990_v9 = vstv %s3491_s9  ;;  %s2598_s9 = sld [smem:[#allocation8 + $0x1]] }
 0x10b   : > { %v712_v53 = vadd.f32 %v710_v35, %v698_v4  ;;  %v512_v32 = vmul.f32 %v5990_v9, %v5989_v41  ;;  %v5992_v38 = vstv %s3508_s18  ;;  %v614_v7 = vadd.f32 %v612_v55, %v599_v8  ;;  %s5997_s18 = smov 16  }
 0x10c   : > { %1073 = vrot.lane.b32.xlu1 %v3226_v18, %s5951_s28  ;;  %1071 = vrot.lane.b32.xlu0 %v3229_v19, %s5951_s28  ;;  %v525_v51 = vmul.f32 %v5992_v38, %v5991_v59  ;;  %v5994_v23 = vmov %v5992_v38  ;;  %v5995_v63 = vstv %s3590_s14  ;;  %v725_v2 = vadd.f32 %v723_v39, %v711_v52  ;;  %s793_s14 = sld [smem:[#allocation2]] }
 0x10d   : > { %1085 = vrot.lane.b32.xlu2 %v3237_v22, %s5951_s28  ;;  %v526_v62 = vmul.f32 %v5994_v23, %v5993_v42  ;;  %v639_v14 = vmul.f32 %v5995_v63, %v635_v36  ;;  %v5996_v45 = vmov %v5995_v63  ;;  %v628_v47 = vadd.f32 %v626_v25, %v614_v7 }
 0x10e   : > { %v730_v3 = vpop.permute.xlu1 %729  ;;  %v728_v44 = vpop.permute.xlu0 %727  ;;  %v640_v35 = vmul.f32 %v5996_v45, %v636_v20  ;;  %v726_v48 = vadd.f32 %v724_v40, %v712_v53  ;;  %v765_v8 = vstv %s3783_s12  ;;  %v514_v53 = vadd.f32 %v512_v32, %v3629_v33  ;;  %s3955_s12 = sld [smem:[#allocation2 + $0x13]] }
 0x10f   : > { %v732_v0 = vsel %vm731_vm11, %v728_v44, %v730_v3  ;;  %v733_v31 = vsel %vm731_vm11, %v730_v3, %v728_v44  ;;  %v3807_v6 = vpop.permute.xlu2 %823  ;;  %v641_v59 = vadd.f32 %v639_v14, %v627_v17 }
 0x110   : > { %v734_v34 = vsel %vm3464_vm6, %v732_v0, 0.0  ;;  %v735_v54 = vsel %vm3795_vm15, %v733_v31, 0.0  ;;  %v642_v38 = vadd.f32 %v640_v35, %v628_v47  ;;  %v528_v7 = vadd.f32 %v526_v62, %v514_v53 }
 0x111   : > { %v738_v37 = vmul.f32 %v737_v49, %v734_v34  ;;  %v739_v55 = vmul.f32 %v737_v49, %v735_v54  ;;  %v774_v35 = vstv %s2598_s9  ;;  %s3966_s9 = sld [smem:[#allocation2 + $0x2]] }
 0x112   : > { %v771_v32 = vadd.f32 %v642_v38, %v528_v7 }
 0x113   : > { %v740_v39 = vadd.f32 %v738_v37, %v725_v2  ;;  %v741_v40 = vadd.f32 %v739_v55, %v726_v48 }
 0x114   : > { %1099 = vrot.lane.b32.xlu1 %v3250_v26, %s5951_s28  ;;  %1087 = vrot.lane.b32.xlu0 %v3253_v27, %s5951_s28 }
 0x115   : > { %1101 = vrot.lane.b32.xlu2 %v3257_v29, %s5951_s28  ;;  %s4031_s28 = sld [smem:[#allocation2 + $0x14]] }
 0x116   : > { %v757_v3 = vpop.permute.xlu1 %756  ;;  %v745_v44 = vpop.permute.xlu0 %744 }
 0x117   : > { %v746_v36 = vsel %vm731_vm11, %v3588_v30, %v745_v44  ;;  %v747_v0 = vsel %vm731_vm11, %v745_v44, %v3588_v30  ;;  %v760_v31 = vsel %vm731_vm11, %v757_v3, %v3661_v16  ;;  %v761_v28 = vsel %vm731_vm11, %v3661_v16, %v757_v3  ;;  %v3866_v25 = vpop.permute.xlu2 %849 }
 0x118   : > { %v748_v20 = vsel %vm3464_vm6, %v746_v36, 0.0  ;;  %v749_v56 = vsel %vm3795_vm15, %v747_v0, 0.0  ;;  %v762_v4 = vsel %vm3464_vm6, %v760_v31, 0.0  ;;  %v763_v30 = vsel %vm3795_vm15, %v761_v28, 0.0 }
 0x119   : > { %v752_v49 = vmul.f32 %v751_v5, %v748_v20  ;;  %v753_v52 = vmul.f32 %v751_v5, %v749_v56  ;;  %v513_v16 = vadd.f32 %v3658_v1, %v3627_v10  ;;  %v766_v34 = vmul.f32 %v765_v8, %v762_v4 }
 0x11a   : > { %v767_v54 = vmul.f32 %v765_v8, %v763_v30 }
 0x11b   : > { %v754_v41 = vadd.f32 %v752_v49, %v740_v39  ;;  %v755_v9 = vadd.f32 %v753_v52, %v741_v40  ;;  %v527_v61 = vadd.f32 %v525_v51, %v513_v16  ;;  %v811_v16 = vstv %s2625_s19  ;;  %s3970_s19 = sld [smem:[#allocation2 + $0xc]] }
 0x11c   : > { %1115 = vrot.lane.b32.xlu1 %v3226_v18, %s5949_s29  ;;  %1113 = vrot.lane.b32.xlu0 %v3229_v19, %s5949_s29 }
 0x11d   : > { %v768_v42 = vadd.f32 %v766_v34, %v754_v41  ;;  %v769_v23 = vadd.f32 %v767_v54, %v755_v9  ;;  %1127 = vrot.lane.b32.xlu2 %v3237_v22, %s5949_s29  ;;  %v770_v33 = vadd.f32 %v641_v59, %v527_v61  ;;  %v794_v9 = vstv %s793_s14  ;;  %s3973_s14 = sld [smem:[#allocation2 + $0x3]] }
 0x11e   : > { %v788_v10 = vpop.permute.xlu1 %787  ;;  %v786_v1 = vpop.permute.xlu0 %785 }
 0x11f   : > { %v3877_v63 = vpop.permute.xlu2 %865  ;;  %v772_v14 = vadd.f32 %v770_v33, %v768_v42  ;;  %v773_v45 = vadd.f32 %v771_v32, %v769_v23  ;;  %v789_v49 = vsel %vm5963_vm2, %v786_v1, %v788_v10  ;;  %v790_v52 = vsel %vm5963_vm2, %v788_v10, %v786_v1 }
 0x120   : > { %v791_v59 = vsel %vm3371_vm3, %v790_v52, 0.0  ;;  %v792_v38 = vsel %vm3379_vm4, %v789_v49, 0.0  ;;  %v830_v42 = vstv %s3925_s10  ;;  %v844_v32 = vstv %s3933_s11  ;;  %s3981_s10 = sld [smem:[#allocation2 + $0x4]] }
 0x121   : > { %v775_v18 = vadd.f32 %v774_v35, %v772_v14  ;;  %v776_v19 = vadd.f32 %v774_v35, %v773_v45  ;;  %v795_v10 = vmul.f32 %v794_v9, %v791_v59  ;;  %v796_v1 = vmul.f32 %v794_v9, %v792_v38  ;;  %s3987_s11 = sld [smem:[#allocation2 + $0x15]] }
 0x122   : > { %v940_v59 = vstv %s3970_s19  ;;  %s4066_s19 = sld [smem:[#allocation2 + $0x5]] }
 0x123   : > { %v3887_v17 = vmax.f32 %v775_v18, 0.0  ;;  %v3889_v47 = vmax.f32 %v776_v19, 0.0 }
 0x124   : > { %1141 = vrot.lane.b32.xlu1 %v3250_v26, %s5949_s29  ;;  %1129 = vrot.lane.b32.xlu0 %v3253_v27, %s5949_s29 }
 0x125   : > { %1143 = vrot.lane.b32.xlu2 %v3257_v29, %s5949_s29  ;;  %s3999_s29 = sld [smem:[#allocation2 + $0xd]] }
 0x126   : > { %v822_v51 = vpop.permute.xlu1 %821  ;;  %v805_v62 = vpop.permute.xlu0 %804 }
 0x127   : > { %v3885_v22 = vpop.permute.xlu2 %891  ;;  %v806_v4 = vsel %vm5963_vm2, %v3735_v60, %v805_v62  ;;  %v807_v30 = vsel %vm5963_vm2, %v805_v62, %v3735_v60  ;;  %v826_v34 = vsel %vm5963_vm2, %v3807_v6, %v822_v51  ;;  %v825_v54 = vsel %vm5963_vm2, %v822_v51, %v3807_v6 }
 0x128   : > { %v808_v53 = vsel %vm3371_vm3, %v807_v30, 0.0  ;;  %v809_v60 = vsel %vm3379_vm4, %v806_v4, 0.0  ;;  %v827_v23 = vsel %vm3371_vm3, %v826_v34, 0.0  ;;  %v828_v6 = vsel %vm3379_vm4, %v825_v54, 0.0 }
 0x129   : > { %v812_v61 = vmul.f32 %v811_v16, %v808_v53  ;;  %v813_v7 = vmul.f32 %v811_v16, %v809_v60  ;;  %v831_v33 = vmul.f32 %v830_v42, %v827_v23  ;;  %v832_v19 = vmul.f32 %v830_v42, %v828_v6 }
 0x12a   : > { %v858_v4 = vstv %s3950_s17  ;;  %v872_v30 = vstv %s3955_s12  ;;  %v886_v34 = vstv %s3966_s9  ;;  %s4014_s17 = sld [smem:[#allocation2 + $0xb]]  ;;  %v928_v23 = vstv %s3973_s14 }
 0x12b   : > { %v814_v35 = vadd.f32 %v812_v61, %v795_v10  ;;  %v815_v18 = vadd.f32 %v813_v7, %v796_v1  ;;  %s4029_s12 = sld [smem:[#allocation2 + $0x16]] }
 0x12c   : > { %1167 = vrot.lane.b32.xlu1 %v3889_v47, %s5956_s16  ;;  %1165 = vrot.lane.b32.xlu0 %v3887_v17, %s5956_s16  ;;  %s4091_s14 = sld [smem:[#allocation2 + $0xf]] }
 0x12d   : > { %s4188_s9 = sld [smem:[#allocation2 + $0x10]] }
 0x12e   : > { %v838_v26 = vpop.permute.xlu1 %837  ;;  %v836_v27 = vpop.permute.xlu0 %835 }
 0x12f   : > { %v3895_v37 = vpop.permute.xlu2 %907  ;;  %v839_v51 = vsel %vm5962_vm5, %v836_v27, %v838_v26  ;;  %v840_v62 = vsel %vm5962_vm5, %v838_v26, %v836_v27  ;;  %v833_v26 = vadd.f32 %v831_v33, %v814_v35  ;;  %v834_v27 = vadd.f32 %v832_v19, %v815_v18 }
 0x130   : > { %v846_v49 = vmul.f32 %v844_v32, %v839_v51  ;;  %v841_v60 = vsel %vm5960_vm0, %v840_v62, 0.0 }
 0x132   : > { %v848_v42 = vadd.f32 %v846_v49, %v834_v27  ;;  %v954_v49 = vstv %s3987_s11  ;;  %s4110_s11 = sld [smem:[#allocation2 + $0x6]] }
 0x134   : > { %1191 = vrot.lane.b32.xlu1 %v3887_v17, %s5997_s18 }
 0x136   : > { %v3899_v29 = vpop.permute.xlu1 %863  ;;  %v852_v55 = vpop.permute.xlu0 %851 }
 0x137   : > { %v3901_v2 = vpop.permute.xlu2 %931  ;;  %v853_v52 = vsel %vm5962_vm5, %v3866_v25, %v852_v55  ;;  %v854_v16 = vsel %vm5962_vm5, %v852_v55, %v3866_v25  ;;  %v867_v25 = vsel %vm5962_vm5, %v3899_v29, %v3877_v63  ;;  %v868_v55 = vsel %vm5962_vm5, %v3877_v63, %v3899_v29 }
 0x138   : > { %v855_v38 = vsel %vm5960_vm0, %v854_v16, 0.0  ;;  %v860_v61 = vmul.f32 %v858_v4, %v853_v52  ;;  %v845_v29 = vmul.f32 %v844_v32, %v841_v60  ;;  %v960_v32 = vstv %s3981_s10  ;;  %s4097_s10 = sld [smem:[#allocation2 + $0x17]] }
 0x139   : > { %v859_v35 = vmul.f32 %v858_v4, %v855_v38  ;;  %v874_v18 = vmul.f32 %v872_v30, %v867_v25  ;;  %v4063_v16 = vmul.f32 %v960_v32, %v3218_v15 }
 0x13a   : > { %v862_v62 = vadd.f32 %v860_v61, %v848_v42  ;;  %v847_v27 = vadd.f32 %v845_v29, %v833_v26  ;;  %v5998_v61 = vld [vmem:[#allocation15_spill] sm:$0xff]  ;;  %v900_v29 = vstv %s4014_s17  ;;  %s4117_s17 = sld [smem:[#allocation2 + $0x18]] }
 0x13c   : > { %v861_v38 = vadd.f32 %v859_v35, %v847_v27 }
 0x13e   : > { %v3903_v48 = vpop.permute.xlu1 %879  ;;  %v3905_v3 = vpop.permute.xlu0 %877 }
 0x13f   : > { %v3907_v5 = vpop.permute.xlu2 %947  ;;  %v882_v25 = vsel %vm5953_vm8, %v3903_v48, %v3905_v3 }
 0x146   : > { %v3909_v44 = vpop.permute.xlu1 %905  ;;  %v3911_v8 = vpop.permute.xlu0 %893 }
 0x147   : > { %v3913_v36 = vpop.permute.xlu2 %1003  ;;  %v895_v32 = vsel %vm5953_vm8, %v3885_v22, %v3911_v8  ;;  %v896_v35 = vsel %vm5953_vm8, %v3911_v8, %v3885_v22  ;;  %v4127_v22 = vsel %vm5953_vm8, %v3909_v44, %v3895_v37  ;;  %v4133_v8 = vsel %vm5953_vm8, %v3895_v37, %v3909_v44 }
 0x148   : > { %v898_v27 = vsel %vm3470_vm7, %v895_v32, 0.0 }
 0x14e   : > { %v3915_v0 = vpop.permute.xlu1 %921  ;;  %v3917_v31 = vpop.permute.xlu0 %919 }
 0x14f   : > { %v3923_v56 = vpop.permute.xlu2 %1019  ;;  %v924_v9 = vsel %vm5955_vm9, %v3915_v0, %v3917_v31 }
 0x150   : > { %v925_v33 = vsel %vm3334_vm1, %v924_v9, 0.0 }
 0x151   : > { %v929_v4 = vmul.f32 %v928_v23, %v925_v33 }
 0x156   : > { %v3919_v28 = vpop.permute.xlu1 %945  ;;  %v3921_v20 = vpop.permute.xlu0 %933 }
 0x157   : > { %v3957_v41 = vpop.permute.xlu2 %1043  ;;  %v936_v53 = vsel %vm5955_vm9, %v3921_v20, %v3901_v2  ;;  %v935_v7 = vsel %vm5955_vm9, %v3901_v2, %v3921_v20  ;;  %v950_v6 = vsel %vm5955_vm9, %v3907_v5, %v3919_v28  ;;  %v869_v2 = vsel %vm5960_vm0, %v868_v55, 0.0 }
 0x158   : > { %v937_v63 = vsel %vm3334_vm1, %v936_v53, 0.0  ;;  %v923_v20 = vsel %vm5955_vm9, %v3917_v31, %v3915_v0  ;;  %v938_v19 = vsel %vm3379_vm4, %v935_v7, 0.0  ;;  %v949_v52 = vsel %vm5955_vm9, %v3919_v28, %v3907_v5 }
 0x159   : > { %v941_v51 = vmul.f32 %v940_v59, %v937_v63  ;;  %v951_v0 = vsel %vm3334_vm1, %v950_v6, 0.0  ;;  %v926_v31 = vsel %vm3379_vm4, %v923_v20, 0.0  ;;  %v970_v53 = vstv %s3999_s29  ;;  %s4082_s29 = sld [smem:[#allocation2 + $0xe]] }
 0x15a   : > { %v873_v60 = vmul.f32 %v872_v30, %v869_v2  ;;  %v881_v5 = vsel %vm5953_vm8, %v3905_v3, %v3903_v48  ;;  %v942_v28 = vmul.f32 %v940_v59, %v938_v19  ;;  %v952_v55 = vsel %vm3379_vm4, %v949_v52, 0.0  ;;  %v2845_v19 = vld [vmem:[%s3213_s13 + $0x2] ss:$4 sm:$0x3] }
 0x15b   : > { %v943_v15 = vadd.f32 %v941_v51, %v929_v4  ;;  %v955_v9 = vmul.f32 %v954_v49, %v951_v0  ;;  %v930_v26 = vmul.f32 %v928_v23, %v926_v31  ;;  %v4079_v30 = vmul.f32 %v5998_v61, %v970_v53 }
 0x15c   : > { %v980_v7 = vstv %s4029_s12  ;;  %v4086_v59 = vadd.f32 %v874_v18, %v862_v62  ;;  %v914_v48 = vstv %s4031_s28  ;;  %v963_v3 = vperm.slane %v4063_v16, 0  ;;  %s4144_s12 = sld [smem:[#allocation2 + $0x7]]  ;;  %s6005_s28 = smov 15  }
 0x15d   : > { %v883_v23 = vsel %vm3540_vm10, %v882_v25, 0.0  ;;  %v884_v2 = vsel %vm3470_vm7, %v881_v5, 0.0  ;;  %v944_v20 = vadd.f32 %v942_v28, %v930_v26  ;;  %v956_v33 = vmul.f32 %v954_v49, %v952_v55 }
 0x15e   : > { %v3935_v39 = vpop.permute.xlu1 %991  ;;  %v3937_v40 = vpop.permute.xlu0 %989  ;;  %v957_v18 = vadd.f32 %v955_v9, %v943_v15  ;;  %v4108_v51 = vmul.f32 %v2845_v19, %v980_v7  ;;  %v4112_v62 = vadd.f32 %v873_v60, %v861_v38  ;;  %v964_v49 = vperm.slane %v4063_v16, 1 }
 0x15f   : > { %v4004_v54 = vpop.permute.xlu2 %1059  ;;  %v973_v52 = vperm.slane %v4079_v30, 0  ;;  %v974_v0 = vperm.slane %v4079_v30, 1  ;;  %v4121_v31 = vmul.f32 %v886_v34, %v883_v23  ;;  %v998_v4 = vstv %s4066_s19  ;;  %s4266_s19 = sld [smem:[#allocation2 + $0x11]] }
 0x160   : > { %v4138_v16 = vmul.f32 %v886_v34, %v884_v2  ;;  %v897_v53 = vsel %vm3540_vm10, %v896_v35, 0.0  ;;  %v958_v60 = vadd.f32 %v956_v33, %v944_v20  ;;  %v967_v5 = vadd.f32 %v963_v3, %v957_v18 }
 0x161   : > { %v983_v28 = vperm.slane %v4108_v51, 0  ;;  %v984_v37 = vperm.slane %v4108_v51, 1  ;;  %v911_v34 = vsel %vm3540_vm10, %v4133_v8, 0.0  ;;  %v912_v25 = vsel %vm3470_vm7, %v4127_v22, 0.0 }
 0x162   : > { %v1012_v15 = vstv %s4082_s29  ;;  %v4161_v9 = vmul.f32 %v900_v29, %v897_v53  ;;  %v4163_v38 = vmul.f32 %v900_v29, %v898_v27  ;;  %v1052_v61 = vstv %s4091_s14  ;;  %s4208_s14 = sld [smem:[#allocation2 + $0x19]] }
 0x163   : > { %v968_v3 = vadd.f32 %v964_v49, %v958_v60  ;;  %vm5999_vm8 = vcmp.lt.s32.totalorder %v3308_v43, 127  ;;  %v977_v23 = vadd.f32 %v973_v52, %v967_v5  ;;  %v1066_v18 = vstv %s4117_s17  ;;  %s4271_s17 = sld [smem:[#allocation2 + $0x1a]] }
 0x164   : > { %v994_v19 = vsel %vm5999_vm8, %v3935_v39, %v3937_v40  ;;  %v1080_v27 = vstv %s4144_s12  ;;  %s779_s29 = sld [smem:[#allocation8]]  ;;  %s6007_s12 = smov 112  }
 0x165   : > { %v978_v60 = vadd.f32 %v974_v0, %v968_v3  ;;  %v987_v5 = vadd.f32 %v983_v28, %v977_v23 }
 0x166   : > { %v3975_v14 = vpop.permute.xlu1 %1017  ;;  %v3977_v45 = vpop.permute.xlu0 %1005 }
 0x167   : > { %v4084_v63 = vpop.permute.xlu2 %1085 }
 0x16e   : > { %v4038_v10 = vpop.permute.xlu1 %1033  ;;  %v4040_v1 = vpop.permute.xlu0 %1031 }
 0x16f   : > { %v1035_v26 = vsel %vm5954_vm13, %v4040_v1, %v4038_v10  ;;  %v1036_v29 = vsel %vm5954_vm13, %v4038_v10, %v4040_v1  ;;  %v1102_v32 = vpop.permute.xlu2 %1101  ;;  %v1026_v10 = vstv %s4097_s10  ;;  %v1040_v1 = vstv %s4110_s11  ;;  %s4224_s11 = sld [smem:[#allocation2 + $0x8]]  ;;  %s6006_s10 = smov 1  }
 0x170   : > { %v1037_v35 = vsel %vm3334_vm1, %v1035_v26, 0.0 }
 0x176   : > { %v1058_v42 = vpop.permute.xlu1 %1057  ;;  %v1046_v6 = vpop.permute.xlu0 %1045 }
 0x177   : > { %v1047_v44 = vsel %vm5954_vm13, %v3957_v41, %v1046_v6  ;;  %v1048_v55 = vsel %vm5954_vm13, %v1046_v6, %v3957_v41  ;;  %v993_v41 = vsel %vm5999_vm8, %v3937_v40, %v3935_v39  ;;  %v1061_v20 = vsel %vm5954_vm13, %v1058_v42, %v4004_v54 }
 0x178   : > { %v1049_v6 = vsel %vm3334_vm1, %v1047_v44, 0.0  ;;  %v1050_v2 = vsel %vm3675_vm14, %v1048_v55, 0.0  ;;  %v1062_v33 = vsel %vm5954_vm13, %v4004_v54, %v1058_v42  ;;  %v995_v51 = vsel %vm3464_vm6, %v993_v41, 0.0 }
 0x179   : > { %v1038_v54 = vsel %vm3675_vm14, %v1036_v29, 0.0  ;;  %v1053_v42 = vmul.f32 %v1052_v61, %v1049_v6  ;;  %v1054_v49 = vmul.f32 %v1052_v61, %v1050_v2  ;;  %v1063_v52 = vsel %vm3334_vm1, %v1061_v20, 0.0 }
 0x17a   : > { %v1064_v53 = vsel %vm3675_vm14, %v1062_v33, 0.0  ;;  %v1041_v39 = vmul.f32 %v1040_v1, %v1037_v35  ;;  %vm6000_vm8 = vcmp.lt.s32.totalorder %v3308_v43, 112  ;;  %v996_v44 = vsel %vm3470_vm7, %v994_v19, 0.0 }
 0x17b   : > { %v999_v55 = vmul.f32 %v998_v4, %v995_v51  ;;  %vm6001_vm13 = vcmp.lt.s32.totalorder %v3308_v43, 127  ;;  %v1042_v61 = vmul.f32 %v1040_v1, %v1038_v54  ;;  %v1067_v3 = vmul.f32 %v1066_v18, %v1063_v52 }
 0x17c   : > { %v1007_v26 = vsel %vm6001_vm13, %v3913_v36, %v3977_v45  ;;  %vm6002_vm9 = vmmov %vm6001_vm13  ;;  %v1055_v28 = vadd.f32 %v1053_v42, %v1041_v39  ;;  %v1068_v41 = vmul.f32 %v1066_v18, %v1064_v53  ;;  %v988_v1 = vadd.f32 %v984_v37, %v978_v60  ;;  %v1128_v42 = vpop.permute.xlu2 %1127 }
 0x17d   : > { %v1008_v0 = vsel %vm6002_vm9, %v3977_v45, %v3913_v36  ;;  %v1056_v23 = vadd.f32 %v1054_v49, %v1042_v61  ;;  %vm6003_vm13 = vmmov %vm6000_vm8  ;;  %v1000_v36 = vmul.f32 %v998_v4, %v996_v44  ;;  %v1001_v45 = vadd.f32 %v999_v55, %v987_v5 }
 0x17e   : > { %v1074_v30 = vpop.permute.xlu1 %1073  ;;  %v1072_v7 = vpop.permute.xlu0 %1071  ;;  %v1094_v35 = vstv %s4188_s9  ;;  %v1021_v18 = vsel %vm6002_vm9, %v3975_v14, %v3923_v56  ;;  %v1009_v4 = vsel %vm3464_vm6, %v1007_v26, 0.0  ;;  %v1010_v19 = vsel %vm3470_vm7, %v1008_v0, 0.0  ;;  %s6008_s9 = smov 111  }
 0x17f   : > { %v1076_v40 = vsel %vm6000_vm8, %v1074_v30, %v1072_v7  ;;  %v1075_v2 = vsel %vm6000_vm8, %v1072_v7, %v1074_v30  ;;  %v1069_v49 = vadd.f32 %v1067_v3, %v1055_v28  ;;  %v1070_v52 = vadd.f32 %v1068_v41, %v1056_v23 }
 0x180   : > { %v1078_v20 = vsel %vm363_vm12, %v1076_v40, 0.0  ;;  %v1081_v51 = vmul.f32 %v1080_v27, %v1075_v2  ;;  %v1108_v53 = vstv %s4208_s14  ;;  %v1002_v44 = vadd.f32 %v1000_v36, %v988_v1  ;;  %s4492_s14 = sld [smem:[#allocation7]] }
 0x181   : > { %v1082_v54 = vmul.f32 %v1080_v27, %v1078_v20  ;;  %v1013_v27 = vmul.f32 %v1012_v15, %v1009_v4  ;;  %v1014_v55 = vmul.f32 %v1012_v15, %v1010_v19  ;;  %v1122_v0 = vstv %s4224_s11  ;;  %s4498_s11 = sld [smem:[#allocation7 + $0xd]] }
 0x182   : > { %v1083_v26 = vadd.f32 %v1081_v51, %v1069_v49  ;;  %v1136_v49 = vstv %s4266_s19  ;;  %s4500_s19 = sld [smem:[#allocation7 + $0x9]] }
 0x183   : > { %v1084_v61 = vadd.f32 %v1082_v54, %v1070_v52  ;;  %v1016_v1 = vadd.f32 %v1014_v55, %v1002_v44  ;;  %v1150_v52 = vstv %s4271_s17  ;;  %s4502_s17 = sld [smem:[#allocation7 + $0x1]] }
 0x184   : > { %v1144_v51 = vpop.permute.xlu2 %1143 }
 0x186   : > { %v1100_v29 = vpop.permute.xlu1 %1099  ;;  %v1088_v6 = vpop.permute.xlu0 %1087 }
 0x187   : > { %v1090_v33 = vsel %vm6003_vm13, %v1088_v6, %v4084_v63  ;;  %v1089_v30 = vsel %vm6000_vm8, %v4084_v63, %v1088_v6  ;;  %vm6004_vm13 = vmmov %vm6000_vm8  ;;  %v1022_v63 = vsel %vm6002_vm9, %v3923_v56, %v3975_v14  ;;  %v1103_v39 = vsel %vm6000_vm8, %v1100_v29, %v1102_v32 }
 0x188   : > { %v1092_v7 = vsel %vm363_vm12, %v1090_v33, 0.0  ;;  %v1104_v37 = vsel %vm6004_vm13, %v1102_v32, %v1100_v29  ;;  %v1095_v60 = vmul.f32 %v1094_v35, %v1089_v30  ;;  %v1023_v56 = vsel %vm3464_vm6, %v1021_v18, 0.0 }
 0x189   : > { %v1096_v5 = vmul.f32 %v1094_v35, %v1092_v7  ;;  %v1106_v40 = vsel %vm363_vm12, %v1104_v37, 0.0  ;;  %v1024_v14 = vsel %vm3470_vm7, %v1022_v63, 0.0  ;;  %v1109_v3 = vmul.f32 %v1108_v53, %v1103_v39 }
 0x18a   : > { %v1110_v15 = vmul.f32 %v1108_v53, %v1106_v40  ;;  %v1097_v6 = vadd.f32 %v1095_v60, %v1083_v26  ;;  %v1015_v33 = vadd.f32 %v1013_v27, %v1001_v45  ;;  %v1027_v36 = vmul.f32 %v1026_v10, %v1023_v56 }
 0x18b   : > { %v1098_v23 = vadd.f32 %v1096_v5, %v1084_v61  ;;  %v1028_v35 = vmul.f32 %v1026_v10, %v1024_v14  ;;  %v889_v7 = vadd.f32 %v4121_v31, %v4112_v62  ;;  %v890_v37 = vadd.f32 %v4138_v16, %v4086_v59 }
 0x18c   : > { %v915_v45 = vmul.f32 %v914_v48, %v911_v34  ;;  %v916_v10 = vmul.f32 %v914_v48, %v912_v25  ;;  %v1111_v4 = vadd.f32 %v1109_v3, %v1097_v6  ;;  %v1029_v31 = vadd.f32 %v1027_v36, %v1015_v33  ;;  %v4392_v33 = vld [vmem:[%s3124_s15 + $0x8] ss:$4 sm:$0x3] }
 0x18d   : > { %v1112_v19 = vadd.f32 %v1110_v15, %v1098_v23  ;;  %v903_v62 = vadd.f32 %v4161_v9, %v889_v7  ;;  %v904_v59 = vadd.f32 %v4163_v38, %v890_v37  ;;  %v1030_v16 = vadd.f32 %v1028_v35, %v1016_v1  ;;  %v4395_v1 = vld [vmem:[%s3124_s15 + $0xa] ss:$4 sm:$0x3] }
 0x18e   : > { %v1116_v32 = vpop.permute.xlu1 %1115  ;;  %v1114_v28 = vpop.permute.xlu0 %1113  ;;  %v4398_v36 = vperm.slane %v4392_v33, 1  ;;  %v4401_v35 = vperm.slane %v4395_v1, 1  ;;  %vm6009_vm13 = vcmp.lt.s32.totalorder %v3308_v43, 1 }
 0x18f   : > { %v1117_v41 = vsel %vm731_vm11, %v1114_v28, %v1116_v32  ;;  %v1118_v29 = vsel %vm731_vm11, %v1116_v32, %v1114_v28  ;;  %v917_v27 = vadd.f32 %v915_v45, %v903_v62  ;;  %v918_v55 = vadd.f32 %v916_v10, %v904_v59  ;;  %vm6010_vm9 = vmmov %vm6009_vm13 }
 0x190   : > { %v1119_v2 = vsel %vm3464_vm6, %v1117_v41, 0.0  ;;  %v1120_v20 = vsel %vm3795_vm15, %v1118_v29, 0.0  ;;  %v1159_v28 = vstv %s779_s29  ;;  %s4508_s29 = sld [smem:[#allocation7 + $0xa]]  ;;  %vm6012_vm8 = vmmov %vm6010_vm9 }
 0x191   : > { %v1123_v18 = vmul.f32 %v1122_v0, %v1119_v2  ;;  %v1124_v30 = vmul.f32 %v1122_v0, %v1120_v20  ;;  %v1155_v26 = vadd.f32 %v1029_v31, %v917_v27  ;;  %v1156_v61 = vadd.f32 %v1030_v16, %v918_v55  ;;  %v4380_v2 = vld [vmem:[%s3124_s15 + $0x9] ss:$4 sm:$0x3]  ;;  %s4490_s15 = sld [smem:[#allocation7 + $0x4]] }
 0x192   : > { %v4383_v20 = vperm.slane %v4380_v2, 0  ;;  %v4416_v7 = vperm.slane %v4380_v2, 1 }
 0x193   : > { %v1125_v54 = vadd.f32 %v1123_v18, %v1111_v4  ;;  %v1126_v8 = vadd.f32 %v1124_v30, %v1112_v19  ;;  %v4404_v18 = vperm.slane %v4392_v33, 0  ;;  %v4413_v30 = vperm.slane %v4395_v1, 0 }
 0x196   : > { %v1142_v63 = vpop.permute.xlu1 %1141  ;;  %v1130_v34 = vpop.permute.xlu0 %1129 }
 0x197   : > { %v1131_v22 = vsel %vm731_vm11, %v1128_v42, %v1130_v34  ;;  %v1132_v48 = vsel %vm731_vm11, %v1130_v34, %v1128_v42  ;;  %v1145_v25 = vsel %vm731_vm11, %v1142_v63, %v1144_v51  ;;  %v1146_v9 = vsel %vm731_vm11, %v1144_v51, %v1142_v63 }
 0x198   : > { %v1133_v38 = vsel %vm3464_vm6, %v1131_v22, 0.0  ;;  %v1134_v53 = vsel %vm3795_vm15, %v1132_v48, 0.0  ;;  %v1147_v60 = vsel %vm3464_vm6, %v1145_v25, 0.0  ;;  %v1148_v5 = vsel %vm3795_vm15, %v1146_v9, 0.0 }
 0x199   : > { %v1137_v39 = vmul.f32 %v1136_v49, %v1133_v38  ;;  %v1138_v42 = vmul.f32 %v1136_v49, %v1134_v53  ;;  %v1151_v40 = vmul.f32 %v1150_v52, %v1147_v60  ;;  %v1152_v44 = vmul.f32 %v1150_v52, %v1148_v5 }
 0x19a   : > { %v1274_v27 = vstv %s4490_s15  ;;  %s4550_s15 = sld [smem:[#allocation7 + $0x3]] }
 0x19b   : > { %v1139_v56 = vadd.f32 %v1137_v39, %v1125_v54  ;;  %v1140_v14 = vadd.f32 %v1138_v42, %v1126_v8  ;;  %v1174_v42 = vstv %s4492_s14  ;;  %s4540_s14 = sld [smem:[#allocation7 + $0x5]] }
 0x19d   : > { %v1153_v32 = vadd.f32 %v1151_v40, %v1139_v56  ;;  %v1154_v0 = vadd.f32 %v1152_v44, %v1140_v14 }
 0x19e   : > { %v1168_v45 = vpop.permute.xlu1 %1167  ;;  %v1166_v4 = vpop.permute.xlu0 %1165 }
 0x19f   : > { %v1157_v3 = vadd.f32 %v1155_v26, %v1153_v32  ;;  %v1158_v15 = vadd.f32 %v1156_v61, %v1154_v0  ;;  %v1169_v53 = vsel %vm5963_vm2, %v1166_v4, %v1168_v45  ;;  %v1170_v60 = vsel %vm5963_vm2, %v1168_v45, %v1166_v4 }
 0x1a0   : > { %v1171_v40 = vsel %vm3371_vm3, %v1170_v60, 0.0  ;;  %v1172_v44 = vsel %vm3379_vm4, %v1169_v53, 0.0  ;;  %v1280_v61 = vstv %s4498_s11  ;;  %v1186_v32 = vstv %s4500_s19  ;;  %s4578_s11 = sld [smem:[#allocation7 + $0xf]]  ;;  %s6011_s19 = smov 113  }
 0x1a1   : > { %v1160_v41 = vadd.f32 %v1159_v28, %v1157_v3  ;;  %v1161_v29 = vadd.f32 %v1159_v28, %v1158_v15  ;;  %v1175_v3 = vmul.f32 %v1174_v42, %v1171_v40  ;;  %v1176_v15 = vmul.f32 %v1174_v42, %v1172_v44 }
 0x1a3   : > { %v4321_v6 = vmax.f32 %v1160_v41, 0.0  ;;  %v4323_v23 = vmax.f32 %v1161_v29, 0.0  ;;  %v4553_v41 = vmul.f32 %v1274_v27, %v3887_v17  ;;  %v4556_v29 = vmul.f32 %v1274_v27, %v3889_v47 }
 0x1a5   : > { %1207 = vrot.lane.b32.xlu1 %v4323_v23, %s5997_s18  ;;  %1179 = vrot.lane.b32.xlu0 %v4323_v23, %s5956_s16 }
 0x1a6   : > { %1177 = vrot.lane.b32.xlu2 %v4321_v6, %s5956_s16  ;;  %v4438_v19 = vpop.permute.xlu1 %1191 }
 0x1ad   : > { %1233 = vrot.lane.b32.xlu1 %v4321_v6, %s6005_s28  ;;  %1205 = vrot.lane.b32.xlu0 %v4321_v6, %s5997_s18 }
 0x1ae   : > { %1193 = vrot.lane.b32.xlu2 %v3889_v47, %s5997_s18 }
 0x1b5   : > { %1249 = vrot.lane.b32.xlu1 %v3889_v47, %s6006_s10  ;;  %1221 = vrot.lane.b32.xlu0 %v3889_v47, %s6005_s28 }
 0x1b6   : > { %1219 = vrot.lane.b32.xlu2 %v3887_v17, %s6005_s28 }
 0x1bd   : > { %1285 = vrot.lane.b32.xlu1 %v3887_v17, %s5965_s20  ;;  %1247 = vrot.lane.b32.xlu0 %v3887_v17, %s6006_s10 }
 0x1be   : > { %1235 = vrot.lane.b32.xlu2 %v4323_v23, %s6005_s28 }
 0x1c5   : > { %1301 = vrot.lane.b32.xlu1 %v4323_v23, %s5965_s20  ;;  %1261 = vrot.lane.b32.xlu0 %v4323_v23, %s6006_s10 }
 0x1c6   : > { %1259 = vrot.lane.b32.xlu2 %v4321_v6, %s6006_s10 }
 0x1cd   : > { %1325 = vrot.lane.b32.xlu1 %v4321_v6, %s5958_s26  ;;  %1299 = vrot.lane.b32.xlu0 %v4321_v6, %s5965_s20 }
 0x1ce   : > { %1287 = vrot.lane.b32.xlu2 %v3889_v47, %s5965_s20 }
 0x1d5   : > { %1341 = vrot.lane.b32.xlu1 %v3889_v47, %s6007_s12  ;;  %1315 = vrot.lane.b32.xlu0 %v3889_v47, %s5958_s26 }
 0x1d6   : > { %1313 = vrot.lane.b32.xlu2 %v3887_v17, %s5958_s26 }
 0x1dd   : > { %1367 = vrot.lane.b32.xlu1 %v3887_v17, %s6008_s9  ;;  %1339 = vrot.lane.b32.xlu0 %v3887_v17, %s6007_s12 }
 0x1de   : > { %1327 = vrot.lane.b32.xlu2 %v4323_v23, %s5958_s26 }
 0x1e5   : > { %1383 = vrot.lane.b32.xlu1 %v4323_v23, %s6008_s9  ;;  %1355 = vrot.lane.b32.xlu0 %v4323_v23, %s6007_s12 }
 0x1e6   : > { %1353 = vrot.lane.b32.xlu2 %v4321_v6, %s6007_s12 }
 0x1ed   : > { %1381 = vrot.lane.b32.xlu0 %v4321_v6, %s6008_s9  ;;  %1448 = vrot.lane.b32.xlu1 %v4383_v20, %s5956_s16 }
 0x1ee   : > { %1369 = vrot.lane.b32.xlu2 %v3889_v47, %s6008_s9 }
 0x1f5   : > { %1433 = vrot.lane.b32.xlu0 %v4398_v36, %s5956_s16  ;;  %1469 = vrot.lane.b32.xlu1 %v4401_v35, %s5956_s16 }
 0x1f6   : > { %1431 = vrot.lane.b32.xlu2 %v4404_v18, %s5956_s16 }
 0x1fd   : > { %1467 = vrot.lane.b32.xlu0 %v4413_v30, %s5956_s16  ;;  %1495 = vrot.lane.b32.xlu1 %v4383_v20, %s5997_s18 }
 0x1fe   : > { %1450 = vrot.lane.b32.xlu2 %v4416_v7, %s5956_s16  ;;  %s4510_s16 = sld [smem:[#allocation7 + $0xb]] }
 0x200   : > { %v1178_v37 = vpop.permute.xlu2 %1177 }
 0x205   : > { %1483 = vrot.lane.b32.xlu0 %v4398_v36, %s5997_s18  ;;  %1511 = vrot.lane.b32.xlu1 %v4401_v35, %s5997_s18 }
 0x206   : > { %1481 = vrot.lane.b32.xlu2 %v4404_v18, %s5997_s18 }
 0x208   : > { %v4430_v10 = vpop.permute.xlu2 %1193 }
 0x209   : > { %v1196_v14 = vsel %vm5962_vm5, %v4430_v10, %v4438_v19  ;;  %v1195_v45 = vsel %vm5962_vm5, %v4438_v19, %v4430_v10 }
 0x20a   : > { %v1197_v4 = vsel %vm5960_vm0, %v1196_v14, 0.0 }
 0x20d   : > { %1509 = vrot.lane.b32.xlu0 %v4413_v30, %s5997_s18  ;;  %1537 = vrot.lane.b32.xlu1 %v4383_v20, %s6005_s28 }
 0x20e   : > { %1497 = vrot.lane.b32.xlu2 %v4416_v7, %s5997_s18 }
 0x210   : > { %v4440_v51 = vpop.permute.xlu2 %1219 }
 0x215   : > { %1525 = vrot.lane.b32.xlu0 %v4398_v36, %s6005_s28  ;;  %1553 = vrot.lane.b32.xlu1 %v4401_v35, %s6005_s28 }
 0x216   : > { %1523 = vrot.lane.b32.xlu2 %v4404_v18, %s6005_s28 }
 0x217   : > { %v4448_v62 = vpop.permute.xlu1 %1207  ;;  %v1180_v59 = vpop.permute.xlu0 %1179 }
 0x218   : > { %v4450_v31 = vpop.permute.xlu2 %1235  ;;  %v1181_v5 = vsel %vm5963_vm2, %v1178_v37, %v1180_v59  ;;  %v1182_v39 = vsel %vm5963_vm2, %v1180_v59, %v1178_v37  ;;  %v1200_v37 = vstv %s4502_s17  ;;  %v4566_v59 = vmul.f32 %v1280_v61, %v4321_v6  ;;  %s4594_s17 = sld [smem:[#allocation7 + $0xe]] }
 0x219   : > { %v1183_v0 = vsel %vm3371_vm3, %v1182_v39, 0.0  ;;  %v1184_v28 = vsel %vm3379_vm4, %v1181_v5, 0.0  ;;  %v1242_v5 = vstv %s4510_s16  ;;  %v1214_v39 = vstv %s4508_s29  ;;  %s4643_s29 = sld [smem:[#allocation7 + $0x7]]  ;;  %s5964_s16 = sand.u32 1, %s2973_s22  }
 0x21a   : > { %v1187_v53 = vmul.f32 %v1186_v32, %v1183_v0  ;;  %v1188_v60 = vmul.f32 %v1186_v32, %v1184_v28  ;;  %v4581_v6 = vmul.f32 %v1280_v61, %v4323_v23  ;;  %v1202_v19 = vmul.f32 %v1200_v37, %v1195_v45 }
 0x21b   : > { %v1201_v23 = vmul.f32 %v1200_v37, %v1197_v4  ;;  %v1294_v37 = vstv %s4540_s14  ;;  %v1256_v45 = vstv %s4550_s15  ;;  %s4660_s15 = sld [smem:[#allocation7 + $0x10]] }
 0x21c   : > { %s4763_s14 = sld [smem:[#allocation5 + $0x9]] }
 0x21d   : > { %1551 = vrot.lane.b32.xlu0 %v4413_v30, %s6005_s28  ;;  %1577 = vrot.lane.b32.xlu1 %v4383_v20, %s6006_s10 }
 0x21e   : > { %1539 = vrot.lane.b32.xlu2 %v4416_v7, %s6005_s28 }
 0x21f   : > { %v4458_v16 = vpop.permute.xlu1 %1233  ;;  %v4460_v54 = vpop.permute.xlu0 %1205 }
 0x220   : > { %v1260_v8 = vpop.permute.xlu2 %1259  ;;  %v1210_v10 = vsel %vm5962_vm5, %v4448_v62, %v4460_v54  ;;  %v1209_v32 = vsel %vm5962_vm5, %v4460_v54, %v4448_v62 }
 0x221   : > { %v1211_v0 = vsel %vm5960_vm0, %v1210_v10, 0.0 }
 0x225   : > { %1567 = vrot.lane.b32.xlu0 %v4398_v36, %s6006_s10  ;;  %1593 = vrot.lane.b32.xlu1 %v4401_v35, %s6006_s10 }
 0x226   : > { %1565 = vrot.lane.b32.xlu2 %v4404_v18, %s6006_s10 }
 0x227   : > { %v4468_v63 = vpop.permute.xlu1 %1249  ;;  %v4470_v49 = vpop.permute.xlu0 %1221 }
 0x228   : > { %v4472_v34 = vpop.permute.xlu2 %1287 }
 0x22d   : > { %1591 = vrot.lane.b32.xlu0 %v4413_v30, %s6006_s10  ;;  %1649 = vrot.lane.b32.xlu1 %v4383_v20, %s5965_s20 }
 0x22e   : > { %1579 = vrot.lane.b32.xlu2 %v4416_v7, %s6006_s10 }
 0x22f   : > { %v4480_v52 = vpop.permute.xlu1 %1285  ;;  %v1248_v22 = vpop.permute.xlu0 %1247 }
 0x230   : > { %v4482_v48 = vpop.permute.xlu2 %1313 }
 0x235   : > { %1637 = vrot.lane.b32.xlu0 %v4398_v36, %s5965_s20  ;;  %1665 = vrot.lane.b32.xlu1 %v4401_v35, %s5965_s20 }
 0x236   : > { %1635 = vrot.lane.b32.xlu2 %v4404_v18, %s5965_s20 }
 0x237   : > { %v4494_v25 = vpop.permute.xlu1 %1301  ;;  %v1262_v9 = vpop.permute.xlu0 %1261 }
 0x238   : > { %v4496_v38 = vpop.permute.xlu2 %1327  ;;  %v1263_v17 = vsel %vm6009_vm13, %v1260_v8, %v1262_v9  ;;  %v1264_v47 = vsel %vm6010_vm9, %v1262_v9, %v1260_v8  ;;  %v1228_v8 = vstv %s4520_s0  ;;  %v1251_v9 = vsel %vm6012_vm8, %v1248_v22, %v4468_v63  ;;  %vm6013_vm13 = vmmov %vm6012_vm8  ;;  %s4605_s0 = sld [smem:[#allocation7 + $0x6]] }
 0x239   : > { %v1252_v42 = vsel %vm6013_vm13, %v4468_v63, %v1248_v22  ;;  %v1265_v44 = vsel %vm3334_vm1, %v1264_v47, 0.0  ;;  %v1266_v27 = vsel %vm3379_vm4, %v1263_v17, 0.0  ;;  %v1189_v63 = vadd.f32 %v1187_v53, %v1175_v3 }
 0x23a   : > { %v1190_v22 = vadd.f32 %v1188_v60, %v1176_v15  ;;  %v1253_v4 = vsel %vm3334_vm1, %v1252_v42, 0.0  ;;  %v1254_v17 = vsel %vm3379_vm4, %v1251_v9, 0.0  ;;  %vm6014_vm9 = vcmp.lt.s32.totalorder %v3308_v43, 15 }
 0x23b   : > { %v4625_v3 = vsel %vm6014_vm9, %v4458_v16, %v4450_v31  ;;  %vm6015_vm8 = vmmov %vm6014_vm9  ;;  %v1215_v53 = vmul.f32 %v1214_v39, %v1211_v0  ;;  %v1216_v60 = vmul.f32 %v1214_v39, %v1209_v32  ;;  %v1203_v9 = vadd.f32 %v1201_v23, %v1189_v63 }
 0x23c   : > { %v4631_v62 = vsel %vm6015_vm8, %v4450_v31, %v4458_v16  ;;  %vm6016_vm13 = vmmov %vm6015_vm8  ;;  %v1204_v31 = vadd.f32 %v1202_v19, %v1190_v22  ;;  %v1257_v16 = vmul.f32 %v1256_v45, %v1253_v4  ;;  %v1258_v42 = vmul.f32 %v1256_v45, %v1254_v17 }
 0x23d   : > { %1663 = vrot.lane.b32.xlu0 %v4413_v30, %s5965_s20  ;;  %1689 = vrot.lane.b32.xlu1 %v4383_v20, %s5958_s26  ;;  %s4529_s26 = sld [smem:[#allocation7 + $0xc]]  ;;  %v1223_v47 = vsel %vm6016_vm13, %v4440_v51, %v4470_v49  ;;  %vm6017_vm9 = vmmov %vm6015_vm8  ;;  %v1239_v39 = vsel %vm3540_vm10, %v4631_v62, 0.0  ;;  %vm6018_vm8 = vcmp.lt.s32.totalorder %v3308_v43, 127  ;;  %v4668_v63 = vadd.f32 %v1215_v53, %v1203_v9 }
 0x23e   : > { %1651 = vrot.lane.b32.xlu2 %v4416_v7, %s5965_s20  ;;  %v1224_v10 = vsel %vm6017_vm9, %v4470_v49, %v4440_v51  ;;  %v1289_v51 = vsel %vm6018_vm8, %v4480_v52, %v4472_v34  ;;  %v1334_v49 = vstv %s4578_s11  ;;  %v1226_v23 = vsel %vm3470_vm7, %v1223_v47, 0.0  ;;  %vm6019_vm13 = vmmov %vm6018_vm8  ;;  %s4737_s11 = sld [smem:[#allocation7 + $0x11]] }
 0x23f   : > { %v4532_v55 = vpop.permute.xlu1 %1325  ;;  %v4534_v56 = vpop.permute.xlu0 %1299  ;;  %v1225_v19 = vsel %vm3540_vm10, %v1224_v10, 0.0  ;;  %v4670_v22 = vadd.f32 %v1216_v60, %v1204_v31  ;;  %v1308_v32 = vstv %s4594_s17  ;;  %v1322_v0 = vstv %s4605_s0  ;;  %s4775_s17 = sld [smem:[#allocation8 + $0x2]] }
 0x240   : > { %v4542_v26 = vpop.permute.xlu2 %1353  ;;  %v1290_v17 = vsel %vm6019_vm13, %v4472_v34, %v4480_v52  ;;  %vm6020_vm9 = vcmp.lt.s32.totalorder %v3308_v43, 113  ;;  %v1229_v47 = vmul.f32 %v1228_v8, %v1225_v19  ;;  %v1230_v10 = vmul.f32 %v1228_v8, %v1226_v23  ;;  %s4792_s0 = sld [smem:[#allocation5]] }
 0x241   : > { %vm6021_vm8 = vmmov %vm6020_vm9  ;;  %v1292_v31 = vsel %vm3470_vm7, %v1290_v17, 0.0  ;;  %v1348_v19 = vstv %s4643_s29  ;;  %s2587_s29 = sshll.u32 %s5964_s16, 2  ;;  %s5391_s16 = sld [smem:[#allocation2 + $0x16]] }
 0x242   : > { %vm6022_vm13 = vmmov %vm6021_vm8 }
 0x243   : > { %v1268_v40 = vstv %s4529_s26  ;;  %s4633_s26 = sld [smem:[#allocation7 + $0x8]]  ;;  %v1329_v34 = vsel %vm6022_vm13, %v4532_v55, %v4496_v38  ;;  %vm6023_vm0 = vmmov %vm6021_vm8 }
 0x244   : > { %v1269_v54 = vmul.f32 %v1268_v40, %v1265_v44  ;;  %v1270_v15 = vmul.f32 %v1268_v40, %v1266_v27  ;;  %v1240_v40 = vsel %vm3470_vm7, %v4625_v3, 0.0  ;;  %v1330_v52 = vsel %vm6023_vm0, %v4496_v38, %v4532_v55 }
 0x245   : > { %1679 = vrot.lane.b32.xlu0 %v4398_v36, %s6011_s19  ;;  %1705 = vrot.lane.b32.xlu1 %v4401_v35, %s6011_s19  ;;  %v1331_v55 = vsel %vm3334_vm1, %v1329_v34, 0.0  ;;  %vm6025_vm0 = vcmp.lt.s32.totalorder %v3308_v43, 127  ;;  %v1244_v62 = vmul.f32 %v1242_v5, %v1240_v40 }
 0x246   : > { %1677 = vrot.lane.b32.xlu2 %v4404_v18, %s6011_s19  ;;  %v1271_v44 = vadd.f32 %v1269_v54, %v1257_v16  ;;  %v1272_v27 = vadd.f32 %v1270_v15, %v1258_v42  ;;  %v1291_v54 = vsel %vm3464_vm6, %v1289_v51, 0.0 }
 0x247   : > { %v4603_v14 = vpop.permute.xlu1 %1341  ;;  %v1316_v61 = vpop.permute.xlu0 %1315  ;;  %v1295_v16 = vmul.f32 %v1294_v37, %v1291_v54 }
 0x248   : > { %v4613_v28 = vpop.permute.xlu2 %1369  ;;  %v1317_v15 = vsel %vm6020_vm9, %v4482_v48, %v1316_v61  ;;  %v1318_v53 = vsel %vm6021_vm8, %v1316_v61, %v4482_v48  ;;  %v1277_v9 = vadd.f32 %v4553_v41, %v1271_v44  ;;  %v1278_v48 = vadd.f32 %v4556_v29, %v1272_v27  ;;  %vm6026_vm8 = vmmov %vm6025_vm0 }
 0x249   : > { %v1376_v61 = vstv %s4633_s26  ;;  %vm6024_vm9 = vcmp.lt.s32.totalorder %v3308_v43, 112  ;;  %v1319_v42 = vsel %vm3334_vm1, %v1317_v15, 0.0  ;;  %v1320_v38 = vsel %vm3675_vm14, %v1318_v53, 0.0  ;;  %s4825_s26 = sld [smem:[#allocation5 + $0x12]] }
 0x24a   : > { %v1332_v41 = vsel %vm3675_vm14, %v1330_v52, 0.0  ;;  %v1303_v29 = vsel %vm6025_vm0, %v4534_v56, %v4494_v25  ;;  %v1304_v51 = vsel %vm6026_vm8, %v4494_v25, %v4534_v56  ;;  %vm6027_vm13 = vmmov %vm6024_vm9  ;;  %v1362_v27 = vstv %s4660_s15  ;;  %s6032_s15 = smov 17  }
 0x24b   : > { %v1283_v17 = vadd.f32 %v4566_v59, %v1277_v9  ;;  %v1284_v54 = vadd.f32 %v4581_v6, %v1278_v48  ;;  %v1323_v25 = vmul.f32 %v1322_v0, %v1319_v42  ;;  %v1324_v56 = vmul.f32 %v1322_v0, %v1320_v38  ;;  %vm6028_vm0 = vmmov %vm6024_vm9 }
 0x24c   : > { %v1305_v15 = vsel %vm3464_vm6, %v1303_v29, 0.0  ;;  %v1306_v53 = vsel %vm3470_vm7, %v1304_v51, 0.0  ;;  %vm5961_vm8 = vcmask 1040384  }
 0x24d   : > { %1703 = vrot.lane.b32.xlu0 %v4413_v30, %s6011_s19  ;;  %1731 = vrot.lane.b32.xlu1 %v4383_v20, %s6007_s12 }
 0x24e   : > { %1691 = vrot.lane.b32.xlu2 %v4416_v7, %s6011_s19 }
 0x24f   : > { %v1368_v45 = vpop.permute.xlu1 %1367  ;;  %v1340_v4 = vpop.permute.xlu0 %1339 }
 0x250   : > { %v4686_v60 = vpop.permute.xlu2 %1431  ;;  %v1344_v8 = vsel %vm6024_vm9, %v4603_v14, %v1340_v4  ;;  %v1343_v23 = vsel %vm6027_vm13, %v1340_v4, %v4603_v14  ;;  %v1335_v14 = vmul.f32 %v1334_v49, %v1331_v55  ;;  %v1336_v4 = vmul.f32 %v1334_v49, %v1332_v41 }
 0x251   : > { %v1346_v44 = vsel %vm363_vm12, %v1344_v8, 0.0  ;;  %v1349_v52 = vmul.f32 %v1348_v19, %v1343_v23  ;;  %v1296_v49 = vmul.f32 %v1294_v37, %v1292_v31  ;;  %v1371_v8 = vsel %vm731_vm11, %v1368_v45, %v4613_v28 }
 0x252   : > { %v1350_v6 = vmul.f32 %v1348_v19, %v1346_v44  ;;  %v1372_v42 = vsel %vm731_vm11, %v4613_v28, %v1368_v45  ;;  %v1337_v55 = vadd.f32 %v1335_v14, %v1323_v25  ;;  %v1338_v41 = vadd.f32 %v1336_v4, %v1324_v56 }
 0x253   : > { %v1298_v19 = vadd.f32 %v1296_v49, %v1284_v54  ;;  %v1309_v37 = vmul.f32 %v1308_v32, %v1305_v15  ;;  %v1310_v31 = vmul.f32 %v1308_v32, %v1306_v53  ;;  %v1373_v23 = vsel %vm3464_vm6, %v1371_v8, 0.0 }
 0x254   : > { %v1374_v44 = vsel %vm3795_vm15, %v1372_v42, 0.0  ;;  %v1351_v28 = vadd.f32 %v1349_v52, %v1337_v55  ;;  %v1352_v45 = vadd.f32 %v1350_v6, %v1338_v41  ;;  %v1231_v32 = vadd.f32 %v1229_v47, %v4668_v63 }
 0x255   : > { %1719 = vrot.lane.b32.xlu0 %v4398_v36, %s6007_s12  ;;  %1747 = vrot.lane.b32.xlu1 %v4401_v35, %s6007_s12  ;;  %v1390_v63 = vstv %s4737_s11  ;;  %v1312_v47 = vadd.f32 %v1310_v31, %v1298_v19  ;;  %v1378_v54 = vmul.f32 %v1376_v61, %v1374_v44  ;;  %v1440_v19 = vstv %s4792_s0  ;;  %s4852_s11 = sld [smem:[#allocation5 + $0x1]] }
 0x256   : > { %1717 = vrot.lane.b32.xlu2 %v4404_v18, %s6007_s12  ;;  %s4900_s0 = sld [smem:[#allocation5 + $0x13]] }
 0x257   : > { %v1384_v34 = vpop.permute.xlu1 %1383  ;;  %v1356_v59 = vpop.permute.xlu0 %1355 }
 0x258   : > { %v1451_v9 = vpop.permute.xlu2 %1450  ;;  %v1357_v0 = vsel %vm6024_vm9, %v4542_v26, %v1356_v59  ;;  %v1358_v48 = vsel %vm6028_vm0, %v1356_v59, %v4542_v26  ;;  %v1297_v26 = vadd.f32 %v1295_v16, %v1283_v17  ;;  %v1243_v16 = vmul.f32 %v1242_v5, %v1239_v39 }
 0x259   : > { %v1360_v38 = vsel %vm363_vm12, %v1358_v48, 0.0  ;;  %v1363_v29 = vmul.f32 %v1362_v27, %v1357_v0  ;;  %vm6033_vm9 = vcmp.ge.s32.totalorder %v3308_v43, 16 }
 0x25a   : > { %v1364_v51 = vmul.f32 %v1362_v27, %v1360_v38  ;;  %v1232_v27 = vadd.f32 %v1230_v10, %v4670_v22  ;;  %v1311_v22 = vadd.f32 %v1309_v37, %v1297_v26  ;;  %v1377_v10 = vmul.f32 %v1376_v61, %v1373_v23  ;;  %vm6034_vm0 = vmmov %vm6033_vm9 }
 0x25b   : > { %v1365_v17 = vadd.f32 %v1363_v29, %v1351_v28  ;;  %v1245_v14 = vadd.f32 %v1243_v16, %v1231_v32  ;;  %v1399_v38 = vstv %s4775_s17  ;;  %v6029_v32 = vlaneseq  ;;  %s4874_s17 = sld [smem:[#allocation5 + $0xa]] }
 0x25c   : > { %v1366_v39 = vadd.f32 %v1364_v51, %v1352_v45  ;;  %v1246_v4 = vadd.f32 %v1244_v62, %v1232_v27  ;;  %v4822_v51 = vld [vmem:[%s3213_s13 + $0x9] ss:$4 sm:$0x3] }
 0x25d   : > { %1745 = vrot.lane.b32.xlu0 %v4413_v30, %s6007_s12  ;;  %1773 = vrot.lane.b32.xlu1 %v4383_v20, %s6008_s9  ;;  %v1379_v59 = vadd.f32 %v1377_v10, %v1365_v17  ;;  %v1395_v0 = vadd.f32 %v1311_v22, %v1245_v14  ;;  %v4840_v16 = vperm.slane %v4822_v51, 0  ;;  %vm4843_vm13 = vcmp.lt.s32.totalorder %v6029_v32, 256  ;;  %v4862_v10 = vld [vmem:[%s3213_s13 + $0x8] ss:$4 sm:$0x3] }
 0x25e   : > { %1733 = vrot.lane.b32.xlu2 %v4416_v7, %s6007_s12  ;;  %v1380_v52 = vadd.f32 %v1378_v54, %v1366_v39  ;;  %v1396_v48 = vadd.f32 %v1312_v47, %v1246_v4  ;;  %v4865_v54 = vld [vmem:[%s3213_s13 + $0xa] ss:$4 sm:$0x3] }
 0x25f   : > { %v1382_v25 = vpop.permute.xlu0 %1381  ;;  %v1449_v20 = vpop.permute.xlu1 %1448 }
 0x260   : > { %v4794_v56 = vpop.permute.xlu2 %1481  ;;  %v1385_v5 = vsel %vm731_vm11, %v1382_v25, %v1384_v34  ;;  %v1386_v3 = vsel %vm731_vm11, %v1384_v34, %v1382_v25  ;;  %v1452_v40 = vsel %vm5963_vm2, %v1449_v20, %v1451_v9  ;;  %v1453_v61 = vsel %vm5963_vm2, %v1451_v9, %v1449_v20 }
 0x261   : > { %v1387_v15 = vsel %vm3464_vm6, %v1385_v5, 0.0  ;;  %v1388_v53 = vsel %vm3795_vm15, %v1386_v3, 0.0  ;;  %v1457_v9 = vstv %s4763_s14  ;;  %v1454_v42 = vsel %vm3371_vm3, %v1453_v61, 0.0  ;;  %s4854_s14 = scalar_lea.vmem [#allocation10], %s2587_s29  ;;  %s2682_s29 = sld [smem:[#allocation5 + $0xb]] }
 0x262   : > { %v1391_v6 = vmul.f32 %v1390_v63, %v1387_v15  ;;  %v1392_v34 = vmul.f32 %v1390_v63, %v1388_v53  ;;  %v1455_v55 = vsel %vm3379_vm4, %v1452_v40, 0.0  ;;  %v1458_v26 = vmul.f32 %v1457_v9, %v1454_v42 }
 0x263   : > { %v1459_v23 = vmul.f32 %v1457_v9, %v1455_v55  ;;  %v1476_v25 = vstv %s4825_s26  ;;  %v4885_v15 = vperm.slane %v4862_v10, 1  ;;  %v4888_v53 = vperm.slane %v4865_v54, 1  ;;  %s2681_s26 = sld [smem:[#allocation5 + $0x2]] }
 0x264   : > { %v1393_v49 = vadd.f32 %v1391_v6, %v1379_v59  ;;  %v1394_v8 = vadd.f32 %v1392_v34, %v1380_v52  ;;  %v4891_v6 = vperm.slane %v4862_v10, 0  ;;  %v1504_v9 = vstv %s4874_s17  ;;  %s4964_s17 = sld [smem:[#allocation5 + $0xc]] }
 0x265   : > { %1761 = vrot.lane.b32.xlu0 %v4398_v36, %s6008_s9  ;;  %1789 = vrot.lane.b32.xlu1 %v4401_v35, %s6008_s9 }
 0x266   : > { %v1397_v41 = vadd.f32 %v1395_v0, %v1393_v49  ;;  %v1398_v29 = vadd.f32 %v1396_v48, %v1394_v8  ;;  %1759 = vrot.lane.b32.xlu2 %v4404_v18, %s6008_s9  ;;  %v1490_v48 = vstv %s4852_s11  ;;  %s4944_s11 = sld [smem:[#allocation5 + $0x14]] }
 0x267   : > { %v1434_v37 = vpop.permute.xlu0 %1433  ;;  %v1470_v31 = vpop.permute.xlu1 %1469 }
 0x268   : > { %v1401_v36 = vadd.f32 %v1399_v38, %v1398_v29  ;;  %v1498_v44 = vpop.permute.xlu2 %1497  ;;  %v1435_v35 = vsel %vm5963_vm2, %v4686_v60, %v1434_v37  ;;  %v1436_v18 = vsel %vm5963_vm2, %v1434_v37, %v4686_v60  ;;  %v1400_v62 = vadd.f32 %v1399_v38, %v1397_v41 }
 0x269   : > { %v1437_v28 = vsel %vm3371_vm3, %v1436_v18, 0.0  ;;  %v1438_v45 = vsel %vm3379_vm4, %v1435_v35, 0.0 }
 0x26a   : > { %v1404_v17 = vrot.slane %v1401_v36, 7  ;;  %v1441_v60 = vmul.f32 %v1440_v19, %v1437_v28  ;;  %v1442_v39 = vmul.f32 %v1440_v19, %v1438_v45  ;;  %v4914_v19 = vperm.slane %v4865_v54, 0 }
 0x26b   : > { %v1518_v28 = vstv %s4900_s0  ;;  %s4969_s0 = sld [smem:[#allocation5 + $0x3]] }
 0x26c   : > { %v1460_v63 = vadd.f32 %v1458_v26, %v1441_v60  ;;  %v1461_v22 = vadd.f32 %v1459_v23, %v1442_v39  ;;  %v1406_v47 = vsel %vm5961_vm8, %v1400_v62, %v1404_v17  ;;  %vm6037_vm8 = vcmp.ge.s32.totalorder %v3308_v43, 16 }
 0x26d   : > { %1787 = vrot.lane.b32.xlu0 %v4413_v30, %s6008_s9  ;;  %1833 = vrot.lane.b32.xlu1 %v4840_v16, %s6032_s15  ;;  %1412 = vst.msk [vmem:[%s4854_s14] sm:$0x3] %vm4843_vm13, %v1406_v47 }
 0x26e   : > { %1775 = vrot.lane.b32.xlu2 %v4416_v7, %s6008_s9 }
 0x26f   : > { %v1468_v30 = vpop.permute.xlu0 %1467  ;;  %v1496_v20 = vpop.permute.xlu1 %1495 }
 0x270   : > { %v4868_v5 = vpop.permute.xlu2 %1523  ;;  %v1471_v3 = vsel %vm5963_vm2, %v1468_v30, %v1470_v31  ;;  %v1472_v40 = vsel %vm5963_vm2, %v1470_v31, %v1468_v30  ;;  %v1499_v7 = vsel %vm5962_vm5, %v1496_v20, %v1498_v44  ;;  %v1500_v61 = vsel %vm5962_vm5, %v1498_v44, %v1496_v20 }
 0x271   : > { %v1473_v14 = vsel %vm3371_vm3, %v1472_v40, 0.0  ;;  %v1474_v4 = vsel %vm3379_vm4, %v1471_v3, 0.0  ;;  %v1501_v41 = vsel %vm6033_vm9, %v1500_v61, 0.0  ;;  %v4917_v31 = vperm.slane %v4822_v51, 1 }
 0x272   : > { %v1477_v59 = vmul.f32 %v1476_v25, %v1473_v14  ;;  %v1478_v52 = vmul.f32 %v1476_v25, %v1474_v4  ;;  %v1506_v36 = vmul.f32 %v1504_v9, %v1499_v7  ;;  %v1505_v44 = vmul.f32 %v1504_v9, %v1501_v41 }
 0x273   : > { %vm6035_vm9 = vcmp.lt.s32.totalorder %v3308_v43, 15  ;;  %v1532_v20 = vstv %s2681_s26  ;;  %v1546_v7 = vstv %s2682_s29  ;;  %v1560_v41 = vstv %s4944_s11  ;;  %s2687_s26 = sld [smem:[#allocation5 + $0x4]] }
 0x274   : > { %v1479_v34 = vadd.f32 %v1477_v59, %v1460_v63  ;;  %v1480_v0 = vadd.f32 %v1478_v52, %v1461_v22  ;;  %s4998_s29 = sld [smem:[#allocation5 + $0xd]] }
 0x275   : > { %1818 = vrot.lane.b32.xlu0 %v4885_v15, %s6032_s15  ;;  %1854 = vrot.lane.b32.xlu1 %v4888_v53, %s6032_s15  ;;  %s5002_s11 = sld [smem:[#allocation5 + $0x15]] }
 0x276   : > { %1816 = vrot.lane.b32.xlu2 %v4891_v6, %s6032_s15 }
 0x277   : > { %v1484_v49 = vpop.permute.xlu0 %1483  ;;  %v1512_v8 = vpop.permute.xlu1 %1511 }
 0x278   : > { %v1540_v42 = vpop.permute.xlu2 %1539  ;;  %v1485_v38 = vsel %vm5962_vm5, %v4794_v56, %v1484_v49  ;;  %v1486_v55 = vsel %vm5962_vm5, %v1484_v49, %v4794_v56 }
 0x279   : > { %v1487_v29 = vsel %vm6034_vm0, %v1486_v55, 0.0  ;;  %v1492_v26 = vmul.f32 %v1490_v48, %v1485_v38  ;;  %vm6036_vm0 = vmmov %vm6035_vm9 }
 0x27a   : > { %v1491_v37 = vmul.f32 %v1490_v48, %v1487_v29 }
 0x27b   : > { %v1494_v23 = vadd.f32 %v1492_v26, %v1480_v0 }
 0x27c   : > { %v1493_v35 = vadd.f32 %v1491_v37, %v1479_v34 }
 0x27d   : > { %1852 = vrot.lane.b32.xlu0 %v4914_v19, %s6032_s15  ;;  %v1508_v56 = vadd.f32 %v1506_v36, %v1494_v23  ;;  %1880 = vrot.lane.b32.xlu1 %v4840_v16, %s5997_s18 }
 0x27e   : > { %1835 = vrot.lane.b32.xlu2 %v4917_v31, %s6032_s15  ;;  %v1507_v18 = vadd.f32 %v1505_v44, %v1493_v35 }
 0x27f   : > { %v1510_v45 = vpop.permute.xlu0 %1509  ;;  %v1538_v32 = vpop.permute.xlu1 %1537 }
 0x280   : > { %v4926_v51 = vpop.permute.xlu2 %1565  ;;  %v1513_v62 = vsel %vm5962_vm5, %v1510_v45, %v1512_v8  ;;  %v1514_v17 = vsel %vm5962_vm5, %v1512_v8, %v1510_v45  ;;  %v1541_v60 = vsel %vm6035_vm9, %v1538_v32, %v1540_v42  ;;  %v1542_v39 = vsel %vm6036_vm0, %v1540_v42, %v1538_v32  ;;  %vm6039_vm9 = vmmov %vm6036_vm0 }
 0x281   : > { %v1515_v63 = vsel %vm6037_vm8, %v1514_v17, 0.0  ;;  %v1520_v22 = vmul.f32 %v1518_v28, %v1513_v62  ;;  %vm6038_vm8 = vmmov %vm6036_vm0  ;;  %v1543_v59 = vsel %vm3540_vm10, %v1542_v39, 0.0  ;;  %v1544_v52 = vsel %vm3470_vm7, %v1541_v60, 0.0 }
 0x282   : > { %v1519_v47 = vmul.f32 %v1518_v28, %v1515_v63  ;;  %v1547_v8 = vmul.f32 %v1546_v7, %v1543_v59  ;;  %v1548_v9 = vmul.f32 %v1546_v7, %v1544_v52  ;;  %v1586_v17 = vstv %s4964_s17  ;;  %s5005_s17 = sld [smem:[#allocation5 + $0x16]] }
 0x283   : > { %v1522_v25 = vadd.f32 %v1520_v22, %v1508_v56  ;;  %v1574_v63 = vstv %s4969_s0  ;;  %v1606_v59 = vstv %s2687_s26  ;;  %s5027_s0 = sld [smem:[#allocation5 + $0x5]] }
 0x284   : > { %v1521_v30 = vadd.f32 %v1519_v47, %v1507_v18  ;;  %s5043_s26 = sld [smem:[#allocation5 + $0xe]] }
 0x285   : > { %1868 = vrot.lane.b32.xlu0 %v4885_v15, %s5997_s18  ;;  %1896 = vrot.lane.b32.xlu1 %v4888_v53, %s5997_s18 }
 0x286   : > { %1866 = vrot.lane.b32.xlu2 %v4891_v6, %s5997_s18 }
 0x287   : > { %v1526_v3 = vpop.permute.xlu0 %1525  ;;  %v1554_v40 = vpop.permute.xlu1 %1553 }
 0x288   : > { %v1580_v61 = vpop.permute.xlu2 %1579  ;;  %v1527_v14 = vsel %vm6038_vm8, %v4868_v5, %v1526_v3  ;;  %v1528_v4 = vsel %vm6039_vm9, %v1526_v3, %v4868_v5  ;;  %vm6040_vm8 = vmmov %vm6036_vm0  ;;  %vm6041_vm9 = vcmp.lt.s32.totalorder %v3308_v43, 1 }
 0x289   : > { %v1529_v34 = vsel %vm3540_vm10, %v1528_v4, 0.0  ;;  %v1530_v0 = vsel %vm3470_vm7, %v1527_v14, 0.0  ;;  %vm6042_vm5 = vmmov %vm6041_vm9 }
 0x28a   : > { %v1533_v48 = vmul.f32 %v1532_v20, %v1529_v34  ;;  %v1534_v49 = vmul.f32 %v1532_v20, %v1530_v0  ;;  %v1607_v0 = vmul.f32 %v4392_v33, %v1606_v59 }
 0x28c   : > { %v1535_v42 = vadd.f32 %v1533_v48, %v1521_v30  ;;  %v1536_v38 = vadd.f32 %v1534_v49, %v1522_v25  ;;  %v1600_v48 = vstv %s5002_s11  ;;  %s5112_s11 = sld [smem:[#allocation5 + $0xf]] }
 0x28d   : > { %1894 = vrot.lane.b32.xlu0 %v4914_v19, %s5997_s18  ;;  %1922 = vrot.lane.b32.xlu1 %v4840_v16, %s6005_s28 }
 0x28e   : > { %1882 = vrot.lane.b32.xlu2 %v4917_v31, %s5997_s18  ;;  %v1549_v5 = vadd.f32 %v1547_v8, %v1535_v42  ;;  %v1550_v55 = vadd.f32 %v1548_v9, %v1536_v38  ;;  %v1626_v9 = vstv %s5005_s17  ;;  %s5114_s17 = sld [smem:[#allocation5 + $0x6]] }
 0x28f   : > { %v1552_v29 = vpop.permute.xlu0 %1551  ;;  %v1578_v26 = vpop.permute.xlu1 %1577 }
 0x290   : > { %v4971_v37 = vpop.permute.xlu2 %1635  ;;  %v1555_v36 = vsel %vm6036_vm0, %v1552_v29, %v1554_v40  ;;  %v1556_v23 = vsel %vm6040_vm8, %v1554_v40, %v1552_v29  ;;  %v1581_v28 = vsel %vm6041_vm9, %v1578_v26, %v1580_v61  ;;  %v1582_v45 = vsel %vm6042_vm5, %v1580_v61, %v1578_v26  ;;  %vm6043_vm0 = vmmov %vm6042_vm5 }
 0x291   : > { %v1557_v44 = vsel %vm3540_vm10, %v1556_v23, 0.0  ;;  %v1558_v35 = vsel %vm3470_vm7, %v1555_v36, 0.0  ;;  %v1583_v60 = vsel %vm3334_vm1, %v1582_v45, 0.0  ;;  %v1584_v39 = vsel %vm3379_vm4, %v1581_v28, 0.0  ;;  %vm6044_vm8 = vmmov %vm6043_vm0 }
 0x292   : > { %v1561_v56 = vmul.f32 %v1560_v41, %v1557_v44  ;;  %v1562_v18 = vmul.f32 %v1560_v41, %v1558_v35  ;;  %v1587_v25 = vmul.f32 %v1586_v17, %v1583_v60  ;;  %v1588_v30 = vmul.f32 %v1586_v17, %v1584_v39  ;;  %vm6045_vm9 = vmmov %vm6043_vm0 }
 0x293   : > { %v1610_v26 = vperm.slane %v1607_v0, 1  ;;  %v1627_v44 = vmul.f32 %v4395_v1, %v1626_v9  ;;  %v1644_v1 = vstv %s5027_s0  ;;  %s5120_s0 = sld [smem:[#allocation5 + $0x18]] }
 0x294   : > { %v4985_v32 = vadd.f32 %v1561_v56, %v1549_v5  ;;  %v4987_v62 = vadd.f32 %v1562_v18, %v1550_v55  ;;  %v1609_v55 = vperm.slane %v1607_v0, 0  ;;  %v1658_v0 = vstv %s5043_s26  ;;  %s5124_s26 = sld [smem:[#allocation5 + $0x7]] }
 0x295   : > { %1910 = vrot.lane.b32.xlu0 %v4885_v15, %s6005_s28  ;;  %1938 = vrot.lane.b32.xlu1 %v4888_v53, %s6005_s28  ;;  %v1629_v17 = vperm.slane %v1627_v44, 0  ;;  %v1630_v60 = vperm.slane %v1627_v44, 1 }
 0x296   : > { %1908 = vrot.lane.b32.xlu2 %v4891_v6, %s6005_s28 }
 0x297   : > { %v1568_v22 = vpop.permute.xlu0 %1567  ;;  %v1594_v47 = vpop.permute.xlu1 %1593 }
 0x298   : > { %v1652_v20 = vpop.permute.xlu2 %1651  ;;  %v1569_v3 = vsel %vm6042_vm5, %v4926_v51, %v1568_v22  ;;  %v1570_v40 = vsel %vm6043_vm0, %v1568_v22, %v4926_v51  ;;  %v1616_v51 = vstv %s4998_s29  ;;  %s5050_s29 = sld [smem:[#allocation5 + $0x17]]  ;;  %vm6046_vm5 = vcmp.lt.s32.totalorder %v3308_v43, 127 }
 0x299   : > { %v1571_v7 = vsel %vm3334_vm1, %v1570_v40, 0.0  ;;  %v1572_v61 = vsel %vm3379_vm4, %v1569_v3, 0.0  ;;  %v1617_v5 = vmul.f32 %v4380_v2, %v1616_v51  ;;  %vm6047_vm0 = vmmov %vm6046_vm5 }
 0x29a   : > { %v1575_v14 = vmul.f32 %v1574_v63, %v1571_v7  ;;  %v1576_v4 = vmul.f32 %v1574_v63, %v1572_v61 }
 0x29b   : > { %v1619_v18 = vperm.slane %v1617_v5, 0  ;;  %v1620_v28 = vperm.slane %v1617_v5, 1 }
 0x29c   : > { %v1589_v52 = vadd.f32 %v1587_v25, %v1575_v14  ;;  %v1590_v34 = vadd.f32 %v1588_v30, %v1576_v4 }
 0x29d   : > { %1936 = vrot.lane.b32.xlu0 %v4914_v19, %s6005_s28  ;;  %1962 = vrot.lane.b32.xlu1 %v4840_v16, %s6006_s10 }
 0x29e   : > { %1924 = vrot.lane.b32.xlu2 %v4917_v31, %s6005_s28 }
 0x29f   : > { %v1592_v49 = vpop.permute.xlu0 %1591  ;;  %v1650_v8 = vpop.permute.xlu1 %1649 }
 0x2a0   : > { %v5029_v42 = vpop.permute.xlu2 %1677  ;;  %v1595_v38 = vsel %vm6044_vm8, %v1592_v49, %v1594_v47  ;;  %v1596_v33 = vsel %vm6045_vm9, %v1594_v47, %v1592_v49  ;;  %vm6048_vm8 = vmmov %vm6047_vm0  ;;  %v1672_v49 = vstv %s5050_s29  ;;  %s5154_s29 = sld [smem:[#allocation5 + $0x10]] }
 0x2a1   : > { %v1597_v41 = vsel %vm3334_vm1, %v1596_v33, 0.0  ;;  %v1598_v29 = vsel %vm3379_vm4, %v1595_v38, 0.0  ;;  %v1653_v40 = vsel %vm6048_vm8, %v1650_v8, %v1652_v20  ;;  %vm6049_vm9 = vmmov %vm6047_vm0  ;;  %vm6051_vm8 = vcmp.lt.s32.totalorder %v3308_v43, 113 }
 0x2a2   : > { %v1601_v36 = vmul.f32 %v1600_v48, %v1597_v41  ;;  %v1602_v23 = vmul.f32 %v1600_v48, %v1598_v29  ;;  %v1654_v7 = vsel %vm6049_vm9, %v1652_v20, %v1650_v8  ;;  %vm6052_vm9 = vmmov %vm6051_vm8 }
 0x2a3   : > { %v1656_v51 = vsel %vm3470_vm7, %v1654_v7, 0.0 }
 0x2a4   : > { %v1603_v35 = vadd.f32 %v1601_v36, %v1589_v52  ;;  %v1604_v56 = vadd.f32 %v1602_v23, %v1590_v34  ;;  %v1660_v33 = vmul.f32 %v1658_v0, %v1656_v51 }
 0x2a5   : > { %1952 = vrot.lane.b32.xlu0 %v4885_v15, %s6006_s10  ;;  %1978 = vrot.lane.b32.xlu1 %v4888_v53, %s6006_s10 }
 0x2a6   : > { %v1613_v2 = vadd.f32 %v1609_v55, %v1603_v35  ;;  %v1614_v45 = vadd.f32 %v1610_v26, %v1604_v56  ;;  %1950 = vrot.lane.b32.xlu2 %v4891_v6, %s6006_s10 }
 0x2a7   : > { %v1638_v39 = vpop.permute.xlu0 %1637  ;;  %v1666_v63 = vpop.permute.xlu1 %1665 }
 0x2a8   : > { %v5052_v22 = vpop.permute.xlu2 %1691  ;;  %v1623_v47 = vadd.f32 %v1619_v18, %v1613_v2  ;;  %v1624_v25 = vadd.f32 %v1620_v28, %v1614_v45  ;;  %v1639_v30 = vsel %vm6046_vm5, %v4971_v37, %v1638_v39  ;;  %v1640_v3 = vsel %vm6047_vm0, %v1638_v39, %v4971_v37  ;;  %vm6050_vm5 = vmmov %vm6047_vm0 }
 0x2a9   : > { %v1641_v61 = vsel %vm3464_vm6, %v1639_v30, 0.0  ;;  %v1642_v14 = vsel %vm3470_vm7, %v1640_v3, 0.0  ;;  %v1655_v37 = vsel %vm3464_vm6, %v1653_v40, 0.0 }
 0x2aa   : > { %v1633_v4 = vadd.f32 %v1629_v17, %v1623_v47  ;;  %v1634_v59 = vadd.f32 %v1630_v60, %v1624_v25  ;;  %v1645_v52 = vmul.f32 %v1644_v1, %v1641_v61  ;;  %v1646_v34 = vmul.f32 %v1644_v1, %v1642_v14 }
 0x2ab   : > { %v1659_v38 = vmul.f32 %v1658_v0, %v1655_v37  ;;  %v1698_v61 = vstv %s5112_s11  ;;  %s5165_s11 = sld [smem:[#allocation5 + $0x19]] }
 0x2ac   : > { %v1647_v20 = vadd.f32 %v1645_v52, %v1633_v4  ;;  %v1648_v48 = vadd.f32 %v1646_v34, %v1634_v59  ;;  %v1686_v4 = vstv %s5114_s17  ;;  %v1712_v34 = vstv %s5120_s0  ;;  %s5180_s17 = sld [smem:[#allocation5 + $0x8]] }
 0x2ad   : > { %1976 = vrot.lane.b32.xlu0 %v4914_v19, %s6006_s10  ;;  %2034 = vrot.lane.b32.xlu1 %v4840_v16, %s5965_s20  ;;  %s5189_s0 = sld [smem:[#allocation5 + $0x11]] }
 0x2ae   : > { %1964 = vrot.lane.b32.xlu2 %v4917_v31, %s6006_s10  ;;  %v1661_v36 = vadd.f32 %v1659_v38, %v1647_v20  ;;  %v1662_v23 = vadd.f32 %v1660_v33, %v1648_v48  ;;  %v1726_v20 = vstv %s5124_s26  ;;  %s5197_s26 = sld [smem:[#allocation5 + $0x1a]] }
 0x2af   : > { %v1664_v8 = vpop.permute.xlu0 %1663  ;;  %v1690_v9 = vpop.permute.xlu1 %1689 }
 0x2b0   : > { %v5080_v5 = vpop.permute.xlu2 %1717  ;;  %v1667_v55 = vsel %vm6050_vm5, %v1664_v8, %v1666_v63  ;;  %v1668_v41 = vsel %vm6047_vm0, %v1666_v63, %v1664_v8  ;;  %v1693_v25 = vsel %vm6051_vm8, %v1690_v9, %v5052_v22  ;;  %vm6053_vm5 = vmmov %vm6051_vm8 }
 0x2b1   : > { %v1669_v29 = vsel %vm3464_vm6, %v1667_v55, 0.0  ;;  %v1670_v26 = vsel %vm3470_vm7, %v1668_v41, 0.0  ;;  %v1694_v3 = vsel %vm6053_vm5, %v5052_v22, %v1690_v9  ;;  %vm6054_vm0 = vmmov %vm6053_vm5  ;;  %v1695_v14 = vsel %vm3334_vm1, %v1693_v25, 0.0 }
 0x2b2   : > { %v1673_v44 = vmul.f32 %v1672_v49, %v1669_v29  ;;  %v1674_v35 = vmul.f32 %v1672_v49, %v1670_v26  ;;  %vm6055_vm2 = vmmov %vm6054_vm0  ;;  %v1696_v52 = vsel %vm3675_vm14, %v1694_v3, 0.0  ;;  %v1699_v37 = vmul.f32 %v1698_v61, %v1695_v14 }
 0x2b3   : > { %vm6056_vm8 = vmmov %vm6054_vm0  ;;  %v1700_v9 = vmul.f32 %v1698_v61, %v1696_v52 }
 0x2b4   : > { %v1675_v56 = vadd.f32 %v1673_v44, %v1661_v36  ;;  %v1676_v18 = vadd.f32 %v1674_v35, %v1662_v23 }
 0x2b5   : > { %2022 = vrot.lane.b32.xlu0 %v4885_v15, %s5965_s20  ;;  %2050 = vrot.lane.b32.xlu1 %v4888_v53, %s5965_s20 }
 0x2b6   : > { %v5095_v28 = vadd.f32 %v1675_v56, %v4985_v32  ;;  %v5098_v2 = vadd.f32 %v1676_v18, %v4987_v62  ;;  %2020 = vrot.lane.b32.xlu2 %v4891_v6, %s5965_s20 }
 0x2b7   : > { %v1680_v45 = vpop.permute.xlu0 %1679  ;;  %v1706_v17 = vpop.permute.xlu1 %1705 }
 0x2b8   : > { %v5102_v60 = vpop.permute.xlu2 %1733  ;;  %v1681_v30 = vsel %vm6052_vm9, %v5029_v42, %v1680_v45  ;;  %v1682_v40 = vsel %vm6054_vm0, %v1680_v45, %v5029_v42 }
 0x2b9   : > { %v1683_v59 = vsel %vm3334_vm1, %v1681_v30, 0.0  ;;  %v1684_v22 = vsel %vm3675_vm14, %v1682_v40, 0.0 }
 0x2ba   : > { %v1687_v51 = vmul.f32 %v1686_v4, %v1683_v59  ;;  %v1688_v38 = vmul.f32 %v1686_v4, %v1684_v22  ;;  %v1768_v22 = vstv %s5180_s17  ;;  %s5255_s17 = sld [smem:[#allocation8 + $0x1]] }
 0x2bc   : > { %v1701_v36 = vadd.f32 %v1699_v37, %v1687_v51  ;;  %v1702_v35 = vadd.f32 %v1700_v9, %v1688_v38  ;;  %v1782_v38 = vstv %s5189_s0  ;;  %s5269_s0 = sld [smem:[#allocation2 + $0x12]] }
 0x2bd   : > { %2048 = vrot.lane.b32.xlu0 %v4914_v19, %s5965_s20  ;;  %2074 = vrot.lane.b32.xlu1 %v4840_v16, %s6011_s19 }
 0x2be   : > { %2036 = vrot.lane.b32.xlu2 %v4917_v31, %s5965_s20  ;;  %s5432_s20 = sld [smem:[#allocation2 + $0x6]] }
 0x2bf   : > { %v1704_v32 = vpop.permute.xlu0 %1703  ;;  %v1732_v1 = vpop.permute.xlu1 %1731 }
 0x2c0   : > { %v5110_v62 = vpop.permute.xlu2 %1759  ;;  %v1707_v7 = vsel %vm6055_vm2, %v1704_v32, %v1706_v17  ;;  %v1708_v42 = vsel %vm6056_vm8, %v1706_v17, %v1704_v32  ;;  %vm6057_vm2 = vcmp.lt.s32.totalorder %v3308_v43, 112  ;;  %v1740_v17 = vstv %s5154_s29  ;;  %s5225_s29 = sld [smem:[#allocation2 + $0x9]] }
 0x2c1   : > { %v1709_v0 = vsel %vm3334_vm1, %v1707_v7, 0.0  ;;  %v1710_v33 = vsel %vm3675_vm14, %v1708_v42, 0.0  ;;  %vm6058_vm9 = vmmov %vm6057_vm2  ;;  %v1754_v32 = vstv %s5165_s11  ;;  %s5239_s11 = sld [smem:[#allocation2]] }
 0x2c2   : > { %v1713_v29 = vmul.f32 %v1712_v34, %v1709_v0  ;;  %v1714_v23 = vmul.f32 %v1712_v34, %v1710_v33  ;;  %vm6059_vm5 = vmmov %vm6057_vm2  ;;  %v1796_v33 = vstv %s5197_s26  ;;  %s5288_s26 = sld [smem:[#allocation2 + $0x1]] }
 0x2c3   : > { %v1736_v56 = vsel %vm6059_vm5, %v5102_v60, %v1732_v1  ;;  %vm6060_vm0 = vmmov %vm6057_vm2 }
 0x2c4   : > { %v1715_v18 = vadd.f32 %v1713_v29, %v1701_v36  ;;  %vm6061_vm8 = vmmov %vm6060_vm0  ;;  %v1738_v30 = vsel %vm363_vm12, %v1736_v56, 0.0 }
 0x2c5   : > { %2064 = vrot.lane.b32.xlu0 %v4885_v15, %s6011_s19  ;;  %2090 = vrot.lane.b32.xlu1 %v4888_v53, %s6011_s19  ;;  %v1735_v25 = vsel %vm6061_vm8, %v1732_v1, %v5102_v60  ;;  %v1742_v34 = vmul.f32 %v1740_v17, %v1738_v30 }
 0x2c6   : > { %2062 = vrot.lane.b32.xlu2 %v4891_v6, %s6011_s19  ;;  %v1741_v52 = vmul.f32 %v1740_v17, %v1735_v25 }
 0x2c7   : > { %v1720_v39 = vpop.permute.xlu0 %1719  ;;  %v1748_v63 = vpop.permute.xlu1 %1747 }
 0x2c8   : > { %v5126_v47 = vpop.permute.xlu2 %1775  ;;  %v1722_v48 = vsel %vm6057_vm2, %v1720_v39, %v5080_v5  ;;  %v1721_v55 = vsel %vm6058_vm9, %v5080_v5, %v1720_v39  ;;  %v1716_v39 = vadd.f32 %v1714_v23, %v1702_v35  ;;  %vm6062_vm2 = vmmov %vm6060_vm0  ;;  %vm6063_vm9 = vcmp.lt.s32.totalorder %v3308_v43, 17 }
 0x2c9   : > { %v1724_v26 = vsel %vm363_vm12, %v1722_v48, 0.0  ;;  %v1727_v44 = vmul.f32 %v1726_v20, %v1721_v55  ;;  %vm6064_vm5 = vmmov %vm6063_vm9 }
 0x2ca   : > { %v1728_v5 = vmul.f32 %v1726_v20, %v1724_v26 }
 0x2cb   : > { %v1729_v3 = vadd.f32 %v1727_v44, %v1715_v18 }
 0x2cc   : > { %v1730_v1 = vadd.f32 %v1728_v5, %v1716_v39 }
 0x2cd   : > { %2088 = vrot.lane.b32.xlu0 %v4914_v19, %s6011_s19  ;;  %2116 = vrot.lane.b32.xlu1 %v4840_v16, %s6007_s12  ;;  %v1743_v51 = vadd.f32 %v1741_v52, %v1729_v3  ;;  %v1842_v3 = vstv %s5225_s29  ;;  %s2705_s29 = sld [smem:[#allocation2 + $0xa]] }
 0x2ce   : > { %2076 = vrot.lane.b32.xlu2 %v4917_v31, %s6011_s19  ;;  %v1744_v48 = vadd.f32 %v1742_v34, %v1730_v1 }
 0x2cf   : > { %v1746_v49 = vpop.permute.xlu0 %1745  ;;  %v1774_v8 = vpop.permute.xlu1 %1773 }
 0x2d0   : > { %v5176_v41 = vpop.permute.xlu2 %1816  ;;  %v1750_v45 = vsel %vm6060_vm0, %v1748_v63, %v1746_v49  ;;  %v1749_v61 = vsel %vm6062_vm2, %v1746_v49, %v1748_v63  ;;  %v1777_v20 = vsel %vm731_vm11, %v1774_v8, %v5126_v47  ;;  %vm6065_vm0 = vmmov %vm6064_vm5 }
 0x2d1   : > { %v1752_v14 = vsel %vm363_vm12, %v1750_v45, 0.0  ;;  %v1755_v0 = vmul.f32 %v1754_v32, %v1749_v61  ;;  %vm6066_vm8 = vmmov %vm6065_vm0 }
 0x2d2   : > { %v1756_v37 = vmul.f32 %v1754_v32, %v1752_v14  ;;  %vm6067_vm2 = vmmov %vm6065_vm0 }
 0x2d3   : > { %v1757_v55 = vadd.f32 %v1755_v0, %v1743_v51 }
 0x2d4   : > { %v1758_v29 = vadd.f32 %v1756_v37, %v1744_v48 }
 0x2d5   : > { %2104 = vrot.lane.b32.xlu0 %v4885_v15, %s6007_s12  ;;  %2132 = vrot.lane.b32.xlu1 %v4888_v53, %s6007_s12 }
 0x2d6   : > { %2102 = vrot.lane.b32.xlu2 %v4891_v6, %s6007_s12 }
 0x2d7   : > { %v1762_v40 = vpop.permute.xlu0 %1761  ;;  %v1790_v7 = vpop.permute.xlu1 %1789 }
 0x2d8   : > { %v1836_v4 = vpop.permute.xlu2 %1835  ;;  %v1763_v59 = vsel %vm731_vm11, %v5110_v62, %v1762_v40  ;;  %v1764_v60 = vsel %vm731_vm11, %v1762_v40, %v5110_v62  ;;  %v1778_v62 = vsel %vm731_vm11, %v5126_v47, %v1774_v8  ;;  %v1779_v47 = vsel %vm3464_vm6, %v1777_v20, 0.0 }
 0x2d9   : > { %v1765_v42 = vsel %vm3464_vm6, %v1763_v59, 0.0  ;;  %v1766_v63 = vsel %vm3795_vm15, %v1764_v60, 0.0  ;;  %v1780_v8 = vsel %vm3795_vm15, %v1778_v62, 0.0  ;;  %v1783_v32 = vmul.f32 %v1782_v38, %v1779_v47 }
 0x2da   : > { %v1769_v49 = vmul.f32 %v1768_v22, %v1765_v42  ;;  %v1770_v9 = vmul.f32 %v1768_v22, %v1766_v63  ;;  %v1784_v39 = vmul.f32 %v1782_v38, %v1780_v8  ;;  %v1825_v60 = vstv %s5239_s11  ;;  %s2706_s11 = sld [smem:[#allocation2 + $0x13]] }
 0x2db   : > { %v1805_v62 = vstv %s5255_s17  ;;  %v1861_v38 = vstv %s5269_s0  ;;  %s2707_s17 = sld [smem:[#allocation2 + $0x2]] }
 0x2dc   : > { %v1771_v18 = vadd.f32 %v1769_v49, %v1757_v55  ;;  %v1772_v5 = vadd.f32 %v1770_v9, %v1758_v29  ;;  %s2708_s0 = sld [smem:[#allocation2 + $0xb]] }
 0x2dd   : > { %2130 = vrot.lane.b32.xlu0 %v4914_v19, %s6007_s12  ;;  %2158 = vrot.lane.b32.xlu1 %v4840_v16, %s6008_s9 }
 0x2de   : > { %2118 = vrot.lane.b32.xlu2 %v4917_v31, %s6007_s12  ;;  %v1785_v40 = vadd.f32 %v1783_v32, %v1771_v18  ;;  %v1875_v18 = vstv %s5288_s26  ;;  %s2709_s26 = sld [smem:[#allocation2 + $0x14]] }
 0x2df   : > { %v1788_v26 = vpop.permute.xlu0 %1787  ;;  %v1834_v36 = vpop.permute.xlu1 %1833 }
 0x2e0   : > { %v5241_v23 = vpop.permute.xlu2 %1866  ;;  %v1791_v16 = vsel %vm731_vm11, %v1788_v26, %v1790_v7  ;;  %v1792_v44 = vsel %vm731_vm11, %v1790_v7, %v1788_v26  ;;  %v1837_v35 = vsel %vm6063_vm9, %v1834_v36, %v1836_v4  ;;  %v1838_v56 = vsel %vm6064_vm5, %v1836_v4, %v1834_v36  ;;  %vm6068_vm9 = vmmov %vm6065_vm0 }
 0x2e1   : > { %v1793_v45 = vsel %vm3464_vm6, %v1791_v16, 0.0  ;;  %v1794_v17 = vsel %vm3795_vm15, %v1792_v44, 0.0  ;;  %v1786_v7 = vadd.f32 %v1784_v39, %v1772_v5  ;;  %v1839_v61 = vsel %vm3371_vm3, %v1838_v56, 0.0 }
 0x2e2   : > { %v1797_v25 = vmul.f32 %v1796_v33, %v1793_v45  ;;  %v1798_v30 = vmul.f32 %v1796_v33, %v1794_v17  ;;  %v1840_v14 = vsel %vm3379_vm4, %v1837_v35, 0.0  ;;  %vm6069_vm5 = vcmp.lt.s32.totalorder %v3308_v43, 16 }
 0x2e3   : > { %v1844_v22 = vmul.f32 %v1842_v3, %v1840_v14  ;;  %v1889_v17 = vstv %s2705_s29  ;;  %s5376_s29 = sld [smem:[#allocation2 + $0xc]] }
 0x2e4   : > { %v1799_v4 = vadd.f32 %v1797_v25, %v1785_v40  ;;  %v1800_v59 = vadd.f32 %v1798_v30, %v1786_v7 }
 0x2e5   : > { %2146 = vrot.lane.b32.xlu0 %v4885_v15, %s6008_s9  ;;  %2174 = vrot.lane.b32.xlu1 %v4888_v53, %s6008_s9  ;;  %v1843_v15 = vmul.f32 %v1842_v3, %v1839_v61 }
 0x2e6   : > { %2144 = vrot.lane.b32.xlu2 %v4891_v6, %s6008_s9  ;;  %v1803_v51 = vadd.f32 %v5095_v28, %v1799_v4  ;;  %v1804_v20 = vadd.f32 %v5098_v2, %v1800_v59 }
 0x2e7   : > { %v1819_v1 = vpop.permute.xlu0 %1818  ;;  %v1855_v52 = vpop.permute.xlu1 %1854 }
 0x2e8   : > { %v1883_v42 = vpop.permute.xlu2 %1882  ;;  %v1820_v63 = vsel %vm6065_vm0, %v5176_v41, %v1819_v1  ;;  %v1821_v53 = vsel %vm6066_vm8, %v1819_v1, %v5176_v41  ;;  %v1806_v41 = vadd.f32 %v1805_v62, %v1803_v51  ;;  %v1807_v9 = vadd.f32 %v1805_v62, %v1804_v20  ;;  %vm6070_vm0 = vmmov %vm6069_vm5 }
 0x2e9   : > { %v1822_v6 = vsel %vm3371_vm3, %v1821_v53, 0.0  ;;  %v1823_v34 = vsel %vm3379_vm4, %v1820_v63, 0.0  ;;  %vm6071_vm8 = vmmov %vm6070_vm0  ;;  %v1917_v62 = vstv %s2707_s17  ;;  %s5380_s17 = sld [smem:[#allocation2 + $0x15]] }
 0x2ea   : > { %v1826_v0 = vmul.f32 %v1825_v60, %v1822_v6  ;;  %v1827_v37 = vmul.f32 %v1825_v60, %v1823_v34  ;;  %v5303_v16 = vmax.f32 %v1807_v9, 0.0  ;;  %v5305_v44 = vmax.f32 %v1806_v41, 0.0 }
 0x2eb   : > { %v1931_v41 = vstv %s2708_s0  ;;  %s2713_s0 = sld [smem:[#allocation2 + $0x4]] }
 0x2ec   : > { %v1845_v48 = vadd.f32 %v1843_v15, %v1826_v0  ;;  %v1846_v49 = vadd.f32 %v1844_v22, %v1827_v37 }
 0x2ed   : > { %2172 = vrot.lane.b32.xlu0 %v4914_v19, %s6008_s9 }
 0x2ee   : > { %2160 = vrot.lane.b32.xlu2 %v4917_v31, %s6008_s9 }
 0x2ef   : > { %v1853_v33 = vpop.permute.xlu0 %1852  ;;  %v1881_v55 = vpop.permute.xlu1 %1880 }
 0x2f0   : > { %v1909_v29 = vpop.permute.xlu2 %1908  ;;  %v1856_v28 = vsel %vm6067_vm2, %v1853_v33, %v1855_v52  ;;  %v1857_v2 = vsel %vm6068_vm9, %v1855_v52, %v1853_v33  ;;  %v1884_v19 = vsel %vm6069_vm5, %v1881_v55, %v1883_v42  ;;  %v1885_v31 = vsel %vm6070_vm0, %v1883_v42, %v1881_v55  ;;  %vm6072_vm2 = vmmov %vm6070_vm0 }
 0x2f1   : > { %v1858_v47 = vsel %vm3371_vm3, %v1857_v2, 0.0  ;;  %v1859_v8 = vsel %vm3379_vm4, %v1856_v28, 0.0  ;;  %vm6073_vm9 = vcmp.ge.s32.totalorder %v3308_v43, 16  ;;  %v1891_v61 = vmul.f32 %v1889_v17, %v1884_v19 }
 0x2f2   : > { %v1862_v26 = vmul.f32 %v1861_v38, %v1858_v47  ;;  %v1863_v36 = vmul.f32 %v1861_v38, %v1859_v8  ;;  %v1886_v30 = vsel %vm6073_vm9, %v1885_v31, 0.0  ;;  %vm6074_vm5 = vmmov %vm6073_vm9  ;;  %v1903_v52 = vstv %s2706_s11  ;;  %s5378_s11 = sld [smem:[#allocation2 + $0x3]] }
 0x2f3   : > { %v1890_v4 = vmul.f32 %v1889_v17, %v1886_v30 }
 0x2f4   : > { %v1864_v35 = vadd.f32 %v1862_v26, %v1845_v48  ;;  %v1865_v56 = vadd.f32 %v1863_v36, %v1846_v49 }
 0x2f5   : > { %2198 = vrot.lane.b32.xlu0 %v5303_v16, %s6032_s15 }
 0x2f6   : > { %2196 = vrot.lane.b32.xlu2 %v5305_v44, %s6032_s15 }
 0x2f7   : > { %v1869_v5 = vpop.permute.xlu0 %1868  ;;  %v1897_v45 = vpop.permute.xlu1 %1896 }
 0x2f8   : > { %v1925_v32 = vpop.permute.xlu2 %1924  ;;  %v1870_v39 = vsel %vm6071_vm8, %v5241_v23, %v1869_v5  ;;  %v1871_v25 = vsel %vm6072_vm2, %v1869_v5, %v5241_v23  ;;  %vm6075_vm8 = vmmov %vm6070_vm0  ;;  %vm6076_vm2 = vcmp.lt.s32.totalorder %v3308_v43, 15 }
 0x2f9   : > { %v1872_v3 = vsel %vm6074_vm5, %v1871_v25, 0.0  ;;  %v1877_v40 = vmul.f32 %v1875_v18, %v1870_v39  ;;  %vm6077_vm9 = vmmov %vm6076_vm2 }
 0x2fa   : > { %v1876_v7 = vmul.f32 %v1875_v18, %v1872_v3  ;;  %v1945_v18 = vstv %s2709_s26  ;;  %s5382_s26 = sld [smem:[#allocation2 + $0xd]] }
 0x2fb   : > { %v1879_v14 = vadd.f32 %v1877_v40, %v1865_v56 }
 0x2fc   : > { %v1878_v59 = vadd.f32 %v1876_v7, %v1864_v35 }
 0x2fd   : > { %2222 = vrot.lane.b32.xlu0 %v5305_v44, %s5997_s18  ;;  %v1893_v60 = vadd.f32 %v1891_v61, %v1879_v14 }
 0x2fe   : > { %v1892_v1 = vadd.f32 %v1890_v4, %v1878_v59 }
 0x2ff   : > { %v1895_v15 = vpop.permute.xlu0 %1894  ;;  %v1923_v23 = vpop.permute.xlu1 %1922 }
 0x300   : > { %v5324_v22 = vpop.permute.xlu2 %1950  ;;  %v1898_v42 = vsel %vm6070_vm0, %v1895_v15, %v1897_v45  ;;  %v1899_v63 = vsel %vm6075_vm8, %v1897_v45, %v1895_v15  ;;  %v1926_v53 = vsel %vm6076_vm2, %v1923_v23, %v1925_v32  ;;  %v1927_v6 = vsel %vm6077_vm9, %v1925_v32, %v1923_v23  ;;  %vm6078_vm0 = vmmov %vm6076_vm2 }
 0x301   : > { %v1900_v34 = vsel %vm6074_vm5, %v1899_v63, 0.0  ;;  %v1905_v0 = vmul.f32 %v1903_v52, %v1898_v42  ;;  %vm6079_vm8 = vmmov %vm6078_vm0  ;;  %v1928_v55 = vsel %vm3540_vm10, %v1927_v6, 0.0  ;;  %v1929_v28 = vsel %vm3470_vm7, %v1926_v53, 0.0 }
 0x302   : > { %v1904_v37 = vmul.f32 %v1903_v52, %v1900_v34  ;;  %v1932_v8 = vmul.f32 %v1931_v41, %v1928_v55  ;;  %v1933_v26 = vmul.f32 %v1931_v41, %v1929_v28  ;;  %vm6080_vm2 = vmmov %vm6078_vm0  ;;  %vm6082_vm5 = vcmp.lt.s32.totalorder %v3308_v43, 1 }
 0x303   : > { %v1907_v51 = vadd.f32 %v1905_v0, %v1893_v60  ;;  %vm6081_vm9 = vmmov %vm6078_vm0  ;;  %v1985_v55 = vstv %s5380_s17  ;;  %v1991_v28 = vstv %s2713_s0  ;;  %s5422_s17 = sld [smem:[#allocation2 + $0x17]] }
 0x304   : > { %v1906_v20 = vadd.f32 %v1904_v37, %v1892_v1  ;;  %s5427_s0 = sld [smem:[#allocation2 + $0xf]] }
 0x307   : > { %v1911_v48 = vpop.permute.xlu0 %1910  ;;  %v1939_v49 = vpop.permute.xlu1 %1938 }
 0x308   : > { %v1965_v9 = vpop.permute.xlu2 %1964  ;;  %v1912_v38 = vsel %vm6078_vm0, %v1909_v29, %v1911_v48  ;;  %v1913_v33 = vsel %vm6079_vm8, %v1911_v48, %v1909_v29  ;;  %vm6083_vm0 = vmmov %vm6082_vm5 }
 0x309   : > { %v1914_v2 = vsel %vm3540_vm10, %v1913_v33, 0.0  ;;  %v1915_v19 = vsel %vm3470_vm7, %v1912_v38, 0.0  ;;  %vm6084_vm8 = vmmov %vm6083_vm0 }
 0x30a   : > { %v1918_v31 = vmul.f32 %v1917_v62, %v1914_v2  ;;  %v1919_v47 = vmul.f32 %v1917_v62, %v1915_v19 }
 0x30c   : > { %v1920_v36 = vadd.f32 %v1918_v31, %v1906_v20  ;;  %v1921_v35 = vadd.f32 %v1919_v47, %v1907_v51  ;;  %v1971_v51 = vstv %s5376_s29  ;;  %v1959_v20 = vstv %s5378_s11  ;;  %s5413_s29 = sld [smem:[#allocation2 + $0xe]] }
 0x30d   : > { %s5419_s11 = sld [smem:[#allocation2 + $0x5]] }
 0x30e   : > { %v1934_v56 = vadd.f32 %v1932_v8, %v1920_v36  ;;  %v1935_v29 = vadd.f32 %v1933_v26, %v1921_v35  ;;  %v2001_v8 = vstv %s5382_s26  ;;  %v1992_v26 = vmul.f32 %v4862_v10, %v1991_v28  ;;  %s5435_s26 = sld [smem:[#allocation2 + $0x18]] }
 0x30f   : > { %v1937_v5 = vpop.permute.xlu0 %1936  ;;  %v1963_v45 = vpop.permute.xlu1 %1962 }
 0x310   : > { %v1940_v17 = vsel %vm6080_vm2, %v1937_v5, %v1939_v49  ;;  %v1941_v32 = vsel %vm6081_vm9, %v1939_v49, %v1937_v5  ;;  %v5356_v30 = vpop.permute.xlu2 %2020  ;;  %v1967_v6 = vsel %vm6082_vm5, %v1965_v9, %v1963_v45  ;;  %vm6085_vm2 = vmmov %vm6083_vm0 }
 0x311   : > { %v1942_v39 = vsel %vm3540_vm10, %v1941_v32, 0.0  ;;  %v1943_v25 = vsel %vm3470_vm7, %v1940_v17, 0.0  ;;  %v1966_v48 = vsel %vm6085_vm2, %v1963_v45, %v1965_v9  ;;  %v1968_v49 = vsel %vm3334_vm1, %v1967_v6, 0.0  ;;  %vm6086_vm9 = vmmov %vm6083_vm0  ;;  %v2846_v32 = vld [vmem:[%s3213_s13 + $0x9] ss:$4 sm:$0x3] }
 0x312   : > { %v1946_v3 = vmul.f32 %v1945_v18, %v1942_v39  ;;  %v1947_v40 = vmul.f32 %v1945_v18, %v1943_v25  ;;  %vm6087_vm5 = vmmov %vm6083_vm0  ;;  %v1969_v19 = vsel %vm3379_vm4, %v1966_v48, 0.0  ;;  %v2011_v45 = vstv %s5391_s16  ;;  %s5450_s13 = sld [smem:[#allocation2 + $0x7]] }
 0x313   : > { %v1973_v18 = vmul.f32 %v1971_v51, %v1969_v19  ;;  %v2002_v39 = vmul.f32 %v2846_v32, %v2001_v8  ;;  %v1994_v25 = vperm.slane %v1992_v26, 0  ;;  %v2083_v19 = vstv %s5427_s0  ;;  %s5495_s16 = sld [smem:[#allocation2 + $0x19]] }
 0x314   : > { %v5358_v7 = vadd.f32 %v1946_v3, %v1934_v56  ;;  %v5360_v61 = vadd.f32 %v1947_v40, %v1935_v29  ;;  %v5438_v40 = vmul.f32 %v4865_v54, %v2011_v45  ;;  %s5550_s0 = sld [smem:[#allocation2 + $0x11]] }
 0x315   : > { %v2004_v6 = vperm.slane %v2002_v39, 0 }
 0x317   : > { %v1953_v14 = vpop.permute.xlu0 %1952  ;;  %v1979_v4 = vpop.permute.xlu1 %1978 }
 0x318   : > { %v5362_v59 = vpop.permute.xlu2 %2036  ;;  %v1955_v34 = vsel %vm6083_vm0, %v1953_v14, %v5324_v22  ;;  %v1954_v41 = vsel %vm6086_vm9, %v5324_v22, %v1953_v14  ;;  %v1972_v22 = vmul.f32 %v1971_v51, %v1968_v49  ;;  %vm6088_vm0 = vcmp.lt.s32.totalorder %v3308_v43, 113 }
 0x319   : > { %v1956_v38 = vsel %vm3334_vm1, %v1955_v34, 0.0  ;;  %v1957_v31 = vsel %vm3379_vm4, %v1954_v41, 0.0  ;;  %v2005_v34 = vperm.slane %v2002_v39, 1  ;;  %v2014_v41 = vperm.slane %v5438_v40, 0  ;;  %vm6090_vm2 = vmmov %vm6088_vm0 }
 0x31a   : > { %v1960_v47 = vmul.f32 %v1959_v20, %v1956_v38  ;;  %v1961_v5 = vmul.f32 %v1959_v20, %v1957_v31  ;;  %vm6091_vm9 = vmmov %vm6088_vm0 }
 0x31c   : > { %v1974_v17 = vadd.f32 %v1972_v22, %v1960_v47  ;;  %v1975_v14 = vadd.f32 %v1973_v18, %v1961_v5  ;;  %v2071_v22 = vstv %s5432_s20  ;;  %s5486_s20 = sld [smem:[#allocation2 + $0x10]] }
 0x31f   : > { %v1977_v60 = vpop.permute.xlu0 %1976  ;;  %v5364_v1 = vpop.permute.xlu1 %2034 }
 0x320   : > { %v5366_v52 = vpop.permute.xlu2 %2062  ;;  %v1981_v62 = vsel %vm6084_vm8, %v1979_v4, %v1977_v60  ;;  %v1980_v2 = vsel %vm6087_vm5, %v1977_v60, %v1979_v4  ;;  %v1995_v4 = vperm.slane %v1992_v26, 1  ;;  %v2043_v60 = vstv %s5413_s29  ;;  %vm6089_vm8 = vmmov %vm6088_vm0  ;;  %s5707_s29 = sld [smem:[#allocation7 + $0x3]] }
 0x321   : > { %v1982_v9 = vsel %vm3334_vm1, %v1981_v62, 0.0  ;;  %v1983_v36 = vsel %vm3379_vm4, %v1980_v2, 0.0  ;;  %v2029_v62 = vstv %s5419_s11  ;;  %v2015_v2 = vperm.slane %v5438_v40, 1  ;;  %vm6092_vm5 = vmmov %vm6088_vm0  ;;  %s5517_s11 = sld [smem:[#allocation2 + $0x8]] }
 0x322   : > { %v1986_v35 = vmul.f32 %v1985_v55, %v1982_v9  ;;  %v1987_v10 = vmul.f32 %v1985_v55, %v1983_v36  ;;  %v2057_v9 = vstv %s5422_s17  ;;  %v2097_v36 = vstv %s5435_s26  ;;  %s5559_s26 = sld [smem:[#allocation2 + $0x1a]] }
 0x323   : > { %s5709_s17 = sld [smem:[#allocation7 + $0xa]] }
 0x324   : > { %v1988_v3 = vadd.f32 %v1986_v35, %v1974_v17  ;;  %v1989_v20 = vadd.f32 %v1987_v10, %v1975_v14 }
 0x326   : > { %v1998_v49 = vadd.f32 %v1994_v25, %v1988_v3  ;;  %v2111_v3 = vstv %s5450_s13  ;;  %s1810_s13 = sld [smem:[#allocation8]] }
 0x327   : > { %v5368_v15 = vpop.permute.xlu0 %2022  ;;  %v5370_v23 = vpop.permute.xlu1 %2050 }
 0x328   : > { %v2077_v53 = vpop.permute.xlu2 %2076  ;;  %v2008_v35 = vadd.f32 %v2004_v6, %v1998_v49 }
 0x32f   : > { %v5372_v42 = vpop.permute.xlu0 %2048  ;;  %v5374_v63 = vpop.permute.xlu1 %2074 }
 0x330   : > { %v5406_v33 = vpop.permute.xlu2 %2102  ;;  %v2078_v48 = vsel %vm6088_vm0, %v5374_v63, %v2077_v53  ;;  %v2079_v38 = vsel %vm6090_vm2, %v2077_v53, %v5374_v63 }
 0x331   : > { %v2080_v31 = vsel %vm3334_vm1, %v2078_v48, 0.0  ;;  %v2081_v8 = vsel %vm3675_vm14, %v2079_v38, 0.0 }
 0x332   : > { %v2084_v5 = vmul.f32 %v2083_v19, %v2080_v31  ;;  %v2085_v39 = vmul.f32 %v2083_v19, %v2081_v8  ;;  %v2125_v8 = vstv %s5486_s20  ;;  %s5711_s20 = sld [smem:[#allocation7 + $0x2]] }
 0x337   : > { %v2065_v0 = vpop.permute.xlu0 %2064  ;;  %v5389_v37 = vpop.permute.xlu1 %2090 }
 0x338   : > { %v5441_v51 = vpop.permute.xlu2 %2118  ;;  %v2066_v54 = vsel %vm6089_vm8, %v5366_v52, %v2065_v0  ;;  %v2067_v55 = vsel %vm6091_vm9, %v2065_v0, %v5366_v52  ;;  %v1999_v0 = vadd.f32 %v1995_v4, %v1989_v20  ;;  %vm6093_vm8 = vcmp.lt.s32.totalorder %v3308_v43, 127 }
 0x339   : > { %v2068_v47 = vsel %vm3334_vm1, %v2066_v54, 0.0  ;;  %v2069_v26 = vsel %vm3675_vm14, %v2067_v55, 0.0  ;;  %v2024_v18 = vsel %vm6093_vm8, %v5356_v30, %v5368_v15  ;;  %vm6094_vm2 = vmmov %vm6093_vm8  ;;  %vm6095_vm9 = vcmp.lt.s32.totalorder %v3308_v43, 112 }
 0x33a   : > { %v2072_v45 = vmul.f32 %v2071_v22, %v2068_v47  ;;  %v2073_v10 = vmul.f32 %v2071_v22, %v2069_v26  ;;  %v2009_v25 = vadd.f32 %v2005_v34, %v1999_v0  ;;  %vm6098_vm8 = vmmov %vm6095_vm9  ;;  %v2026_v4 = vsel %vm3464_vm6, %v2024_v18, 0.0 }
 0x33b   : > { %v2018_v54 = vadd.f32 %v2014_v41, %v2008_v35  ;;  %v2030_v31 = vmul.f32 %v2029_v62, %v2026_v4  ;;  %v2139_v35 = vstv %s5495_s16  ;;  %s5713_s16 = sld [smem:[#allocation7 + $0x6]]  ;;  %v2259_v58 = vstv %s5711_s20  ;;  %s2453_s20 = sshll.u32 %s4854_s14, 4  ;;  %s2454_s20 = int_to_ptr.vmem [resolvable:$true] %s2453_s20 }
 0x33c   : > { %v2086_v49 = vadd.f32 %v2084_v5, %v2072_v45  ;;  %v2087_v38 = vadd.f32 %v2085_v39, %v2073_v10  ;;  %v2019_v22 = vadd.f32 %v2015_v2, %v2009_v25 }
 0x33f   : > { %v2089_v56 = vpop.permute.xlu0 %2088  ;;  %v5429_v29 = vpop.permute.xlu1 %2116 }
 0x340   : > { %v2092_v63 = vsel %vm6092_vm5, %v2089_v56, %v5389_v37  ;;  %v2093_v52 = vsel %vm6088_vm0, %v5389_v37, %v2089_v56  ;;  %v2025_v37 = vsel %vm6094_vm2, %v5368_v15, %v5356_v30  ;;  %vm6096_vm5 = vmmov %vm6094_vm2  ;;  %v2145_v20 = vpop.permute.xlu2 %2144 }
 0x341   : > { %v2094_v17 = vsel %vm3334_vm1, %v2092_v63, 0.0  ;;  %v2095_v32 = vsel %vm3675_vm14, %v2093_v52, 0.0  ;;  %v2038_v30 = vsel %vm6096_vm5, %v5364_v1, %v5362_v59  ;;  %vm6097_vm0 = vmmov %vm6094_vm2  ;;  %v2027_v6 = vsel %vm3470_vm7, %v2025_v37, 0.0 }
 0x342   : > { %v5505_v15 = vsel %vm6097_vm0, %v5362_v59, %v5364_v1  ;;  %v2098_v59 = vmul.f32 %v2097_v36, %v2094_v17  ;;  %v2099_v1 = vmul.f32 %v2097_v36, %v2095_v32  ;;  %v2040_v34 = vsel %vm3464_vm6, %v2038_v30, 0.0  ;;  %vm6099_vm2 = vmmov %vm6098_vm8 }
 0x343   : > { %v2121_v55 = vsel %vm6099_vm2, %v5441_v51, %v5429_v29  ;;  %v2031_v47 = vmul.f32 %v2029_v62, %v2027_v6  ;;  %vm6101_vm5 = vmmov %vm6097_vm0  ;;  %v2053_v2 = vsel %vm6097_vm0, %v5370_v23, %v5372_v42  ;;  %v2153_v30 = vstv %s5517_s11  ;;  %s5718_s11 = sld [smem:[#allocation7 + $0xf]] }
 0x344   : > { %v2052_v41 = vsel %vm6101_vm5, %v5372_v42, %v5370_v23  ;;  %v2100_v52 = vadd.f32 %v2098_v59, %v2086_v49  ;;  %v2101_v0 = vadd.f32 %v2099_v1, %v2087_v38  ;;  %v2123_v36 = vsel %vm363_vm12, %v2121_v55, 0.0 }
 0x345   : > { %v2044_v23 = vmul.f32 %v2043_v60, %v2040_v34  ;;  %v2032_v42 = vadd.f32 %v2030_v31, %v2018_v54  ;;  %v2033_v45 = vadd.f32 %v2031_v47, %v2019_v22  ;;  %v2127_v32 = vmul.f32 %v2125_v8, %v2123_v36 }
 0x346   : > { %v2167_v22 = vstv %s5550_s0  ;;  %s5722_s0 = sld [smem:[#allocation7 + $0x5]] }
 0x347   : > { %v2105_v28 = vpop.permute.xlu0 %2104  ;;  %v2133_v53 = vpop.permute.xlu1 %2132  ;;  %v2046_v38 = vadd.f32 %v2044_v23, %v2032_v42 }
 0x348   : > { %v2107_v56 = vsel %vm6095_vm9, %v2105_v28, %v5406_v33  ;;  %v2106_v40 = vsel %vm6098_vm8, %v5406_v33, %v2105_v28  ;;  %v2041_v33 = vsel %vm3470_vm7, %v5505_v15, 0.0  ;;  %vm6100_vm9 = vmmov %vm6099_vm2 }
 0x349   : > { %v2109_v14 = vsel %vm363_vm12, %v2107_v56, 0.0  ;;  %v2112_v28 = vmul.f32 %v2111_v3, %v2106_v40  ;;  %vm6102_vm8 = vmmov %vm6099_vm2 }
 0x34a   : > { %v2113_v19 = vmul.f32 %v2111_v3, %v2109_v14  ;;  %v2120_v62 = vsel %vm6102_vm8, %v5429_v29, %v5441_v51  ;;  %v2054_v29 = vsel %vm3464_vm6, %v2052_v41, 0.0  ;;  %v2055_v51 = vsel %vm3470_vm7, %v2053_v2, 0.0  ;;  %v2161_v3 = vpop.permute.xlu2 %2160 }
 0x34b   : > { %v2114_v18 = vadd.f32 %v2112_v28, %v2100_v52  ;;  %v2126_v17 = vmul.f32 %v2125_v8, %v2120_v62  ;;  %v2058_v54 = vmul.f32 %v2057_v9, %v2054_v29  ;;  %v2059_v49 = vmul.f32 %v2057_v9, %v2055_v51 }
 0x34c   : > { %v2115_v37 = vadd.f32 %v2113_v19, %v2101_v0  ;;  %v2181_v0 = vstv %s5559_s26  ;;  %v2190_v51 = vstv %s1810_s13  ;;  %s5740_s26 = sld [smem:[#allocation7 + $0x7]] }
 0x34d   : > { %v2128_v40 = vadd.f32 %v2126_v17, %v2114_v18  ;;  %s5759_s13 = sld [smem:[#allocation7 + $0xb]] }
 0x34e   : > { %v2129_v14 = vadd.f32 %v2127_v32, %v2115_v37 }
 0x34f   : > { %v2131_v48 = vpop.permute.xlu0 %2130  ;;  %v2159_v26 = vpop.permute.xlu1 %2158 }
 0x350   : > { %v2135_v63 = vsel %vm6100_vm9, %v2133_v53, %v2131_v48  ;;  %v2134_v56 = vsel %vm6099_vm2, %v2131_v48, %v2133_v53  ;;  %v2162_v59 = vsel %vm731_vm11, %v2159_v26, %v2161_v3  ;;  %v2163_v1 = vsel %vm731_vm11, %v2161_v3, %v2159_v26 }
 0x351   : > { %v2137_v5 = vsel %vm363_vm12, %v2135_v63, 0.0  ;;  %v2140_v15 = vmul.f32 %v2139_v35, %v2134_v56  ;;  %v2164_v31 = vsel %vm3464_vm6, %v2162_v59, 0.0  ;;  %v2165_v47 = vsel %vm3795_vm15, %v2163_v1, 0.0 }
 0x352   : > { %v2141_v39 = vmul.f32 %v2139_v35, %v2137_v5  ;;  %v2168_v9 = vmul.f32 %v2167_v22, %v2164_v31  ;;  %v2169_v26 = vmul.f32 %v2167_v22, %v2165_v47  ;;  %vm6104_vm9 = vcmp.lt.s32.totalorder %v3308_v43, 17 }
 0x353   : > { %v2142_v55 = vadd.f32 %v2140_v15, %v2128_v40  ;;  %vm6105_vm5 = vmmov %vm6104_vm9  ;;  %vm6108_vm2 = vcmp.lt.s32.totalorder %v3308_v43, 16 }
 0x354   : > { %v2143_v28 = vadd.f32 %v2141_v39, %v2129_v14  ;;  %vm6106_vm0 = vmmov %vm6105_vm5 }
 0x355   : > { %vm6107_vm8 = vmmov %vm6106_vm0 }
 0x357   : > { %v2147_v53 = vpop.permute.xlu0 %2146  ;;  %v2175_v63 = vpop.permute.xlu1 %2174 }
 0x358   : > { %v2148_v10 = vsel %vm731_vm11, %v2145_v20, %v2147_v53  ;;  %v2149_v25 = vsel %vm731_vm11, %v2147_v53, %v2145_v20  ;;  %v2045_v20 = vmul.f32 %v2043_v60, %v2041_v33  ;;  %v2060_v33 = vadd.f32 %v2058_v54, %v2046_v38 }
 0x359   : > { %v2150_v4 = vsel %vm3464_vm6, %v2148_v10, 0.0  ;;  %v2151_v6 = vsel %vm3795_vm15, %v2149_v25, 0.0 }
 0x35a   : > { %v2154_v48 = vmul.f32 %v2153_v30, %v2150_v4  ;;  %v2155_v34 = vmul.f32 %v2153_v30, %v2151_v6  ;;  %v2047_v19 = vadd.f32 %v2045_v20, %v2033_v45  ;;  %v2186_v23 = vadd.f32 %v2060_v33, %v5358_v7  ;;  %v2197_v7 = vpop.permute.xlu2 %2196 }
 0x35c   : > { %v2156_v41 = vadd.f32 %v2154_v48, %v2142_v55  ;;  %v2157_v60 = vadd.f32 %v2155_v34, %v2143_v28  ;;  %v2061_v52 = vadd.f32 %v2059_v49, %v2047_v19 }
 0x35e   : > { %v2170_v18 = vadd.f32 %v2168_v9, %v2156_v41  ;;  %v2171_v37 = vadd.f32 %v2169_v26, %v2157_v60  ;;  %v2187_v42 = vadd.f32 %v2061_v52, %v5360_v61 }
 0x35f   : > { %v2173_v8 = vpop.permute.xlu0 %2172 }
 0x360   : > { %v2176_v2 = vsel %vm731_vm11, %v2173_v8, %v2175_v63  ;;  %v2177_v62 = vsel %vm731_vm11, %v2175_v63, %v2173_v8 }
 0x361   : > { %v2178_v36 = vsel %vm3464_vm6, %v2176_v2, 0.0  ;;  %v2179_v35 = vsel %vm3795_vm15, %v2177_v62, 0.0 }
 0x362   : > { %v2182_v56 = vmul.f32 %v2181_v0, %v2178_v36  ;;  %v2183_v5 = vmul.f32 %v2181_v0, %v2179_v35 }
 0x364   : > { %v2184_v45 = vadd.f32 %v2182_v56, %v2170_v18  ;;  %v2185_v29 = vadd.f32 %v2183_v5, %v2171_v37 }
 0x366   : > { %v2188_v17 = vadd.f32 %v2186_v23, %v2184_v45  ;;  %v2189_v32 = vadd.f32 %v2187_v42, %v2185_v29 }
 0x367   : > { %v2199_v10 = vpop.permute.xlu0 %2198 }
 0x368   : > { %v2191_v30 = vadd.f32 %v2190_v51, %v2188_v17  ;;  %v2192_v53 = vadd.f32 %v2190_v51, %v2189_v32  ;;  %v2200_v40 = vsel %vm6104_vm9, %v2197_v7, %v2199_v10  ;;  %v2201_v14 = vsel %vm6105_vm5, %v2199_v10, %v2197_v7  ;;  %vm6109_vm9 = vmmov %vm6108_vm2 }
 0x369   : > { %v2202_v59 = vsel %vm3371_vm3, %v2201_v14, 0.0  ;;  %v2203_v1 = vsel %vm3379_vm4, %v2200_v40, 0.0  ;;  %vm6111_vm5 = vcmp.lt.s32.totalorder %v3308_v43, 1  ;;  %v2287_v14 = vstv %s5707_s29 }
 0x36a   : > { %v5595_v15 = vmax.f32 %v2191_v30, 0.0  ;;  %v5597_v39 = vmax.f32 %v2192_v53, 0.0 }
 0x36c   : > { %2238 = vrot.lane.b32.xlu0 %v5597_v39, %s5997_s18  ;;  %2210 = vrot.lane.b32.xlu2 %v5597_v39, %s6032_s15 }
 0x36d   : > { %2208 = vrot.lane.b32.xlu1 %v5595_v15, %s6032_s15  ;;  %s5705_s15 = sld [smem:[#allocation7 + $0xc]] }
 0x36f   : > { %v2223_v3 = vpop.permute.xlu0 %2222 }
 0x373   : > { %v2299_v53 = vstv %s5705_s15 }
 0x374   : > { %2264 = vrot.lane.b32.xlu0 %v5595_v15, %s6005_s28  ;;  %2236 = vrot.lane.b32.xlu2 %v5595_v15, %s5997_s18 }
 0x375   : > { %2224 = vrot.lane.b32.xlu1 %v5303_v16, %s5997_s18  ;;  %s6103_s18 = smov 127  }
 0x37c   : > { %2290 = vrot.lane.b32.xlu0 %v5595_v15, %s6006_s10  ;;  %2252 = vrot.lane.b32.xlu2 %v5303_v16, %s6005_s28 }
 0x37d   : > { %2250 = vrot.lane.b32.xlu1 %v5305_v44, %s6005_s28 }
 0x384   : > { %2346 = vrot.lane.b32.xlu0 %v5303_v16, %s6011_s19  ;;  %2280 = vrot.lane.b32.xlu2 %v5303_v16, %s6006_s10 }
 0x385   : > { %2278 = vrot.lane.b32.xlu1 %v5305_v44, %s6006_s10 }
 0x38c   : > { %2370 = vrot.lane.b32.xlu0 %v5305_v44, %s6007_s12  ;;  %2344 = vrot.lane.b32.xlu2 %v5305_v44, %s6011_s19 }
 0x38d   : > { %2292 = vrot.lane.b32.xlu1 %v5597_v39, %s6006_s10  ;;  %s2729_s10 = sld [smem:[#allocation7 + $0x9]] }
 0x393   : > { %v2217_v34 = vstv %s2729_s10  ;;  %s5838_s10 = sld [smem:[#allocation7 + $0x11]] }
 0x394   : > { %2318 = vrot.lane.b32.xlu0 %v5303_v16, %s6103_s18  ;;  %2358 = vrot.lane.b32.xlu2 %v5597_v39, %s6011_s19 }
 0x395   : > { %2356 = vrot.lane.b32.xlu1 %v5595_v15, %s6011_s19  ;;  %s5699_s19 = sld [smem:[#allocation7 + $0xd]] }
 0x39c   : > { %2266 = vrot.lane.b32.xlu0 %v5597_v39, %s6005_s28  ;;  %2316 = vrot.lane.b32.xlu2 %v5305_v44, %s6103_s18  ;;  %s2204_s28 = sld [smem:[#allocation7]] }
 0x39d   : > { %2372 = vrot.lane.b32.xlu1 %v5303_v16, %s6007_s12 }
 0x3a2   : > { %v2205_v6 = vstv %s2204_s28  ;;  %s5778_s28 = sld [smem:[#allocation7 + $0xe]] }
 0x3a3   : > { %v2206_v28 = vmul.f32 %v2205_v6, %v2202_v59  ;;  %v2207_v19 = vmul.f32 %v2205_v6, %v2203_v1  ;;  %v2311_v59 = vstv %s5699_s19  ;;  %s2754_s19 = sshll.u32 %s3053_s25, 2  ;;  %s6134_s25 = sand.u32 1, %s2973_s22  }
 0x3a4   : > { %2398 = vrot.lane.b32.xlu0 %v5305_v44, %s6008_s9  ;;  %2386 = vrot.lane.b32.xlu2 %v5597_v39, %s6007_s12 }
 0x3a5   : > { %2384 = vrot.lane.b32.xlu1 %v5595_v15, %s6007_s12  ;;  %s2730_s12 = sld [smem:[#allocation7 + $0x1]] }
 0x3ab   : > { %v2231_v41 = vstv %s2730_s12  ;;  %s5845_s12 = sld [smem:[#allocation7 + $0x8]] }
 0x3ac   : > { %2414 = vrot.lane.b32.xlu0 %v5597_v39, %s6008_s9  ;;  %2332 = vrot.lane.b32.xlu2 %v5597_v39, %s6103_s18 }
 0x3ad   : > { %2330 = vrot.lane.b32.xlu1 %v5595_v15, %s6103_s18  ;;  %s5768_s18 = sld [smem:[#allocation7 + $0x10]] }
 0x3b4   : > { %2412 = vrot.lane.b32.xlu2 %v5595_v15, %s6008_s9 }
 0x3b5   : > { %2400 = vrot.lane.b32.xlu1 %v5303_v16, %s6008_s9  ;;  %s5697_s9 = sld [smem:[#allocation7 + $0x4]] }
 0x3bb   : > { %v2305_v32 = vstv %s5697_s9  ;;  %s5874_s9 = sld [smem:[#allocation8 + $0x2]] }
 0x3bc   : > { %v2306_v6 = vmul.f32 %v2305_v32, %v5305_v44 }
 0x3c1   : > { %v2430_v24 = vstv %s5874_s9 }
 0x3c6   : > { %v2211_v61 = vpop.permute.xlu2 %2210 }
 0x3ce   : > { %v5657_v25 = vpop.permute.xlu2 %2236 }
 0x3d6   : > { %v2253_v48 = vpop.permute.xlu2 %2252 }
 0x3de   : > { %v5663_v4 = vpop.permute.xlu0 %2238  ;;  %v2281_v0 = vpop.permute.xlu2 %2280 }
 0x3df   : > { %v2209_v20 = vpop.permute.xlu1 %2208  ;;  %v2241_v40 = vsel %vm6108_vm2, %v5663_v4, %v5657_v25 }
 0x3e0   : > { %v2212_v54 = vsel %vm6106_vm0, %v2209_v20, %v2211_v61  ;;  %v2213_v49 = vsel %vm6107_vm8, %v2211_v61, %v2209_v20  ;;  %vm6112_vm0 = vmmov %vm6111_vm5 }
 0x3e1   : > { %v2214_v38 = vsel %vm3371_vm3, %v2213_v49, 0.0  ;;  %v2215_v55 = vsel %vm3379_vm4, %v2212_v54, 0.0  ;;  %vm6110_vm3 = vcmp.ge.s32.totalorder %v3308_v43, 16  ;;  %vm6113_vm8 = vmmov %vm6112_vm0 }
 0x3e2   : > { %v2218_v22 = vmul.f32 %v2217_v34, %v2214_v38  ;;  %v2219_v31 = vmul.f32 %v2217_v34, %v2215_v55  ;;  %v2245_v38 = vstv %s5709_s17  ;;  %s2452_s17 = scalar_lea.hbm %s5937_s6, %s2754_s19 }
 0x3e4   : > { %v2220_v47 = vadd.f32 %v2218_v22, %v2206_v28  ;;  %v2221_v63 = vadd.f32 %v2219_v31, %v2207_v19  ;;  %v2307_v19 = vmul.f32 %v2305_v32, %v5303_v16  ;;  %v5766_v22 = vmul.f32 %v2311_v59, %v5595_v15 }
 0x3e5   : > { %v2313_v16 = vmul.f32 %v2311_v59, %v5597_v39 }
 0x3e6   : > { %v5677_v60 = vpop.permute.xlu0 %2264  ;;  %v5689_v18 = vpop.permute.xlu2 %2344 }
 0x3e7   : > { %v2225_v33 = vpop.permute.xlu1 %2224 }
 0x3e8   : > { %v2226_v52 = vsel %vm6108_vm2, %v2223_v3, %v2225_v33  ;;  %v2227_v57 = vsel %vm6109_vm9, %v2225_v33, %v2223_v3  ;;  %vm6114_vm9 = vcmp.lt.s32.totalorder %v3308_v43, 15 }
 0x3e9   : > { %v2228_v8 = vsel %vm6110_vm3, %v2227_v57, 0.0  ;;  %v2233_v9 = vmul.f32 %v2231_v41, %v2226_v52  ;;  %vm6115_vm3 = vmmov %vm6114_vm9  ;;  %v2365_v57 = vstv %s5718_s11  ;;  %s2441_s11 = scalar_lea.sflag [#allocation3], %s6134_s25 }
 0x3ea   : > { %v2232_v26 = vmul.f32 %v2231_v41, %v2228_v8  ;;  %v2353_v41 = vstv %s5713_s16  ;;  %s2455_s16 = sshll.u32 %s2452_s17, 4  ;;  %s2456_s16 = int_to_ptr.hbm [resolvable:$true] %s2455_s16 }
 0x3eb   : > { %v5685_v2 = vadd.f32 %v2233_v9, %v2221_v63 }
 0x3ec   : > { %v5687_v62 = vadd.f32 %v2232_v26, %v2220_v47 }
 0x3ee   : > { %v2291_v36 = vpop.permute.xlu0 %2290  ;;  %v5693_v5 = vpop.permute.xlu2 %2358 }
 0x3ef   : > { %v2251_v35 = vpop.permute.xlu1 %2250 }
 0x3f0   : > { %v2254_v1 = vsel %vm6114_vm9, %v2251_v35, %v2253_v48  ;;  %v2255_v34 = vsel %vm6115_vm3, %v2253_v48, %v2251_v35 }
 0x3f6   : > { %v5691_v37 = vpop.permute.xlu0 %2346  ;;  %v5703_v29 = vpop.permute.xlu2 %2316 }
 0x3f7   : > { %v2279_v56 = vpop.permute.xlu1 %2278 }
 0x3f8   : > { %v2282_v30 = vsel %vm6112_vm0, %v2279_v56, %v2281_v0 }
 0x3f9   : > { %v2285_v54 = vsel %vm3379_vm4, %v2282_v30, 0.0 }
 0x3fa   : > { %v2289_v47 = vmul.f32 %v2287_v14, %v2285_v54 }
 0x3fe   : > { %v5695_v23 = vpop.permute.xlu0 %2370  ;;  %v5750_v49 = vpop.permute.xlu2 %2386 }
 0x3ff   : > { %v2293_v42 = vpop.permute.xlu1 %2292 }
 0x400   : > { %v2294_v17 = vsel %vm6111_vm5, %v2291_v36, %v2293_v42  ;;  %v2295_v7 = vsel %vm6113_vm8, %v2293_v42, %v2291_v36  ;;  %vm6116_vm5 = vmmov %vm6112_vm0  ;;  %vm6118_vm8 = vcmp.ge.s32.totalorder %v3308_v43, 16 }
 0x401   : > { %v2297_v61 = vsel %vm3379_vm4, %v2294_v17, 0.0  ;;  %v2283_v20 = vsel %vm6116_vm5, %v2281_v0, %v2279_v56  ;;  %vm6117_vm0 = vmmov %vm6108_vm2  ;;  %v2296_v55 = vsel %vm3334_vm1, %v2295_v7, 0.0  ;;  %v2242_v48 = vsel %vm6118_vm8, %v2241_v40, 0.0 }
 0x402   : > { %v2240_v44 = vsel %vm6117_vm0, %v5657_v25, %v5663_v4  ;;  %v2301_v28 = vmul.f32 %v2299_v53, %v2297_v61  ;;  %v2256_v25 = vsel %vm3540_vm10, %v2255_v34, 0.0  ;;  %v2257_v4 = vsel %vm3470_vm7, %v2254_v1, 0.0 }
 0x403   : > { %v2284_v31 = vsel %vm3334_vm1, %v2283_v20, 0.0  ;;  %v2247_v63 = vmul.f32 %v2245_v38, %v2240_v44  ;;  %v2300_v33 = vmul.f32 %v2299_v53, %v2296_v55  ;;  %v2246_v15 = vmul.f32 %v2245_v38, %v2242_v48 }
 0x404   : > { %v2303_v52 = vadd.f32 %v2301_v28, %v2289_v47  ;;  %v2325_v0 = vstv %s5722_s0  ;;  %v2260_v8 = vmul.f32 %v2259_v58, %v2256_v25  ;;  %v2261_v9 = vmul.f32 %v2259_v58, %v2257_v4  ;;  %s2921_s0 = sshra.s32 %s2456_s16, 4  ;;  %s2922_s0 = int_to_ptr.hbm [resolvable:$true] %s2921_s0 }
 0x405   : > { %v2288_v26 = vmul.f32 %v2287_v14, %v2284_v31  ;;  %vm6119_vm4 = vcmp.lt.s32.totalorder %v3308_v43, 113  ;;  %v2249_v56 = vadd.f32 %v2247_v63, %v5685_v2  ;;  %v2248_v39 = vadd.f32 %v2246_v15, %v5687_v62  ;;  %p2928_p3 = scmp.lt.s32.totalorder %s2922_s0, %s5937_s6 }
 0x406   : > { %v5701_v45 = vpop.permute.xlu0 %2318  ;;  %v2348_v36 = vsel %vm6119_vm4, %v5689_v18, %v5691_v37  ;;  %vm6120_vm2 = vcmp.lt.s32.totalorder %v3308_v43, 127  ;;  %v2379_v17 = vstv %s5740_s26  ;;  %vm6121_vm9 = vmmov %vm6119_vm4  ;;  %v2309_v61 = vadd.f32 %v2307_v19, %v2303_v52  ;;  %v2333_v59 = vpop.permute.xlu2 %2332  ;;  %s2923_s26 = scalar_lea.hbm %s2922_s0, 4 }
 0x407   : > { %v2357_v51 = vpop.permute.xlu1 %2356  ;;  %v2321_v42 = vsel %vm6120_vm2, %v5701_v45, %v5703_v29  ;;  %v2349_v32 = vsel %vm6121_vm9, %v5691_v37, %v5689_v18  ;;  %v2302_v30 = vadd.f32 %v2300_v33, %v2288_v26  ;;  %vm6122_vm3 = vmmov %vm6119_vm4  ;;  %v2350_v7 = vsel %vm3334_vm1, %v2348_v36, 0.0  ;;  %p2924_p0 = scmp.ne.s32.totalorder %s2922_s0, %s2923_s26 }
 0x408   : > { %v2360_v53 = vsel %vm6122_vm3, %v2357_v51, %v5693_v5  ;;  %vm6123_vm5 = vmmov %vm6122_vm3  ;;  %v2273_v40 = vstv %s5759_s13  ;;  %vm6124_vm0 = vcmp.lt.s32.totalorder %v3308_v43, 15  ;;  %v5812_v37 = vadd.f32 %v2260_v8, %v2248_v39 }
 0x409   : > { %v2361_v2 = vsel %vm6123_vm5, %v5693_v5, %v2357_v51  ;;  %v2263_v14 = vadd.f32 %v2261_v9, %v2249_v56  ;;  %v2323_v5 = vsel %vm3470_vm7, %v2321_v42, 0.0  ;;  %v2393_v51 = vstv %s5768_s18  ;;  %vm6125_vm8 = vmmov %vm6120_vm2  ;;  %p2925_p1 = pnand %p2924_p0, %p3070_p5 }
 0x40a   : > { %v2351_v1 = vsel %vm3675_vm14, %v2349_v32, 0.0  ;;  %v2362_v34 = vsel %vm3334_vm1, %v2360_v53, 0.0  ;;  %v2363_v20 = vsel %vm3675_vm14, %v2361_v2, 0.0  ;;  %v2320_v54 = vsel %vm6125_vm8, %v5703_v29, %v5701_v45  ;;  %vm6129_vm2 = vmmov %vm6124_vm0 }
 0x40b   : > { %v2354_v38 = vmul.f32 %v2353_v41, %v2350_v7  ;;  %v2308_v44 = vadd.f32 %v2306_v6, %v2302_v30  ;;  %v2339_v28 = vstv %s5778_s28  ;;  %v2315_v48 = vadd.f32 %v2313_v16, %v2309_v61  ;;  %vm6130_vm9 = vmmov %vm6125_vm8  ;;  %p2926_p2 = pneg %p2925_p1  ;;  %s2927_s28 = scalar_lea.hbm %s5937_s6, 8 }
 0x40c   : > { %v2327_v58 = vmul.f32 %v2325_v0, %v2323_v5  ;;  %vm6126_vm1 = vcmp.lt.s32.totalorder %v3308_v43, 112  ;;  %v2366_v45 = vmul.f32 %v2365_v57, %v2362_v34  ;;  %v2367_v29 = vmul.f32 %v2365_v57, %v2363_v20  ;;  %vm6131_vm3 = vmmov %vm6125_vm8  ;;  %p2929_p4 = scmp.lt.s32.totalorder %s2927_s28, %s2923_s26 }
 0x40d   : > { %vm6127_vm14 = vmmov %vm6126_vm1  ;;  %v2322_v6 = vsel %vm3464_vm6, %v2320_v54, 0.0  ;;  %v2355_v15 = vmul.f32 %v2353_v41, %v2351_v1  ;;  %v2314_v46 = vadd.f32 %v5766_v22, %v2308_v44  ;;  %v2421_v7 = vstv %s5838_s10 }
 0x40e   : > { %v5731_v3 = vpop.permute.xlu0 %2266  ;;  %vm6128_vm4 = vmmov %vm6126_vm1  ;;  %v2368_v57 = vadd.f32 %v2366_v45, %v2354_v38  ;;  %v2326_v8 = vmul.f32 %v2325_v0, %v2322_v6  ;;  %v2413_v39 = vpop.permute.xlu2 %2412  ;;  %v2407_v61 = vstv %s5845_s12  ;;  %p2930_p7 = por %p2929_p4, %p2928_p3 }
 0x40f   : > { %v5729_v10 = vpop.permute.xlu1 %2372  ;;  %v2268_v18 = vsel %vm6124_vm0, %v5677_v60, %v5731_v3  ;;  %v2269_v4 = vsel %vm6129_vm2, %v5731_v3, %v5677_v60  ;;  %vm6132_vm5 = vmmov %vm6126_vm1  ;;  %v2329_v60 = vadd.f32 %v2327_v58, %v2315_v48  ;;  %v2369_v56 = vadd.f32 %v2367_v29, %v2355_v15 }
 0x410   : > { %v2271_v55 = vsel %vm3470_vm7, %v2268_v18, 0.0  ;;  %v2374_v50 = vsel %vm6126_vm1, %v5695_v23, %v5729_v10  ;;  %v2375_v21 = vsel %vm6127_vm14, %v5729_v10, %v5695_v23  ;;  %v2270_v9 = vsel %vm3540_vm10, %v2269_v4, 0.0  ;;  %p2931_p8 = pnand %p2930_p7, %p2926_p2 }
 0x411   : > { %v2275_v23 = vmul.f32 %v2273_v40, %v2271_v55  ;;  %v2377_v47 = vsel %vm363_vm12, %v2375_v21, 0.0  ;;  %v2380_v63 = vmul.f32 %v2379_v17, %v2374_v50  ;;  %v2328_v2 = vadd.f32 %v2326_v8, %v2314_v46 }
 0x413   : > { %v2382_v42 = vadd.f32 %v2380_v63, %v2368_v57 }
 0x416   : > { %v5803_v62 = vpop.permute.xlu0 %2398 }
 0x417   : > { %v2385_v35 = vpop.permute.xlu1 %2384 }
 0x418   : > { %v2389_v19 = vsel %vm6128_vm4, %v5750_v49, %v2385_v35  ;;  %v2388_v33 = vsel %vm6132_vm5, %v2385_v35, %v5750_v49  ;;  %v2381_v49 = vmul.f32 %v2379_v17, %v2377_v47  ;;  %v2277_v35 = vadd.f32 %v2275_v23, %v2263_v14 }
 0x419   : > { %v2391_v3 = vsel %vm363_vm12, %v2389_v19, 0.0  ;;  %v2394_v11 = vmul.f32 %v2393_v51, %v2388_v33  ;;  %v2274_v17 = vmul.f32 %v2273_v40, %v2270_v9 }
 0x41a   : > { %v2395_v32 = vmul.f32 %v2393_v51, %v2391_v3  ;;  %v2383_v22 = vadd.f32 %v2381_v49, %v2369_v56 }
 0x41b   : > { %v2396_v14 = vadd.f32 %v2394_v11, %v2382_v42  ;;  %v2276_v43 = vadd.f32 %v2274_v17, %v5812_v37 }
 0x41c   : > { %v2397_v20 = vadd.f32 %v2395_v32, %v2383_v22 }
 0x41e   : > { %v2415_v36 = vpop.permute.xlu0 %2414 }
 0x41f   : > { %v2331_v25 = vpop.permute.xlu1 %2330  ;;  %v2416_v13 = vsel %vm731_vm11, %v2413_v39, %v2415_v36  ;;  %v2417_v53 = vsel %vm731_vm11, %v2415_v36, %v2413_v39 }
 0x420   : > { %v2334_v10 = vsel %vm6130_vm9, %v2331_v25, %v2333_v59  ;;  %v2335_v31 = vsel %vm6131_vm3, %v2333_v59, %v2331_v25  ;;  %v2418_v51 = vsel %vm3464_vm6, %v2416_v13, 0.0  ;;  %v2419_v40 = vsel %vm3795_vm15, %v2417_v53, 0.0 }
 0x421   : > { %v2337_v16 = vsel %vm3470_vm7, %v2335_v31, 0.0  ;;  %v2336_v26 = vsel %vm3464_vm6, %v2334_v10, 0.0  ;;  %v2423_v55 = vmul.f32 %v2421_v7, %v2419_v40 }
 0x422   : > { %v2341_v52 = vmul.f32 %v2339_v28, %v2337_v16  ;;  %v2340_v0 = vmul.f32 %v2339_v28, %v2336_v26 }
 0x424   : > { %v2343_v41 = vadd.f32 %v2341_v52, %v2329_v60  ;;  %v2342_v54 = vadd.f32 %v2340_v0, %v2328_v2 }
 0x426   : > { %v2427_v30 = vadd.f32 %v2343_v41, %v2277_v35  ;;  %v2426_v58 = vadd.f32 %v2342_v54, %v2276_v43 }
 0x427   : > { %v2401_v18 = vpop.permute.xlu1 %2400 }
 0x428   : > { %v2402_v59 = vsel %vm731_vm11, %v5803_v62, %v2401_v18  ;;  %v2403_v5 = vsel %vm731_vm11, %v2401_v18, %v5803_v62  ;;  %v2422_v62 = vmul.f32 %v2421_v7, %v2418_v51 }
 0x429   : > { %v2404_v1 = vsel %vm3464_vm6, %v2402_v59, 0.0  ;;  %v2405_v34 = vsel %vm3795_vm15, %v2403_v5, 0.0  ;;  %vm6133_vm6 = vcmask 1040384  }
 0x42a   : > { %v2408_v38 = vmul.f32 %v2407_v61, %v2404_v1  ;;  %v2409_v44 = vmul.f32 %v2407_v61, %v2405_v34 }
 0x42c   : > { %v2410_v28 = vadd.f32 %v2408_v38, %v2396_v14  ;;  %v2411_v48 = vadd.f32 %v2409_v44, %v2397_v20 }
 0x42e   : > { %v2424_v12 = vadd.f32 %v2422_v62, %v2410_v28  ;;  %v2425_v50 = vadd.f32 %v2423_v55, %v2411_v48 }
 0x430   : > { %v2428_v21 = vadd.f32 %v2426_v58, %v2424_v12  ;;  %v2429_v45 = vadd.f32 %v2427_v30, %v2425_v50 }
 0x432   : > { %v2432_v37 = vadd.f32 %v2430_v24, %v2429_v45  ;;  %v2431_v29 = vadd.f32 %v2430_v24, %v2428_v21 }
 0x434   : > { %v2435_v6 = vrot.slane %v2432_v37, 7 }
 0x436   : > { %v2436_v19 = vsel %vm6133_vm6, %v2431_v29, %v2435_v6 }
 0x437   : > { %2746 = vst.msk [vmem:[%s4854_s14 + $0x2] sm:$0x3] %vm4843_vm13, %v2436_v19 }
 0x438   : > { %2934 = shalt.err (!%p2931_p8)
}
 0x439   : > { %s2995_s14 = smov 32   ;;  %s2996_s9 = smov 2  }
 0x43a   : > { %2771 = dma.vmem_to_hbm [thread:$0]  (%p3070_p5), %s2454_s20, 64, %s2456_s16, %s2441_s11, %s2995_s14, %s2995_s14, %s2996_s9  }
 0x43b PF: > { %p2798_p9 = scmp.ge.s32.totalorder %s2981_s24, 2  ;;  %s2470_s19 = sand.u32 1, %s2969_s21  }
 0x43c   : > { %s2471_s15 = scalar_lea.sflag [#allocation3], %s2470_s19 }
 0x43d   : > { %p2787_p10 = pnand %p2798_p9, %p3074_p6 }
 0x43f   : > { %p2788_p11 = pneg %p2787_p10 }
 0x441   : > { %2964 = dma.done.wait (%p2788_p11), %s2471_s15, 64  }
 0x442   : > { %2966 = vsyncadd (%p2788_p11), %s2471_s15, 4294967232  ;;  %p19_p12 = scmp.ge.s32.totalorder %s3057_s27, 4   ;;  %s6135_s21 = smov %s2973_s22 }
 0x443   : > { %s6136_s22 = smov %s2977_s23  ;;  %s6137_s23 = smov %s3068_s30 }
 0x444   : > { %s6138_s24 = smov %s3057_s27  ;;  %21 = sbr.rel (!%p19_p12) target bundleno = 8 (0x8), region = 110 }
 0x449   :  { %2477 = vsyncpa [#allocation3], 1 }
 0x44a   :  { %2479 = vsyncpa [#allocation3 + $0x1], 1 }
 0x44b   :  { %2480 = vsyncpa [#allocation4], 1 }
 0x44c   :  { %2482 = vsyncpa [#allocation4 + $0x1], 1 }
 0x44d   :  { %2483 = vsyncpa [#allocation6], 1 }
 0x44e   :  { %2484 = vsyncpa [#allocation9], 1 }

</bundles_post_ra>
